<compile_context>
chip_gen: v7x
topology: tpu7x:2x2x1
jax: 0.10.0
libtpu: 0.0.40
codegen_flags: <defaults>
</compile_context>

<pallas_src>
import functools

import jax
import jax.numpy as jnp
from jax.experimental import pallas as pl
from jax.experimental.pallas import tpu as pltpu


# ---------------------------------------------------------------------------
# Pallas kernel: fused conv(kxk, pad=(k-1)/2) + folded-BN bias [+res] [+relu]
# ---------------------------------------------------------------------------
def _make_conv_kernel(ksize: int, H: int, W: int, has_residual: bool, apply_relu: bool):
    def kernel(*refs):
        if has_residual:
            x_ref, w_ref, b_ref, res_ref, o_ref = refs
        else:
            x_ref, w_ref, b_ref, o_ref = refs
            res_ref = None

        cout = w_ref.shape[-1]
        M = H * W
        x = x_ref[0]                      # (Hp, Wp, Cin) bf16, resident in VMEM/vregs

        acc = None                        # f32 accumulator, (M, Cout)
        for kh in range(ksize):           # unrolled 9 (or 1) MXU dots, no im2col
            for kw in range(ksize):
                tap = x[kh:kh + H, kw:kw + W, :]
                d = jnp.dot(
                    tap.reshape(M, tap.shape[-1]),
                    w_ref[kh * ksize + kw],
                    preferred_element_type=jnp.float32,
                )
                acc = d if acc is None else acc + d

        acc = acc + b_ref[...]                                   # folded conv+BN bias, f32
        if has_residual:
            acc = acc + res_ref[0].reshape(M, cout).astype(jnp.float32)
        if apply_relu:
            acc = jnp.maximum(acc, 0.0)
        o_ref[0] = acc.reshape(H, W, cout).astype(o_ref.dtype)   # f32 epilogue, cast at store

    return kernel


def fused_conv_bn(x_nhwc, w_folded, b_folded, *, relu, residual=None,
                  out_dtype=jnp.float32):
    """out = [relu]( conv(x, w_folded) + b_folded [+ residual] ).

    x_nhwc:   [B, H, W, Cin]
    w_folded: [k*k, Cin, Cout]  (BatchNorm already folded in)
    b_folded: [Cout]
    """
    B, H, W, Cin = x_nhwc.shape
    KK, _, Cout = w_folded.shape
    ksize = int(round(KK ** 0.5))
    pad = (ksize - 1) // 2

    xp = x_nhwc.astype(jnp.bfloat16)
    if pad:
        xp = jnp.pad(xp, ((0, 0), (pad, pad), (pad, pad), (0, 0)))
    Hp, Wp = H + 2 * pad, W + 2 * pad

    w_bf = w_folded.astype(jnp.bfloat16)
    b2 = b_folded.reshape(1, Cout).astype(jnp.float32)

    in_specs = [
        pl.BlockSpec((1, Hp, Wp, Cin), lambda b: (b, 0, 0, 0)),   # whole padded activation
        pl.BlockSpec((KK, Cin, Cout), lambda b: (0, 0, 0)),       # all taps' weights
        pl.BlockSpec((1, Cout), lambda b: (0, 0)),
    ]
    args = [xp, w_bf, b2]
    if residual is not None:
        in_specs.append(pl.BlockSpec((1, H, W, Cout), lambda b: (b, 0, 0, 0)))
        args.append(residual.astype(jnp.bfloat16))

    kernel = _make_conv_kernel(ksize, H, W, residual is not None, relu)
    return pl.pallas_call(
        kernel,
        out_shape=jax.ShapeDtypeStruct((B, H, W, Cout), out_dtype),
        grid=(B,),                                               # >=2 steps -> v7x megacore
        in_specs=in_specs,
        out_specs=pl.BlockSpec((1, H, W, Cout), lambda b: (b, 0, 0, 0)),
        compiler_params=pltpu.CompilerParams(dimension_semantics=("parallel",)),
    )(*args)


# ---------------------------------------------------------------------------
# Pure-JAX reference with identical numerics (bf16 operands, f32 accumulate)
# ---------------------------------------------------------------------------
def conv_bn_ref(x_nhwc, w_folded, b_folded, *, relu, residual=None,
                out_dtype=jnp.float32):
    B, H, W, Cin = x_nhwc.shape
    KK, _, Cout = w_folded.shape
    ksize = int(round(KK ** 0.5))
    pad = (ksize - 1) // 2
    xp = x_nhwc.astype(jnp.bfloat16)
    if pad:
        xp = jnp.pad(xp, ((0, 0), (pad, pad), (pad, pad), (0, 0)))
    wb = w_folded.astype(jnp.bfloat16)
    acc = jnp.zeros((B, H, W, Cout), jnp.float32)
    for kh in range(ksize):
        for kw in range(ksize):
            acc = acc + jnp.einsum(
                "bhwc,co->bhwo", xp[:, kh:kh + H, kw:kw + W, :], wb[kh * ksize + kw],
                preferred_element_type=jnp.float32)
    acc = acc + b_folded.astype(jnp.float32)[None, None, None, :]
    if residual is not None:
        acc = acc + residual.astype(jnp.float32)
    if relu:
        acc = jnp.maximum(acc, 0.0)
    return acc.astype(out_dtype)


# ---------------------------------------------------------------------------
# ResidualBlock forward (matches the PyTorch module's forward())
# ---------------------------------------------------------------------------
def residual_block(x_nchw, params, conv_fn):
    """x_nchw: [B, Cin, H, W]  ->  [B, Cout, H, W] (float32)."""
    x = jnp.transpose(x_nchw.astype(jnp.float32), (0, 2, 3, 1))          # NCHW -> NHWC
    out = conv_fn(x, params["conv1_w"], params["conv1_b"], relu=True,
                  out_dtype=jnp.bfloat16)                                # relu(bn1(conv1))
    if "sc_w" in params:                                                 # 1x1 conv + BN shortcut
        shortcut = conv_fn(x, params["sc_w"], params["sc_b"], relu=False,
                           out_dtype=jnp.bfloat16)
    else:                                                                # identity shortcut
        shortcut = x.astype(jnp.bfloat16)
    out = conv_fn(out, params["conv2_w"], params["conv2_b"], relu=True,
                  residual=shortcut, out_dtype=jnp.float32)              # relu(bn2(conv2)+sc)
    return jnp.transpose(out, (0, 3, 1, 2))                              # NHWC -> NCHW


# ---------------------------------------------------------------------------
# Parameters (BatchNorm folded at init; weights stored as [k*k, Cin, Cout],
# i.e. the transpose(2,3,1,0).reshape of PyTorch's [Cout, Cin, kh, kw]).
# ---------------------------------------------------------------------------
def _init_conv_bn_folded(key, cin, cout, ksize, eps=1e-5):
    kw_, kb, kg, kbe, km, kv = jax.random.split(key, 6)
    w = jax.random.normal(kw_, (ksize * ksize, cin, cout), jnp.float32) * 0.05
    b = jax.random.normal(kb, (cout,), jnp.float32) * 0.05
    gamma = 1.0 + 0.1 * jax.random.normal(kg, (cout,), jnp.float32)
    beta = 0.1 * jax.random.normal(kbe, (cout,), jnp.float32)
    mean = 0.1 * jax.random.normal(km, (cout,), jnp.float32)
    var = 1.0 + 0.1 * jax.random.uniform(kv, (cout,), jnp.float32)
    scale = gamma / jnp.sqrt(var + eps)                  # inference-mode BN fold
    w_folded = w * scale[None, None, :]
    b_folded = (b - mean) * scale + beta
    return w_folded, b_folded


def init_residual_block_params(key, in_channels, out_channels):
    k1, k2, k3 = jax.random.split(key, 3)
    p = {}
    p["conv1_w"], p["conv1_b"] = _init_conv_bn_folded(k1, in_channels, out_channels, 3)
    p["conv2_w"], p["conv2_b"] = _init_conv_bn_folded(k2, out_channels, out_channels, 3)
    if in_channels != out_channels:
        p["sc_w"], p["sc_b"] = _init_conv_bn_folded(k3, in_channels, out_channels, 1)
    return p


if __name__ == "__main__":
    key = jax.random.PRNGKey(0)
    k_p1, k_p2, k_x = jax.random.split(key, 3)

    B, H, W = 2, 16, 16
    fwd_pallas = jax.jit(functools.partial(residual_block, conv_fn=fused_conv_bn))
    fwd_ref = jax.jit(functools.partial(residual_block, conv_fn=conv_bn_ref))

    # Case 1: identity shortcut (in_channels == out_channels == 64)
    params1 = init_residual_block_params(k_p1, 64, 64)
    x = jax.random.normal(k_x, (B, 64, H, W), jnp.float32)
    out1 = jax.block_until_ready(fwd_pallas(x, params1))
    ref1 = jax.block_until_ready(fwd_ref(x, params1))
    assert out1.shape == (B, 64, H, W) and out1.dtype == jnp.float32
    err1 = float(jnp.max(jnp.abs(out1 - ref1)))
    assert err1 <= 1e-2 + 1e-2 * float(jnp.max(jnp.abs(ref1))), ("case1", err1)

    # Case 2: projection shortcut (1x1 conv + BN), 64 -> 128 channels
    # (Cout=128 also makes every output store lane-dense.)
    params2 = init_residual_block_params(k_p2, 64, 128)
    out2 = jax.block_until_ready(fwd_pallas(x, params2))
    ref2 = jax.block_until_ready(fwd_ref(x, params2))
    assert out2.shape == (B, 128, H, W) and out2.dtype == jnp.float32
    err2 = float(jnp.max(jnp.abs(out2 - ref2)))
    assert err2 <= 1e-2 + 1e-2 * float(jnp.max(jnp.abs(ref2))), ("case2", err2)

    print("KERNEL_OK")
</pallas_src>

<mosaic_0001>
module attributes {stable_mosaic.version = 11 : i64} {
  func.func @kernel(%arg0: i32, %arg1: memref<1x18x18x64xbf16, #tpu.memory_space<vmem>>, %arg2: memref<9x64x64xbf16, #tpu.memory_space<vmem>>, %arg3: memref<1x64xf32, #tpu.memory_space<vmem>>, %arg4: memref<1x16x16x64xbf16, #tpu.memory_space<vmem>>) attributes {dimension_semantics = [#tpu.dimension_semantics<parallel>], iteration_bounds = array<i64: 2>, scalar_prefetch = 0 : i64, scratch_operands = 0 : i64, tpu.core_type = #tpu.core_type<tc>, window_params = [{transform_indices = @transform_0, window_bounds = array<i64: 1, 18, 18, 64>}, {pipeline_mode = #tpu.pipeline_mode<synchronous>, transform_indices = @transform_1, window_bounds = array<i64: 9, 64, 64>}, {pipeline_mode = #tpu.pipeline_mode<synchronous>, transform_indices = @transform_2, window_bounds = array<i64: 1, 64>}, {transform_indices = @transform_3, window_bounds = array<i64: 1, 16, 16, 64>}]} {
    %c0 = arith.constant 0 : index
    %c0_0 = arith.constant 0 : index
    %c0_1 = arith.constant 0 : index
    %c0_2 = arith.constant 0 : index
    %0 = vector.load %arg1[%c0, %c0_0, %c0_1, %c0_2] : memref<1x18x18x64xbf16, #tpu.memory_space<vmem>>, vector<1x18x18x64xbf16>
    %1 = vector.shape_cast %0 : vector<1x18x18x64xbf16> to vector<18x18x64xbf16>
    %2 = vector.extract_strided_slice %1 {offsets = [0, 0, 0], sizes = [16, 16, 64], strides = [1, 1, 1]} : vector<18x18x64xbf16> to vector<16x16x64xbf16>
    %3 = vector.shape_cast %2 : vector<16x16x64xbf16> to vector<256x64xbf16>
    %c0_3 = arith.constant 0 : index
    %c0_4 = arith.constant 0 : index
    %c0_5 = arith.constant 0 : index
    %4 = vector.load %arg2[%c0_3, %c0_4, %c0_5] : memref<9x64x64xbf16, #tpu.memory_space<vmem>>, vector<1x64x64xbf16>
    %5 = vector.shape_cast %4 : vector<1x64x64xbf16> to vector<64x64xbf16>
    %cst = arith.constant dense<0.000000e+00> : vector<256x64xf32>
    %6 = tpu.matmul %3, %5, %cst {dimension_numbers = #tpu.dot_dimension_numbers<[1], [0], [0], [1], [0, 0, 1, 1], [], []>} : vector<256x64xbf16>, vector<64x64xbf16>, vector<256x64xf32> -> vector<256x64xf32>
    %7 = vector.extract_strided_slice %1 {offsets = [0, 1, 0], sizes = [16, 16, 64], strides = [1, 1, 1]} : vector<18x18x64xbf16> to vector<16x16x64xbf16>
    %8 = vector.shape_cast %7 : vector<16x16x64xbf16> to vector<256x64xbf16>
    %c1 = arith.constant 1 : index
    %c0_6 = arith.constant 0 : index
    %c0_7 = arith.constant 0 : index
    %9 = vector.load %arg2[%c1, %c0_6, %c0_7] : memref<9x64x64xbf16, #tpu.memory_space<vmem>>, vector<1x64x64xbf16>
    %10 = vector.shape_cast %9 : vector<1x64x64xbf16> to vector<64x64xbf16>
    %cst_8 = arith.constant dense<0.000000e+00> : vector<256x64xf32>
    %11 = tpu.matmul %8, %10, %cst_8 {dimension_numbers = #tpu.dot_dimension_numbers<[1], [0], [0], [1], [0, 0, 1, 1], [], []>} : vector<256x64xbf16>, vector<64x64xbf16>, vector<256x64xf32> -> vector<256x64xf32>
    %12 = arith.addf %6, %11 : vector<256x64xf32>
    %13 = vector.extract_strided_slice %1 {offsets = [0, 2, 0], sizes = [16, 16, 64], strides = [1, 1, 1]} : vector<18x18x64xbf16> to vector<16x16x64xbf16>
    %14 = vector.shape_cast %13 : vector<16x16x64xbf16> to vector<256x64xbf16>
    %c2 = arith.constant 2 : index
    %c0_9 = arith.constant 0 : index
    %c0_10 = arith.constant 0 : index
    %15 = vector.load %arg2[%c2, %c0_9, %c0_10] : memref<9x64x64xbf16, #tpu.memory_space<vmem>>, vector<1x64x64xbf16>
    %16 = vector.shape_cast %15 : vector<1x64x64xbf16> to vector<64x64xbf16>
    %cst_11 = arith.constant dense<0.000000e+00> : vector<256x64xf32>
    %17 = tpu.matmul %14, %16, %cst_11 {dimension_numbers = #tpu.dot_dimension_numbers<[1], [0], [0], [1], [0, 0, 1, 1], [], []>} : vector<256x64xbf16>, vector<64x64xbf16>, vector<256x64xf32> -> vector<256x64xf32>
    %18 = arith.addf %12, %17 : vector<256x64xf32>
    %19 = vector.extract_strided_slice %1 {offsets = [1, 0, 0], sizes = [16, 16, 64], strides = [1, 1, 1]} : vector<18x18x64xbf16> to vector<16x16x64xbf16>
    %20 = vector.shape_cast %19 : vector<16x16x64xbf16> to vector<256x64xbf16>
    %c3 = arith.constant 3 : index
    %c0_12 = arith.constant 0 : index
    %c0_13 = arith.constant 0 : index
    %21 = vector.load %arg2[%c3, %c0_12, %c0_13] : memref<9x64x64xbf16, #tpu.memory_space<vmem>>, vector<1x64x64xbf16>
    %22 = vector.shape_cast %21 : vector<1x64x64xbf16> to vector<64x64xbf16>
    %cst_14 = arith.constant dense<0.000000e+00> : vector<256x64xf32>
    %23 = tpu.matmul %20, %22, %cst_14 {dimension_numbers = #tpu.dot_dimension_numbers<[1], [0], [0], [1], [0, 0, 1, 1], [], []>} : vector<256x64xbf16>, vector<64x64xbf16>, vector<256x64xf32> -> vector<256x64xf32>
    %24 = arith.addf %18, %23 : vector<256x64xf32>
    %25 = vector.extract_strided_slice %1 {offsets = [1, 1, 0], sizes = [16, 16, 64], strides = [1, 1, 1]} : vector<18x18x64xbf16> to vector<16x16x64xbf16>
    %26 = vector.shape_cast %25 : vector<16x16x64xbf16> to vector<256x64xbf16>
    %c4 = arith.constant 4 : index
    %c0_15 = arith.constant 0 : index
    %c0_16 = arith.constant 0 : index
    %27 = vector.load %arg2[%c4, %c0_15, %c0_16] : memref<9x64x64xbf16, #tpu.memory_space<vmem>>, vector<1x64x64xbf16>
    %28 = vector.shape_cast %27 : vector<1x64x64xbf16> to vector<64x64xbf16>
    %cst_17 = arith.constant dense<0.000000e+00> : vector<256x64xf32>
    %29 = tpu.matmul %26, %28, %cst_17 {dimension_numbers = #tpu.dot_dimension_numbers<[1], [0], [0], [1], [0, 0, 1, 1], [], []>} : vector<256x64xbf16>, vector<64x64xbf16>, vector<256x64xf32> -> vector<256x64xf32>
    %30 = arith.addf %24, %29 : vector<256x64xf32>
    %31 = vector.extract_strided_slice %1 {offsets = [1, 2, 0], sizes = [16, 16, 64], strides = [1, 1, 1]} : vector<18x18x64xbf16> to vector<16x16x64xbf16>
    %32 = vector.shape_cast %31 : vector<16x16x64xbf16> to vector<256x64xbf16>
    %c5 = arith.constant 5 : index
    %c0_18 = arith.constant 0 : index
    %c0_19 = arith.constant 0 : index
    %33 = vector.load %arg2[%c5, %c0_18, %c0_19] : memref<9x64x64xbf16, #tpu.memory_space<vmem>>, vector<1x64x64xbf16>
    %34 = vector.shape_cast %33 : vector<1x64x64xbf16> to vector<64x64xbf16>
    %cst_20 = arith.constant dense<0.000000e+00> : vector<256x64xf32>
    %35 = tpu.matmul %32, %34, %cst_20 {dimension_numbers = #tpu.dot_dimension_numbers<[1], [0], [0], [1], [0, 0, 1, 1], [], []>} : vector<256x64xbf16>, vector<64x64xbf16>, vector<256x64xf32> -> vector<256x64xf32>
    %36 = arith.addf %30, %35 : vector<256x64xf32>
    %37 = vector.extract_strided_slice %1 {offsets = [2, 0, 0], sizes = [16, 16, 64], strides = [1, 1, 1]} : vector<18x18x64xbf16> to vector<16x16x64xbf16>
    %38 = vector.shape_cast %37 : vector<16x16x64xbf16> to vector<256x64xbf16>
    %c6 = arith.constant 6 : index
    %c0_21 = arith.constant 0 : index
    %c0_22 = arith.constant 0 : index
    %39 = vector.load %arg2[%c6, %c0_21, %c0_22] : memref<9x64x64xbf16, #tpu.memory_space<vmem>>, vector<1x64x64xbf16>
    %40 = vector.shape_cast %39 : vector<1x64x64xbf16> to vector<64x64xbf16>
    %cst_23 = arith.constant dense<0.000000e+00> : vector<256x64xf32>
    %41 = tpu.matmul %38, %40, %cst_23 {dimension_numbers = #tpu.dot_dimension_numbers<[1], [0], [0], [1], [0, 0, 1, 1], [], []>} : vector<256x64xbf16>, vector<64x64xbf16>, vector<256x64xf32> -> vector<256x64xf32>
    %42 = arith.addf %36, %41 : vector<256x64xf32>
    %43 = vector.extract_strided_slice %1 {offsets = [2, 1, 0], sizes = [16, 16, 64], strides = [1, 1, 1]} : vector<18x18x64xbf16> to vector<16x16x64xbf16>
    %44 = vector.shape_cast %43 : vector<16x16x64xbf16> to vector<256x64xbf16>
    %c7 = arith.constant 7 : index
    %c0_24 = arith.constant 0 : index
    %c0_25 = arith.constant 0 : index
    %45 = vector.load %arg2[%c7, %c0_24, %c0_25] : memref<9x64x64xbf16, #tpu.memory_space<vmem>>, vector<1x64x64xbf16>
    %46 = vector.shape_cast %45 : vector<1x64x64xbf16> to vector<64x64xbf16>
    %cst_26 = arith.constant dense<0.000000e+00> : vector<256x64xf32>
    %47 = tpu.matmul %44, %46, %cst_26 {dimension_numbers = #tpu.dot_dimension_numbers<[1], [0], [0], [1], [0, 0, 1, 1], [], []>} : vector<256x64xbf16>, vector<64x64xbf16>, vector<256x64xf32> -> vector<256x64xf32>
    %48 = arith.addf %42, %47 : vector<256x64xf32>
    %49 = vector.extract_strided_slice %1 {offsets = [2, 2, 0], sizes = [16, 16, 64], strides = [1, 1, 1]} : vector<18x18x64xbf16> to vector<16x16x64xbf16>
    %50 = vector.shape_cast %49 : vector<16x16x64xbf16> to vector<256x64xbf16>
    %c8 = arith.constant 8 : index
    %c0_27 = arith.constant 0 : index
    %c0_28 = arith.constant 0 : index
    %51 = vector.load %arg2[%c8, %c0_27, %c0_28] : memref<9x64x64xbf16, #tpu.memory_space<vmem>>, vector<1x64x64xbf16>
    %52 = vector.shape_cast %51 : vector<1x64x64xbf16> to vector<64x64xbf16>
    %cst_29 = arith.constant dense<0.000000e+00> : vector<256x64xf32>
    %53 = tpu.matmul %50, %52, %cst_29 {dimension_numbers = #tpu.dot_dimension_numbers<[1], [0], [0], [1], [0, 0, 1, 1], [], []>} : vector<256x64xbf16>, vector<64x64xbf16>, vector<256x64xf32> -> vector<256x64xf32>
    %54 = arith.addf %48, %53 : vector<256x64xf32>
    %c0_30 = arith.constant 0 : index
    %c0_31 = arith.constant 0 : index
    %55 = vector.load %arg3[%c0_30, %c0_31] : memref<1x64xf32, #tpu.memory_space<vmem>>, vector<1x64xf32>
    %56 = vector.broadcast %55 : vector<1x64xf32> to vector<256x64xf32>
    %57 = arith.addf %54, %56 : vector<256x64xf32>
    %cst_32 = arith.constant 0.000000e+00 : f32
    %58 = vector.broadcast %cst_32 : f32 to vector<256x64xf32>
    %59 = arith.maximumf %57, %58 : vector<256x64xf32>
    %60 = vector.shape_cast %59 : vector<256x64xf32> to vector<16x16x64xf32>
    %61 = arith.truncf %60 : vector<16x16x64xf32> to vector<16x16x64xbf16>
    %c0_33 = arith.constant 0 : index
    %c0_34 = arith.constant 0 : index
    %c0_35 = arith.constant 0 : index
    %c0_36 = arith.constant 0 : index
    %62 = vector.load %arg4[%c0_33, %c0_34, %c0_35, %c0_36] : memref<1x16x16x64xbf16, #tpu.memory_space<vmem>>, vector<1x16x16x64xbf16>
    %63 = vector.shape_cast %62 : vector<1x16x16x64xbf16> to vector<16x16x64xbf16>
    %64 = vector.shape_cast %61 : vector<16x16x64xbf16> to vector<1x16x16x64xbf16>
    tpu.vector_store %arg4[%c0_33, %c0_34, %c0_35, %c0_36], %64 {strides = array<i32>} : memref<1x16x16x64xbf16, #tpu.memory_space<vmem>>, vector<1x16x16x64xbf16>,
    return
  }
  func.func @transform_0(%arg0: i32) -> (i32, i32, i32, i32) {
    %c0_i32 = arith.constant 0 : i32
    %c0_i32_0 = arith.constant 0 : i32
    %c0_i32_1 = arith.constant 0 : i32
    %c0_i32_2 = arith.constant 0 : i32
    return %arg0, %c0_i32, %c0_i32_0, %c0_i32_1 : i32, i32, i32, i32
  }
  func.func @transform_1(%arg0: i32) -> (i32, i32, i32) {
    %c0_i32 = arith.constant 0 : i32
    %c0_i32_0 = arith.constant 0 : i32
    %c0_i32_1 = arith.constant 0 : i32
    %c0_i32_2 = arith.constant 0 : i32
    return %c0_i32, %c0_i32_0, %c0_i32_1 : i32, i32, i32
  }
  func.func @transform_2(%arg0: i32) -> (i32, i32) {
    %c0_i32 = arith.constant 0 : i32
    %c0_i32_0 = arith.constant 0 : i32
    %c0_i32_1 = arith.constant 0 : i32
    return %c0_i32, %c0_i32_0 : i32, i32
  }
  func.func @transform_3(%arg0: i32) -> (i32, i32, i32, i32) {
    %c0_i32 = arith.constant 0 : i32
    %c0_i32_0 = arith.constant 0 : i32
    %c0_i32_1 = arith.constant 0 : i32
    %c0_i32_2 = arith.constant 0 : i32
    return %arg0, %c0_i32, %c0_i32_0, %c0_i32_1 : i32, i32, i32, i32
  }
}

module attributes {stable_mosaic.version = 11 : i64} {
  func.func @kernel(%arg0: i32, %arg1: memref<1x18x18x64xbf16, #tpu.memory_space<vmem>>, %arg2: memref<9x64x64xbf16, #tpu.memory_space<vmem>>, %arg3: memref<1x64xf32, #tpu.memory_space<vmem>>, %arg4: memref<1x16x16x64xbf16, #tpu.memory_space<vmem>>, %arg5: memref<1x16x16x64xf32, #tpu.memory_space<vmem>>) attributes {dimension_semantics = [#tpu.dimension_semantics<parallel>], iteration_bounds = array<i64: 2>, scalar_prefetch = 0 : i64, scratch_operands = 0 : i64, tpu.core_type = #tpu.core_type<tc>, window_params = [{transform_indices = @transform_0, window_bounds = array<i64: 1, 18, 18, 64>}, {pipeline_mode = #tpu.pipeline_mode<synchronous>, transform_indices = @transform_1, window_bounds = array<i64: 9, 64, 64>}, {pipeline_mode = #tpu.pipeline_mode<synchronous>, transform_indices = @transform_2, window_bounds = array<i64: 1, 64>}, {transform_indices = @transform_3, window_bounds = array<i64: 1, 16, 16, 64>}, {transform_indices = @transform_4, window_bounds = array<i64: 1, 16, 16, 64>}]} {
    %c0 = arith.constant 0 : index
    %c0_0 = arith.constant 0 : index
    %c0_1 = arith.constant 0 : index
    %c0_2 = arith.constant 0 : index
    %0 = vector.load %arg1[%c0, %c0_0, %c0_1, %c0_2] : memref<1x18x18x64xbf16, #tpu.memory_space<vmem>>, vector<1x18x18x64xbf16>
    %1 = vector.shape_cast %0 : vector<1x18x18x64xbf16> to vector<18x18x64xbf16>
    %2 = vector.extract_strided_slice %1 {offsets = [0, 0, 0], sizes = [16, 16, 64], strides = [1, 1, 1]} : vector<18x18x64xbf16> to vector<16x16x64xbf16>
    %3 = vector.shape_cast %2 : vector<16x16x64xbf16> to vector<256x64xbf16>
    %c0_3 = arith.constant 0 : index
    %c0_4 = arith.constant 0 : index
    %c0_5 = arith.constant 0 : index
    %4 = vector.load %arg2[%c0_3, %c0_4, %c0_5] : memref<9x64x64xbf16, #tpu.memory_space<vmem>>, vector<1x64x64xbf16>
    %5 = vector.shape_cast %4 : vector<1x64x64xbf16> to vector<64x64xbf16>
    %cst = arith.constant dense<0.000000e+00> : vector<256x64xf32>
    %6 = tpu.matmul %3, %5, %cst {dimension_numbers = #tpu.dot_dimension_numbers<[1], [0], [0], [1], [0, 0, 1, 1], [], []>} : vector<256x64xbf16>, vector<64x64xbf16>, vector<256x64xf32> -> vector<256x64xf32>
    %7 = vector.extract_strided_slice %1 {offsets = [0, 1, 0], sizes = [16, 16, 64], strides = [1, 1, 1]} : vector<18x18x64xbf16> to vector<16x16x64xbf16>
    %8 = vector.shape_cast %7 : vector<16x16x64xbf16> to vector<256x64xbf16>
    %c1 = arith.constant 1 : index
    %c0_6 = arith.constant 0 : index
    %c0_7 = arith.constant 0 : index
    %9 = vector.load %arg2[%c1, %c0_6, %c0_7] : memref<9x64x64xbf16, #tpu.memory_space<vmem>>, vector<1x64x64xbf16>
    %10 = vector.shape_cast %9 : vector<1x64x64xbf16> to vector<64x64xbf16>
    %cst_8 = arith.constant dense<0.000000e+00> : vector<256x64xf32>
    %11 = tpu.matmul %8, %10, %cst_8 {dimension_numbers = #tpu.dot_dimension_numbers<[1], [0], [0], [1], [0, 0, 1, 1], [], []>} : vector<256x64xbf16>, vector<64x64xbf16>, vector<256x64xf32> -> vector<256x64xf32>
    %12 = arith.addf %6, %11 : vector<256x64xf32>
    %13 = vector.extract_strided_slice %1 {offsets = [0, 2, 0], sizes = [16, 16, 64], strides = [1, 1, 1]} : vector<18x18x64xbf16> to vector<16x16x64xbf16>
    %14 = vector.shape_cast %13 : vector<16x16x64xbf16> to vector<256x64xbf16>
    %c2 = arith.constant 2 : index
    %c0_9 = arith.constant 0 : index
    %c0_10 = arith.constant 0 : index
    %15 = vector.load %arg2[%c2, %c0_9, %c0_10] : memref<9x64x64xbf16, #tpu.memory_space<vmem>>, vector<1x64x64xbf16>
    %16 = vector.shape_cast %15 : vector<1x64x64xbf16> to vector<64x64xbf16>
    %cst_11 = arith.constant dense<0.000000e+00> : vector<256x64xf32>
    %17 = tpu.matmul %14, %16, %cst_11 {dimension_numbers = #tpu.dot_dimension_numbers<[1], [0], [0], [1], [0, 0, 1, 1], [], []>} : vector<256x64xbf16>, vector<64x64xbf16>, vector<256x64xf32> -> vector<256x64xf32>
    %18 = arith.addf %12, %17 : vector<256x64xf32>
    %19 = vector.extract_strided_slice %1 {offsets = [1, 0, 0], sizes = [16, 16, 64], strides = [1, 1, 1]} : vector<18x18x64xbf16> to vector<16x16x64xbf16>
    %20 = vector.shape_cast %19 : vector<16x16x64xbf16> to vector<256x64xbf16>
    %c3 = arith.constant 3 : index
    %c0_12 = arith.constant 0 : index
    %c0_13 = arith.constant 0 : index
    %21 = vector.load %arg2[%c3, %c0_12, %c0_13] : memref<9x64x64xbf16, #tpu.memory_space<vmem>>, vector<1x64x64xbf16>
    %22 = vector.shape_cast %21 : vector<1x64x64xbf16> to vector<64x64xbf16>
    %cst_14 = arith.constant dense<0.000000e+00> : vector<256x64xf32>
    %23 = tpu.matmul %20, %22, %cst_14 {dimension_numbers = #tpu.dot_dimension_numbers<[1], [0], [0], [1], [0, 0, 1, 1], [], []>} : vector<256x64xbf16>, vector<64x64xbf16>, vector<256x64xf32> -> vector<256x64xf32>
    %24 = arith.addf %18, %23 : vector<256x64xf32>
    %25 = vector.extract_strided_slice %1 {offsets = [1, 1, 0], sizes = [16, 16, 64], strides = [1, 1, 1]} : vector<18x18x64xbf16> to vector<16x16x64xbf16>
    %26 = vector.shape_cast %25 : vector<16x16x64xbf16> to vector<256x64xbf16>
    %c4 = arith.constant 4 : index
    %c0_15 = arith.constant 0 : index
    %c0_16 = arith.constant 0 : index
    %27 = vector.load %arg2[%c4, %c0_15, %c0_16] : memref<9x64x64xbf16, #tpu.memory_space<vmem>>, vector<1x64x64xbf16>
    %28 = vector.shape_cast %27 : vector<1x64x64xbf16> to vector<64x64xbf16>
    %cst_17 = arith.constant dense<0.000000e+00> : vector<256x64xf32>
    %29 = tpu.matmul %26, %28, %cst_17 {dimension_numbers = #tpu.dot_dimension_numbers<[1], [0], [0], [1], [0, 0, 1, 1], [], []>} : vector<256x64xbf16>, vector<64x64xbf16>, vector<256x64xf32> -> vector<256x64xf32>
    %30 = arith.addf %24, %29 : vector<256x64xf32>
    %31 = vector.extract_strided_slice %1 {offsets = [1, 2, 0], sizes = [16, 16, 64], strides = [1, 1, 1]} : vector<18x18x64xbf16> to vector<16x16x64xbf16>
    %32 = vector.shape_cast %31 : vector<16x16x64xbf16> to vector<256x64xbf16>
    %c5 = arith.constant 5 : index
    %c0_18 = arith.constant 0 : index
    %c0_19 = arith.constant 0 : index
    %33 = vector.load %arg2[%c5, %c0_18, %c0_19] : memref<9x64x64xbf16, #tpu.memory_space<vmem>>, vector<1x64x64xbf16>
    %34 = vector.shape_cast %33 : vector<1x64x64xbf16> to vector<64x64xbf16>
    %cst_20 = arith.constant dense<0.000000e+00> : vector<256x64xf32>
    %35 = tpu.matmul %32, %34, %cst_20 {dimension_numbers = #tpu.dot_dimension_numbers<[1], [0], [0], [1], [0, 0, 1, 1], [], []>} : vector<256x64xbf16>, vector<64x64xbf16>, vector<256x64xf32> -> vector<256x64xf32>
    %36 = arith.addf %30, %35 : vector<256x64xf32>
    %37 = vector.extract_strided_slice %1 {offsets = [2, 0, 0], sizes = [16, 16, 64], strides = [1, 1, 1]} : vector<18x18x64xbf16> to vector<16x16x64xbf16>
    %38 = vector.shape_cast %37 : vector<16x16x64xbf16> to vector<256x64xbf16>
    %c6 = arith.constant 6 : index
    %c0_21 = arith.constant 0 : index
    %c0_22 = arith.constant 0 : index
    %39 = vector.load %arg2[%c6, %c0_21, %c0_22] : memref<9x64x64xbf16, #tpu.memory_space<vmem>>, vector<1x64x64xbf16>
    %40 = vector.shape_cast %39 : vector<1x64x64xbf16> to vector<64x64xbf16>
    %cst_23 = arith.constant dense<0.000000e+00> : vector<256x64xf32>
    %41 = tpu.matmul %38, %40, %cst_23 {dimension_numbers = #tpu.dot_dimension_numbers<[1], [0], [0], [1], [0, 0, 1, 1], [], []>} : vector<256x64xbf16>, vector<64x64xbf16>, vector<256x64xf32> -> vector<256x64xf32>
    %42 = arith.addf %36, %41 : vector<256x64xf32>
    %43 = vector.extract_strided_slice %1 {offsets = [2, 1, 0], sizes = [16, 16, 64], strides = [1, 1, 1]} : vector<18x18x64xbf16> to vector<16x16x64xbf16>
    %44 = vector.shape_cast %43 : vector<16x16x64xbf16> to vector<256x64xbf16>
    %c7 = arith.constant 7 : index
    %c0_24 = arith.constant 0 : index
    %c0_25 = arith.constant 0 : index
    %45 = vector.load %arg2[%c7, %c0_24, %c0_25] : memref<9x64x64xbf16, #tpu.memory_space<vmem>>, vector<1x64x64xbf16>
    %46 = vector.shape_cast %45 : vector<1x64x64xbf16> to vector<64x64xbf16>
    %cst_26 = arith.constant dense<0.000000e+00> : vector<256x64xf32>
    %47 = tpu.matmul %44, %46, %cst_26 {dimension_numbers = #tpu.dot_dimension_numbers<[1], [0], [0], [1], [0, 0, 1, 1], [], []>} : vector<256x64xbf16>, vector<64x64xbf16>, vector<256x64xf32> -> vector<256x64xf32>
    %48 = arith.addf %42, %47 : vector<256x64xf32>
    %49 = vector.extract_strided_slice %1 {offsets = [2, 2, 0], sizes = [16, 16, 64], strides = [1, 1, 1]} : vector<18x18x64xbf16> to vector<16x16x64xbf16>
    %50 = vector.shape_cast %49 : vector<16x16x64xbf16> to vector<256x64xbf16>
    %c8 = arith.constant 8 : index
    %c0_27 = arith.constant 0 : index
    %c0_28 = arith.constant 0 : index
    %51 = vector.load %arg2[%c8, %c0_27, %c0_28] : memref<9x64x64xbf16, #tpu.memory_space<vmem>>, vector<1x64x64xbf16>
    %52 = vector.shape_cast %51 : vector<1x64x64xbf16> to vector<64x64xbf16>
    %cst_29 = arith.constant dense<0.000000e+00> : vector<256x64xf32>
    %53 = tpu.matmul %50, %52, %cst_29 {dimension_numbers = #tpu.dot_dimension_numbers<[1], [0], [0], [1], [0, 0, 1, 1], [], []>} : vector<256x64xbf16>, vector<64x64xbf16>, vector<256x64xf32> -> vector<256x64xf32>
    %54 = arith.addf %48, %53 : vector<256x64xf32>
    %c0_30 = arith.constant 0 : index
    %c0_31 = arith.constant 0 : index
    %55 = vector.load %arg3[%c0_30, %c0_31] : memref<1x64xf32, #tpu.memory_space<vmem>>, vector<1x64xf32>
    %56 = vector.broadcast %55 : vector<1x64xf32> to vector<256x64xf32>
    %57 = arith.addf %54, %56 : vector<256x64xf32>
    %c0_32 = arith.constant 0 : index
    %c0_33 = arith.constant 0 : index
    %c0_34 = arith.constant 0 : index
    %c0_35 = arith.constant 0 : index
    %58 = vector.load %arg4[%c0_32, %c0_33, %c0_34, %c0_35] : memref<1x16x16x64xbf16, #tpu.memory_space<vmem>>, vector<1x16x16x64xbf16>
    %59 = vector.shape_cast %58 : vector<1x16x16x64xbf16> to vector<16x16x64xbf16>
    %60 = vector.shape_cast %59 : vector<16x16x64xbf16> to vector<256x64xbf16>
    %61 = arith.extf %60 : vector<256x64xbf16> to vector<256x64xf32>
    %62 = arith.addf %57, %61 : vector<256x64xf32>
    %cst_36 = arith.constant 0.000000e+00 : f32
    %63 = vector.broadcast %cst_36 : f32 to vector<256x64xf32>
    %64 = arith.maximumf %62, %63 : vector<256x64xf32>
    %65 = vector.shape_cast %64 : vector<256x64xf32> to vector<16x16x64xf32>
    %c0_37 = arith.constant 0 : index
    %c0_38 = arith.constant 0 : index
    %c0_39 = arith.constant 0 : index
    %c0_40 = arith.constant 0 : index
    %66 = vector.load %arg5[%c0_37, %c0_38, %c0_39, %c0_40] : memref<1x16x16x64xf32, #tpu.memory_space<vmem>>, vector<1x16x16x64xf32>
    %67 = vector.shape_cast %66 : vector<1x16x16x64xf32> to vector<16x16x64xf32>
    %68 = vector.shape_cast %65 : vector<16x16x64xf32> to vector<1x16x16x64xf32>
    tpu.vector_store %arg5[%c0_37, %c0_38, %c0_39, %c0_40], %68 {strides = array<i32>} : memref<1x16x16x64xf32, #tpu.memory_space<vmem>>, vector<1x16x16x64xf32>,
    return
  }
  func.func @transform_0(%arg0: i32) -> (i32, i32, i32, i32) {
    %c0_i32 = arith.constant 0 : i32
    %c0_i32_0 = arith.constant 0 : i32
    %c0_i32_1 = arith.constant 0 : i32
    %c0_i32_2 = arith.constant 0 : i32
    return %arg0, %c0_i32, %c0_i32_0, %c0_i32_1 : i32, i32, i32, i32
  }
  func.func @transform_1(%arg0: i32) -> (i32, i32, i32) {
    %c0_i32 = arith.constant 0 : i32
    %c0_i32_0 = arith.constant 0 : i32
    %c0_i32_1 = arith.constant 0 : i32
    %c0_i32_2 = arith.constant 0 : i32
    return %c0_i32, %c0_i32_0, %c0_i32_1 : i32, i32, i32
  }
  func.func @transform_2(%arg0: i32) -> (i32, i32) {
    %c0_i32 = arith.constant 0 : i32
    %c0_i32_0 = arith.constant 0 : i32
    %c0_i32_1 = arith.constant 0 : i32
    return %c0_i32, %c0_i32_0 : i32, i32
  }
  func.func @transform_3(%arg0: i32) -> (i32, i32, i32, i32) {
    %c0_i32 = arith.constant 0 : i32
    %c0_i32_0 = arith.constant 0 : i32
    %c0_i32_1 = arith.constant 0 : i32
    %c0_i32_2 = arith.constant 0 : i32
    return %arg0, %c0_i32, %c0_i32_0, %c0_i32_1 : i32, i32, i32, i32
  }
  func.func @transform_4(%arg0: i32) -> (i32, i32, i32, i32) {
    %c0_i32 = arith.constant 0 : i32
    %c0_i32_0 = arith.constant 0 : i32
    %c0_i32_1 = arith.constant 0 : i32
    %c0_i32_2 = arith.constant 0 : i32
    return %arg0, %c0_i32, %c0_i32_0, %c0_i32_1 : i32, i32, i32, i32
  }
}

</mosaic_0001>

<bundles_post_ra>
// kernel: residual_block.3
= control target key start
LH: loop header
LB: loop body
LE: loop exit
PB: predicated region body
PF: predicated region fallthrough
CT: control target
= control target key end

     0   :  { %9 = vsyncpa [#allocation3], 0  ;;  %s6159_s0 = inlined_call_operand.vmem [shape: bf16[2,18,18,64], index: 0, kind: input, shape index: {}]   ;;  %s6160_s1 = inlined_call_operand.vmem [shape: bf16[9,64,64], index: 1, kind: input, shape index: {}]   ;;  %s6161_s2 = inlined_call_operand.vmem [shape: f32[1,64], index: 2, kind: input, shape index: {}]   ;;  %s6162_s3 = inlined_call_operand.vmem [shape: bf16[2,16,16,64], index: 3, kind: input, shape index: {}]   ;;  %s6163_s4 = inlined_call_operand.hbm [shape: f32[2,16,16,64], index: 4, kind: output, shape index: {}]  }
   0x1   :  { %11 = vsyncpa [#allocation3 + $0x1], 0  ;;  %s4880_s15 = smov 0   ;;  %s4882_s16 = smov 0  }
   0x2   :  { %s4884_s17 = smov 0   ;;  %s4886_s18 = smov 0  }
   0x3 LB: > { %s4901_s19 = sadd.s32 4294967295, %s4850_s18   ;;  %s3470_s20 = sadd.s32 4294967294, %s4850_s18   ;;  %s4850_s18 = sphi %s4886_s18, %s6243_s18   ;;  %s4846_s17 = sphi %s4884_s17, %s6242_s17   ;;  %s4842_s16 = sphi %s4882_s16, %s6241_s16   ;;  %s4838_s15 = sphi %s4880_s15, %s6240_s15  }
   0x4   : > { %s4905_s21 = sadd.s32 1, %s4850_s18   ;;  %s118_s22 = sadd.s32 1, %s4846_s17 }
   0x5   : > { %s115_s23 = ssub.s32 %s4850_s18, %s4905_s21  ;;  %p128_p0 = scmp.ne.s32.totalorder %s4846_s17, %s4842_s16 }
   0x6   : > { %p116_p1 = scmp.eq.s32.totalorder %s115_s23, 0  ;;  %p129_p2 = scmp.eq.s32.totalorder %s4901_s19, 1 }
   0x7   : > { %p134_p3 = scmp.ne.s32.totalorder %s4842_s16, %s4838_s15  ;;  %p135_p4 = scmp.eq.s32.totalorder %s3470_s20, 1 }
   0x8   : > { %s4916_s24 = scalar_select %p116_p1, %s4846_s17, %s118_s22  }
   0x9   : > { %p4918_p5 = por %p129_p2, %p128_p0  ;;  %p4922_p6 = por %p135_p4, %p134_p3 }
   0xa   : > { %p3473_p7 = scmp.ge.s32.totalorder %s4850_s18, 1  ;;  %p175_p8 = scmp.lt.s32.totalorder %s4850_s18, 3 }
   0xc   : > { %p176_p9 = pnand %p3473_p7, %p175_p8 }
   0xe   : > { %179 = sbr.rel (%p176_p9) target bundleno = 578 (0x242), region = 36 }
  0x15   : > { %v4727_v0 = vld [vmem:[%s6160_s1 + $0x20] sm:$0xff]   ;;  %p206_p10 = scmp.lt.s32.totalorder %s4901_s19, 1  ;;  %v4729_v2 = vld [vmem:[%s6160_s1 + $0x28] sm:$0xff]   ;;  %v4731_v4 = vld [vmem:[%s6160_s1 + $0x30] sm:$0xff]   ;;  %vm279_vm0 = vsmask.f32 3328 }
  0x16   : > { %v4728_v1 = vld [vmem:[%s6160_s1 + $0x80] sm:$0xff]   ;;  %4061 = vmatprep.subr.bf16.mxu1 %v4727_v0  ;;  %v4730_v3 = vld [vmem:[%s6160_s1 + $0x88] sm:$0xff]   ;;  %v4732_v5 = vld [vmem:[%s6160_s1 + $0x90] sm:$0xff]   ;;  %vm280_vm1 = vsmask.f32 7440  ;;  %vm747_vm2 = vcmask 523264  }
  0x17   : > { %s4939_s7 = scalar_select %p206_p10, %s4901_s19, 1  ;;  %4221 = vmatprep.subr.bf16.mxu0 %v4728_v1  ;;  %4062 = vmatpush3.bf16.msra.mxu1 %v4727_v0  ;;  %v4733_v6 = vld [vmem:[%s6160_s1 + $0x38] sm:$0xff]   ;;  %v4976_v18 = vld [vmem:[%s6160_s1] sm:$0xff]   ;;  %vm4996_vm3 = vmor %vm279_vm0, %vm280_vm1  ;;  %vm1286_vm4 = vcmask 1042432   ;;  %vm1287_vm5 = vcmask 1046532  }
  0x18   : > { %4222 = vmatpush3.bf16.msra.mxu0 %v4728_v1  ;;  %4063 = vmatprep.subr.bf16.mxu1 %v4729_v2  ;;  %v4734_v7 = vld [vmem:[%s6160_s1 + $0x98] sm:$0xff]   ;;  %v4984_v23 = vld [vmem:[%s6160_s1 + $0xa0] sm:$0xff]   ;;  %vm5203_vm6 = vmor %vm1286_vm4, %vm1287_vm5  ;;  %s203_s13 = sand.u32 1, %s4842_s16   ;;  %s3801_s23 = sshll.u32 %s4901_s19, 12 }
  0x19   : > { %s4685_s12 = smul.u32 216, %s4939_s7  ;;  %4223 = vmatprep.subr.bf16.mxu0 %v4730_v3  ;;  %s3800_s9 = sshll.u32 %s4939_s7, 7 }
  0x1a   : > { %s3474_s20 = sshll.u32 %s203_s13, 8  ;;  %s6106_s5 = scalar_lea.hbm %s6163_s4, %s3801_s23 }
  0x1b   : > { %s4957_s28 = scalar_lea.vmem %s6159_s0, %s4685_s12  ;;  %4064 = vmatpush3.bf16.msra.mxu1 %v4729_v2  ;;  %s5975_s12 = scalar_lea.vmem %s6162_s3, %s3800_s9 }
  0x1c   : > { %4224 = vmatpush3.bf16.msra.mxu0 %v4730_v3  ;;  %4065 = vmatprep.subr.bf16.mxu1 %v4731_v4  ;;  %v4963_v8 = vld [vmem:[%s4957_s28] sm:$0xf]  ;;  %v4966_v9 = vld [vmem:[%s4957_s28 + $0x4] sm:$0xf]  ;;  %v219_v10 = vld [vmem:[%s4957_s28 + $0x8] sm:$0x1] }
  0x1d   : > { %4225 = vmatprep.subr.bf16.mxu0 %v4732_v5  ;;  %v283_v11 = vshrl.u32 %v4963_v8, 16  ;;  %v286_v12 = vshll.u32 %v4963_v8, 16  ;;  %v292_v13 = vshll.u32 %v4966_v9, 16  ;;  %v296_v14 = vshrl.u32 %v4966_v9, 16  ;;  %v4979_v22 = vld [vmem:[%s4957_s28 + $0xc] sm:$0xf] }
  0x1e   : > { %v302_v15 = vshll.u32 %v219_v10, 16  ;;  %v4987_v25 = vld [vmem:[%s4957_s28 + $0x10] sm:$0xf]  ;;  %v4990_v26 = vld [vmem:[%s4957_s28 + $0x14] sm:$0x1]  ;;  %v307_v27 = vshrl.u32 %v4979_v22, 16 }
  0x1f   : > { %4066 = vmatpush3.bf16.msra.mxu1 %v4731_v4  ;;  %v285_v16 = vrot.slane %v283_v11, 4  ;;  %v288_v17 = vrot.slane %v286_v12, 5  ;;  %v294_v19 = vrot.slane %v292_v13, 5  ;;  %v298_v20 = vrot.slane %v296_v14, 4  ;;  %v5009_v42 = vld [vmem:[%s4957_s28 + $0x18] sm:$0xf] }
  0x20   : > { %4226 = vmatpush3.bf16.msra.mxu0 %v4732_v5  ;;  %4067 = vmatprep.subr.bf16.mxu1 %v4733_v6  ;;  %v304_v21 = vrot.slane %v302_v15, 5  ;;  %v310_v28 = vshll.u32 %v4979_v22, 16  ;;  %v316_v31 = vshll.u32 %v4987_v25, 16  ;;  %v320_v32 = vshrl.u32 %v4987_v25, 16  ;;  %v5016_v46 = vld [vmem:[%s4957_s28 + $0x1c] sm:$0xf] }
  0x21   : > { %4227 = vmatprep.subr.bf16.mxu0 %v4734_v7  ;;  %v289_v24 = vor.u32 %v288_v17, %v285_v16  ;;  %v299_v30 = vor.u32 %v298_v20, %v294_v19  ;;  %v326_v33 = vshll.u32 %v4990_v26, 16  ;;  %v309_v35 = vrot.slane %v307_v27, 4  ;;  %v5019_v47 = vld [vmem:[%s4957_s28 + $0x20] sm:$0x1]  ;;  %v5027_v53 = vld [vmem:[%s4957_s28 + $0x24] sm:$0xf] }
  0x22   : > { %v312_v36 = vrot.slane %v310_v28, 5  ;;  %v5005_v37 = vcombine.low %v4979_v22, %v4987_v25  ;;  %v318_v39 = vrot.slane %v316_v31, 5  ;;  %v322_v40 = vrot.slane %v320_v32, 4  ;;  %v5030_v54 = vld [vmem:[%s4957_s28 + $0x28] sm:$0xf]  ;;  %s5993_s22 = scalar_lea.vmem [#allocation2], %s3474_s20 }
  0x23   : > { %4068 = vmatpush3.bf16.msra.mxu1 %v4733_v6  ;;  %v290_v34 = vrot.slane %v289_v24, 4  ;;  %v300_v38 = vrot.slane %v299_v30, 4  ;;  %v328_v41 = vrot.slane %v326_v33, 5  ;;  %v1301_v45 = vrot.slane %v4990_v26, 5  ;;  %v5034_v59 = vld [vmem:[%s4957_s28 + $0x2c] sm:$0x1] }
  0x24   : > { %4228 = vmatpush3.bf16.msra.mxu0 %v4734_v7  ;;  %4101 = vmatprep.subr.bf16.mxu1 %v4976_v18  ;;  %v313_v44 = vor.u32 %v312_v36, %v309_v35  ;;  %v331_v48 = vshrl.u32 %v5009_v42, 16  ;;  %v323_v50 = vor.u32 %v322_v40, %v318_v39  ;;  %v334_v51 = vshll.u32 %v5009_v42, 16  ;;  %v5046_v10 = vld [vmem:[%s4957_s28 + $0x30] sm:$0xf]  ;;  %v4739_v11 = vld [vmem:[%s6160_s1 + $0x8] sm:$0xff]   ;;  %s3396_s27 = sshll.u32 %s5993_s22, 4  ;;  %s6108_s27 = int_to_ptr.vmem [resolvable:$true] %s3396_s27 }
  0x25   : > { %v295_v43 = vsel %vm4996_vm3, %v290_v34, %v294_v19  ;;  %4261 = vmatprep.subr.bf16.mxu0 %v4984_v23  ;;  %v305_v49 = vsel %vm4996_vm3, %v300_v38, %v304_v21  ;;  %v340_v52 = vshll.u32 %v5016_v46, 16  ;;  %v344_v58 = vshrl.u32 %v5016_v46, 16  ;;  %v5054_v16 = vld [vmem:[%s4957_s28 + $0x34] sm:$0xf]  ;;  %v5061_v30 = vld [vmem:[%s4957_s28 + $0x38] sm:$0x1] }
  0x26   : > { %v3486_v55 = vcombine.low %v295_v43, %v305_v49  ;;  %v314_v56 = vrot.slane %v313_v44, 4  ;;  %v333_v57 = vrot.slane %v331_v48, 4  ;;  %v324_v60 = vrot.slane %v323_v50, 4  ;;  %v5069_v36 = vld [vmem:[%s4957_s28 + $0x3c] sm:$0xf]  ;;  %v4738_v40 = vld [vmem:[%s6160_s1 + $0xa8] sm:$0xff]  }
  0x27   : > { %v336_v61 = vrot.slane %v334_v51, 5  ;;  %v342_v62 = vrot.slane %v340_v52, 5  ;;  %v350_v63 = vshll.u32 %v5019_v47, 16  ;;  %v346_v1 = vrot.slane %v344_v58, 4  ;;  %v4742_v43 = vld [vmem:[%s6160_s1 + $0x10] sm:$0xff]   ;;  %s6118_s19 = scalar_lea.sflag [#allocation3], %s203_s13 }
  0x28   : > { %4069 = vmatprep.mubr.msk.bf16.mxu1 %vm747_vm2, %v3486_v55  ;;  %v319_v0 = vsel %vm4996_vm3, %v314_v56, %v318_v39  ;;  %v1305_v2 = vrot.slane %v5016_v46, 5  ;;  %v1308_v3 = vrot.slane %v5019_v47, 5  ;;  %v329_v4 = vsel %vm4996_vm3, %v324_v60, %v328_v41  ;;  %v5084_v51 = vld [vmem:[%s4957_s28 + $0x40] sm:$0xf]  ;;  %s4788_s6 = scalar_lea.vmem %s6108_s27, 4096 }
  0x29   : > { %v337_v5 = vor.u32 %v336_v61, %v333_v57  ;;  %v352_v6 = vrot.slane %v350_v63, 5  ;;  %v355_v7 = vshrl.u32 %v5027_v53, 16  ;;  %v3487_v12 = vcombine.low %v319_v0, %v329_v4  ;;  %p4789_p11 = scmp.ne.s32.totalorder %s6108_s27, %s4788_s6 }
  0x2a   : > { %v347_v13 = vor.u32 %v346_v1, %v342_v62  ;;  %v358_v14 = vshll.u32 %v5027_v53, 16  ;;  %v364_v15 = vshll.u32 %v5030_v54, 16  ;;  %v368_v20 = vshrl.u32 %v5030_v54, 16 }
  0x2b   : > { %v338_v17 = vrot.slane %v337_v5, 4  ;;  %v357_v19 = vrot.slane %v355_v7, 4  ;;  %v374_v21 = vshll.u32 %v5034_v59, 16  ;;  %4229 = vmatprep.mubr.msk.bf16.mxu0 %vm747_vm2, %v3487_v12  ;;  %4070 = vmatmul.mubr.msk.bf16.vlgmr.msra.gmra.mrb[0].mxu1 %vm747_vm2, %v3487_v12  ;;  %v379_v31 = vshrl.u32 %v5046_v10, 16  ;;  %p4790_p12 = pnand %p4789_p11, %p4918_p5 }
  0x2c   : > { %v348_v24 = vrot.slane %v347_v13, 4  ;;  %v360_v27 = vrot.slane %v358_v14, 5  ;;  %v366_v28 = vrot.slane %v364_v15, 5  ;;  %4102 = vmatpush3.bf16.msra.mxu1 %v4976_v18  ;;  %v370_v33 = vrot.slane %v368_v20, 4  ;;  %v5109_v15 = vld [vmem:[%s4957_s28 + $0x4c] sm:$0xf] }
  0x2d   : > { %v343_v32 = vsel %vm4996_vm3, %v338_v17, %v342_v62  ;;  %v376_v34 = vrot.slane %v374_v21, 5  ;;  %v382_v35 = vshll.u32 %v5046_v10, 16  ;;  %v381_v41 = vrot.slane %v379_v31, 4  ;;  %4103 = vmatprep.subr.bf16.mxu1 %v4739_v11  ;;  %v5093_v62 = vld [vmem:[%s4957_s28 + $0x44] sm:$0x1]  ;;  %v4744_v21 = vld [vmem:[%s6160_s1 + $0x18] sm:$0xff]   ;;  %p4791_p13 = pneg %p4790_p12 }
  0x2e   : > { %v353_v38 = vsel %vm4996_vm3, %v348_v24, %v352_v6  ;;  %v361_v39 = vor.u32 %v360_v27, %v357_v19  ;;  %v388_v18 = vshll.u32 %v5054_v16, 16  ;;  %v371_v48 = vor.u32 %v370_v33, %v366_v28  ;;  %v5101_v6 = vld [vmem:[%s4957_s28 + $0x48] sm:$0xf]  ;;  %v5121_v31 = vld [vmem:[%s4957_s28 + $0x50] sm:$0x1] }
  0x2f   : > { %v5080_v44 = vcombine.low %v343_v32, %v353_v38  ;;  %v384_v49 = vrot.slane %v382_v35, 5  ;;  %v392_v50 = vshrl.u32 %v5054_v16, 16  ;;  %v398_v56 = vshll.u32 %v5061_v30, 16 }
  0x30   : > { %v362_v52 = vrot.slane %v361_v39, 4  ;;  %v390_v55 = vrot.slane %v388_v18, 5  ;;  %v403_v57 = vshrl.u32 %v5069_v36, 16  ;;  %v372_v58 = vrot.slane %v371_v48, 4  ;;  %4104 = vmatpush3.bf16.msra.mxu1 %v4739_v11  ;;  %v5131_v39 = vld [vmem:[%s4957_s28 + $0x54] sm:$0xf] }
  0x31   : > { %6198 = vst [vmem:[#allocation5_spill] sm:$0xff] %v5080_v44  ;;  %4230 = vmatmul.mubr.msk.bf16.vlgmr.msra.gmra.mrb[0].mxu0 %vm747_vm2, %v5080_v44  ;;  %4073 = vmatprep.mubr.msk.bf16.mxu1 %vm747_vm2, %v5080_v44  ;;  %v385_v60 = vor.u32 %v384_v49, %v381_v41  ;;  %v394_v61 = vrot.slane %v392_v50, 4  ;;  %v406_v63 = vshll.u32 %v5069_v36, 16  ;;  %v400_v1 = vrot.slane %v398_v56, 5  ;;  %6200 = vst [vmem:[#allocation7_spill] sm:$0xff] %v5131_v39  ;;  %v4741_v41 = vld [vmem:[%s6160_s1 + $0xb8] sm:$0xff]  }
  0x32   : > { %4262 = vmatpush3.bf16.msra.mxu0 %v4984_v23  ;;  %v367_v0 = vsel %vm4996_vm3, %v362_v52, %v366_v28  ;;  %v405_v4 = vrot.slane %v403_v57, 4  ;;  %v412_v5 = vshll.u32 %v5084_v51, 16  ;;  %v377_v7 = vsel %vm4996_vm3, %v372_v58, %v376_v34  ;;  %v4740_v23 = vld [vmem:[%s6160_s1 + $0xb0] sm:$0xff]   ;;  %4105 = vmatprep.subr.bf16.mxu1 %v4742_v43  ;;  %v5140_v52 = vld [vmem:[%s4957_s28 + $0x58] sm:$0xf] }
  0x33   : > { %4263 = vmatprep.subr.bf16.mxu0 %v4738_v40  ;;  %v386_v12 = vrot.slane %v385_v60, 4  ;;  %v395_v13 = vor.u32 %v394_v61, %v390_v55  ;;  %v408_v14 = vrot.slane %v406_v63, 5  ;;  %v5111_v17 = vcombine.low %v367_v0, %v377_v7  ;;  %v5150_v61 = vld [vmem:[%s4957_s28 + $0x5c] sm:$0x1] }
  0x34   : > { %v414_v11 = vrot.slane %v412_v5, 5  ;;  %v416_v19 = vshrl.u32 %v5084_v51, 16  ;;  %v422_v20 = vshll.u32 %v5093_v62, 16  ;;  %v427_v32 = vshrl.u32 %v5101_v6, 16  ;;  %4106 = vmatpush3.bf16.msra.mxu1 %v4742_v43 }
  0x35   : > { %6199 = vst [vmem:[#allocation6_spill] sm:$0xff] %v5111_v17  ;;  %v391_v24 = vsel %vm4996_vm3, %v386_v12, %v390_v55  ;;  %v396_v27 = vrot.slane %v395_v13, 4  ;;  %v409_v28 = vor.u32 %v408_v14, %v405_v4  ;;  %4233 = vmatprep.mubr.msk.bf16.mxu0 %vm747_vm2, %v5111_v17  ;;  %4074 = vmatmul.mubr.msk.bf16.gmra.mrb[4].mxu1 %vm747_vm2, %v5111_v17  ;;  %v430_v35 = vshll.u32 %v5101_v6, 16  ;;  %v5145_v55 = vld [vmem:[%s6160_s1 + $0x40] sm:$0xff]  }
  0x36   : > { %v418_v33 = vrot.slane %v416_v19, 4  ;;  %v424_v34 = vrot.slane %v422_v20, 5  ;;  %v436_v38 = vshll.u32 %v5109_v15, 16  ;;  %4264 = vmatpush3.bf16.msra.mxu0 %v4738_v40  ;;  %v429_v49 = vrot.slane %v427_v32, 4  ;;  %4107 = vmatprep.subr.bf16.mxu1 %v4744_v21  ;;  %v5164_v19 = vld [vmem:[%s4957_s28 + $0x60] sm:$0xf] }
  0x37   : > { %v401_v18 = vsel %vm4996_vm3, %v396_v27, %v400_v1  ;;  %v410_v48 = vrot.slane %v409_v28, 4  ;;  %v440_v50 = vshrl.u32 %v5109_v15, 16  ;;  %4265 = vmatprep.subr.bf16.mxu0 %v4740_v23  ;;  %v432_v58 = vrot.slane %v430_v35, 5  ;;  %v5169_v32 = vld [vmem:[%s4957_s28 + $0x64] sm:$0xf] }
  0x38   : > { %v5147_v56 = vcombine.low %v391_v24, %v401_v18  ;;  %v419_v57 = vor.u32 %v418_v33, %v414_v11  ;;  %v438_v60 = vrot.slane %v436_v38, 5  ;;  %v446_v43 = vshll.u32 %v5121_v31, 16  ;;  %4108 = vmatpush3.bf16.msra.mxu1 %v4744_v21  ;;  %v5178_v21 = vld [vmem:[%s6160_s1 + $0xc0] sm:$0xff]  }
  0x39   : > { %v415_v40 = vsel %vm4996_vm3, %v410_v48, %v414_v11  ;;  %v442_v63 = vrot.slane %v440_v50, 4  ;;  %v451_v0 = vshrl.u32 %v5131_v39, 16  ;;  %v433_v4 = vor.u32 %v432_v58, %v429_v49  ;;  %4141 = vmatprep.subr.bf16.mxu1 %v5145_v55  ;;  %v5183_v48 = vld [vmem:[%s4957_s28 + $0x68] sm:$0x1] }
  0x3a   : > { %6201 = vst [vmem:[#allocation8_spill] sm:$0xff] %v5147_v56  ;;  %4234 = vmatmul.mubr.msk.bf16.gmra.mrb[4].mxu0 %vm747_vm2, %v5147_v56  ;;  %4077 = vmatprep.mubr.msk.bf16.mxu1 %vm747_vm2, %v5147_v56  ;;  %v420_v1 = vrot.slane %v419_v57, 4  ;;  %v454_v5 = vshll.u32 %v5131_v39, 16  ;;  %v460_v7 = vshll.u32 %v5140_v52, 16  ;;  %v448_v13 = vrot.slane %v446_v43, 5 }
  0x3b   : > { %v443_v12 = vor.u32 %v442_v63, %v438_v60  ;;  %4266 = vmatpush3.bf16.msra.mxu0 %v4740_v23  ;;  %v453_v14 = vrot.slane %v451_v0, 4  ;;  %v464_v11 = vshrl.u32 %v5140_v52, 16  ;;  %v434_v24 = vrot.slane %v433_v4, 4  ;;  %v5197_v4 = vld [vmem:[%s4957_s28 + $0x6c] sm:$0xf] }
  0x3c   : > { %v425_v20 = vsel %vm4996_vm3, %v420_v1, %v424_v34  ;;  %v456_v27 = vrot.slane %v454_v5, 5  ;;  %v462_v28 = vrot.slane %v460_v7, 5  ;;  %4267 = vmatprep.subr.bf16.mxu0 %v4741_v41  ;;  %v470_v38 = vshll.u32 %v5150_v61, 16 }
  0x3d   : > { %v5172_v33 = vcombine.low %v415_v40, %v425_v20  ;;  %v444_v23 = vrot.slane %v443_v12, 4  ;;  %v466_v35 = vrot.slane %v464_v11, 4  ;;  %v439_v34 = vsel %vm4996_vm3, %v434_v24, %v438_v60 }
  0x3e   : > { %v457_v18 = vor.u32 %v456_v27, %v453_v14  ;;  %v475_v49 = vshrl.u32 %v5164_v19, 16  ;;  %v478_v50 = vshll.u32 %v5164_v19, 16  ;;  %v472_v40 = vrot.slane %v470_v38, 5  ;;  %v5217_v27 = vld [vmem:[%s4957_s28 + $0x70] sm:$0xf] }
  0x3f   : > { %6202 = vst [vmem:[#allocation9_spill] sm:$0xff] %v5172_v33  ;;  %4237 = vmatprep.mubr.msk.bf16.mxu0 %vm747_vm2, %v5172_v33  ;;  %4078 = vmatmul.mubr.msk.bf16.gmra.mrb[8].mxu1 %vm747_vm2, %v5172_v33  ;;  %v449_v57 = vsel %vm4996_vm3, %v444_v23, %v448_v13  ;;  %v467_v58 = vor.u32 %v466_v35, %v462_v28  ;;  %v484_v60 = vshll.u32 %v5169_v32, 16  ;;  %v488_v12 = vshrl.u32 %v5169_v32, 16 }
  0x40   : > { %v5194_v63 = vcombine.low %v439_v34, %v449_v57  ;;  %v458_v43 = vrot.slane %v457_v18, 4  ;;  %v477_v0 = vrot.slane %v475_v49, 4  ;;  %v480_v1 = vrot.slane %v478_v50, 5  ;;  %4268 = vmatpush3.bf16.msra.mxu0 %v4741_v41  ;;  %v5222_v34 = vld [vmem:[%s4957_s28 + $0x74] sm:$0x1] }
  0x41   : > { %v468_v5 = vrot.slane %v467_v58, 4  ;;  %v486_v7 = vrot.slane %v484_v60, 5  ;;  %v494_v13 = vshll.u32 %v5183_v48, 16  ;;  %4301 = vmatprep.subr.bf16.mxu0 %v5178_v21  ;;  %v3559_v20 = vrot.slane %v4979_v22, 9 }
  0x42   : > { %6203 = vst [vmem:[#allocation10_spill] sm:$0xff] %v5194_v63  ;;  %4238 = vmatmul.mubr.msk.bf16.gmra.mrb[8].mxu0 %vm747_vm2, %v5194_v63  ;;  %4081 = vmatprep.mubr.msk.bf16.mxu1 %vm747_vm2, %v5194_v63  ;;  %v463_v41 = vsel %vm4996_vm3, %v458_v43, %v462_v28  ;;  %v481_v11 = vor.u32 %v480_v1, %v477_v0  ;;  %v1298_v24 = vrot.slane %v4987_v25, 5  ;;  %v490_v35 = vrot.slane %v488_v12, 4 }
  0x43   : > { %v473_v23 = vsel %vm4996_vm3, %v468_v5, %v472_v40  ;;  %v496_v38 = vrot.slane %v494_v13, 5  ;;  %v499_v18 = vshrl.u32 %v5197_v4, 16  ;;  %v502_v58 = vshll.u32 %v5197_v4, 16  ;;  %v5242_v5 = vld [vmem:[%s4957_s28 + $0x78] sm:$0xf] }
  0x44   : > { %v5225_v49 = vcombine.low %v463_v41, %v473_v23  ;;  %v482_v28 = vrot.slane %v481_v11, 4  ;;  %v1299_v22 = vsel %vm5203_vm6, %v3559_v20, %v1298_v24  ;;  %v1300_v50 = vrot.slane %v1298_v24, 4 }
  0x45   : > { %v491_v25 = vor.u32 %v490_v35, %v486_v7  ;;  %v501_v57 = vrot.slane %v499_v18, 4  ;;  %v508_v40 = vshll.u32 %v5217_v27, 16  ;;  %v512_v0 = vshrl.u32 %v5217_v27, 16  ;;  %v5254_v35 = vld [vmem:[%s4957_s28 + $0x7c] sm:$0xf] }
  0x46   : > { %6206 = vst [vmem:[#allocation11_spill] sm:$0xff] %v5225_v49  ;;  %4241 = vmatprep.mubr.msk.bf16.mxu0 %vm747_vm2, %v5225_v49  ;;  %v487_v60 = vsel %vm4996_vm3, %v482_v28, %v486_v7  ;;  %v1302_v43 = vsel %vm5203_vm6, %v1300_v50, %v1301_v45  ;;  %v518_v1 = vshll.u32 %v5222_v34, 16  ;;  %v504_v7 = vrot.slane %v502_v58, 5  ;;  %v5257_v18 = vld [vmem:[%s4957_s28 + $0x80] sm:$0x1] }
  0x47   : > { %4082 = vmatmul.mubr.msk.bf16.gmra.mrb[12].mxu1 %vm747_vm2, %v5225_v49  ;;  %v492_v12 = vrot.slane %v491_v25, 4  ;;  %v5246_v13 = vcombine.low %v1299_v22, %v1302_v43  ;;  %v510_v41 = vrot.slane %v508_v40, 5  ;;  %v514_v26 = vrot.slane %v512_v0, 4 }
  0x48   : > { %v520_v11 = vrot.slane %v518_v1, 5  ;;  %v3560_v20 = vrot.slane %v5009_v42, 9  ;;  %v1307_v45 = vrot.slane %v1305_v2, 4  ;;  %v505_v23 = vor.u32 %v504_v7, %v501_v57  ;;  %v5274_v1 = vld [vmem:[%s4957_s28 + $0x84] sm:$0xf] }
  0x49   : > { %6207 = vst [vmem:[#allocation12_spill] sm:$0xff] %v5246_v13  ;;  %v497_v24 = vsel %vm4996_vm3, %v492_v12, %v496_v38  ;;  %v523_v28 = vshrl.u32 %v5242_v5, 16  ;;  %v526_v22 = vshll.u32 %v5242_v5, 16  ;;  %v515_v25 = vor.u32 %v514_v26, %v510_v41  ;;  %v5284_v12 = vld [vmem:[%s4957_s28 + $0x88] sm:$0xf] }
  0x4a   : > { %v5261_v50 = vcombine.low %v487_v60, %v497_v24  ;;  %v1306_v58 = vsel %vm5203_vm6, %v3560_v20, %v1305_v2  ;;  %v1309_v38 = vsel %vm5203_vm6, %v1307_v45, %v1308_v3  ;;  %v506_v57 = vrot.slane %v505_v23, 4  ;;  %v5287_v7 = vld [vmem:[%s4957_s28 + $0x8c] sm:$0x1] }
  0x4b   : > { %v5271_v40 = vcombine.low %v1306_v58, %v1309_v38  ;;  %v525_v43 = vrot.slane %v523_v28, 4  ;;  %v528_v0 = vrot.slane %v526_v22, 5  ;;  %v516_v60 = vrot.slane %v515_v25, 4 }
  0x4c   : > { %6208 = vst [vmem:[#allocation13_spill] sm:$0xff] %v5261_v50  ;;  %4242 = vmatmul.mubr.msk.bf16.gmra.mrb[12].mxu0 %vm747_vm2, %v5261_v50  ;;  %4085 = vmatprep.mubr.msk.bf16.mxu1 %vm747_vm2, %v5261_v50  ;;  %v532_v2 = vshll.u32 %v5254_v35, 16  ;;  %v536_v47 = vshrl.u32 %v5254_v35, 16  ;;  %v542_v3 = vshll.u32 %v5257_v18, 16  ;;  %v511_v26 = vsel %vm4996_vm3, %v506_v57, %v510_v41 }
  0x4d   : > { %6209 = vst [vmem:[#allocation14_spill] sm:$0xff] %v5271_v40  ;;  %4269 = vmatprep.mubr.msk.bf16.mxu0 %vm747_vm2, %v5246_v13  ;;  %v529_v20 = vor.u32 %v528_v0, %v525_v43  ;;  %v3561_v45 = vrot.slane %v5027_v53, 9  ;;  %v1312_v24 = vrot.slane %v5030_v54, 5  ;;  %v521_v23 = vsel %vm4996_vm3, %v516_v60, %v520_v11 }
  0x4e   : > { %v534_v28 = vrot.slane %v532_v2, 5  ;;  %v538_v22 = vrot.slane %v536_v47, 4  ;;  %v544_v25 = vrot.slane %v542_v3, 5  ;;  %v5297_v58 = vcombine.low %v511_v26, %v521_v23 }
  0x4f   : > { %v530_v38 = vrot.slane %v529_v20, 4  ;;  %v1313_v50 = vsel %vm5203_vm6, %v3561_v45, %v1312_v24  ;;  %v1314_v49 = vrot.slane %v1312_v24, 4  ;;  %v1315_v57 = vrot.slane %v5034_v59, 5  ;;  %v5314_v45 = vld [vmem:[%s4957_s28 + $0x90] sm:$0xf]  ;;  %v4745_v24 = vld [vmem:[%s6160_s1 + $0xc8] sm:$0xff]  }
  0x50   : > { %6210 = vst [vmem:[#allocation15_spill] sm:$0xff] %v5297_v58  ;;  %v539_v41 = vor.u32 %v538_v22, %v534_v28  ;;  %v547_v43 = vshrl.u32 %v5274_v1, 16  ;;  %v550_v0 = vshll.u32 %v5274_v1, 16  ;;  %4086 = vmatmul.mubr.msk.bf16.gmra.mrb[16].mxu1 %vm747_vm2, %v5297_v58  ;;  %v556_v60 = vshll.u32 %v5284_v12, 16  ;;  %v5322_v58 = vld [vmem:[%s4957_s28 + $0x94] sm:$0xf] }
  0x51   : > { %v535_v11 = vsel %vm4996_vm3, %v530_v38, %v534_v28  ;;  %v560_v2 = vshrl.u32 %v5284_v12, 16  ;;  %v566_v47 = vshll.u32 %v5287_v7, 16  ;;  %v1316_v59 = vsel %vm5203_vm6, %v1314_v49, %v1315_v57 }
  0x52   : > { %v540_v3 = vrot.slane %v539_v41, 4  ;;  %v549_v26 = vrot.slane %v547_v43, 4  ;;  %v552_v20 = vrot.slane %v550_v0, 5  ;;  %v5319_v23 = vcombine.low %v1313_v50, %v1316_v59  ;;  %v5331_v0 = vld [vmem:[%s4957_s28 + $0x98] sm:$0x1] }
  0x53   : > { %v558_v28 = vrot.slane %v556_v60, 5  ;;  %v562_v22 = vrot.slane %v560_v2, 4  ;;  %v568_v38 = vrot.slane %v566_v47, 5  ;;  %v3562_v57 = vrot.slane %v5046_v10, 9 }
  0x54   : > { %6211 = vst [vmem:[#allocation16_spill] sm:$0xff] %v5319_v23  ;;  %4270 = vmatmul.mubr.msk.bf16.vlgmr.msra.gmra.mrb[0].mxu0 %vm747_vm2, %v5271_v40  ;;  %v545_v49 = vsel %vm4996_vm3, %v540_v3, %v544_v25  ;;  %v553_v41 = vor.u32 %v552_v20, %v549_v26  ;;  %v1319_v43 = vrot.slane %v5054_v16, 5  ;;  %v1322_v2 = vrot.slane %v5061_v30, 5  ;;  %v5441_v40 = vld [vmem:[%s4957_s28 + $0xbc] sm:$0x1] }
  0x55   : > { %4302 = vmatpush3.bf16.msra.mxu0 %v5178_v21  ;;  %v5334_v50 = vcombine.low %v535_v11, %v545_v49  ;;  %4273 = vmatprep.mubr.msk.bf16.mxu0 %vm747_vm2, %v5319_v23  ;;  %v563_v60 = vor.u32 %v562_v22, %v558_v28  ;;  %v571_v25 = vshrl.u32 %v5314_v45, 16  ;;  %v574_v26 = vshll.u32 %v5314_v45, 16  ;;  %v5344_v21 = vld [vmem:[%s4957_s28 + $0x9c] sm:$0xf]  ;;  %v4748_v11 = vld [vmem:[%s6160_s1 + $0xd0] sm:$0xff]  }
  0x56   : > { %v554_v47 = vrot.slane %v553_v41, 4  ;;  %v1320_v3 = vsel %vm5203_vm6, %v3562_v57, %v1319_v43  ;;  %v1321_v59 = vrot.slane %v1319_v43, 4  ;;  %4303 = vmatprep.subr.bf16.mxu0 %v4745_v24  ;;  %v580_v22 = vshll.u32 %v5322_v58, 16  ;;  %v5354_v41 = vld [vmem:[%s4957_s28 + $0xa0] sm:$0xf] }
  0x57   : > { %6212 = vst [vmem:[#allocation17_spill] sm:$0xff] %v5334_v50  ;;  %4089 = vmatprep.mubr.msk.bf16.mxu1 %vm747_vm2, %v5334_v50  ;;  %v564_v30 = vrot.slane %v563_v60, 4  ;;  %v573_v20 = vrot.slane %v571_v25, 4  ;;  %v584_v49 = vshrl.u32 %v5322_v58, 16  ;;  %v576_v63 = vrot.slane %v574_v26, 5  ;;  %v4753_v60 = vld [vmem:[%s6160_s1 + $0xd8] sm:$0xff]  }
  0x58   : > { %v559_v57 = vsel %vm4996_vm3, %v554_v47, %v558_v28  ;;  %v1323_v43 = vsel %vm5203_vm6, %v1321_v59, %v1322_v2  ;;  %v590_v33 = vshll.u32 %v5331_v0, 16  ;;  %v582_v56 = vrot.slane %v580_v22, 5  ;;  %v5372_v59 = vld [vmem:[%s4957_s28 + $0xa4] sm:$0x1] }
  0x59   : > { %v569_v25 = vsel %vm4996_vm3, %v564_v30, %v568_v38  ;;  %v5366_v50 = vcombine.low %v1320_v3, %v1323_v43  ;;  %v586_v17 = vrot.slane %v584_v49, 4  ;;  %4304 = vmatpush3.bf16.msra.mxu0 %v4745_v24  ;;  %v577_v28 = vor.u32 %v576_v63, %v573_v20 }
  0x5a   : > { %v5368_v44 = vcombine.low %v559_v57, %v569_v25  ;;  %v592_v2 = vrot.slane %v590_v33, 5  ;;  %v3563_v47 = vrot.slane %v5069_v36, 9  ;;  %4305 = vmatprep.subr.bf16.mxu0 %v4748_v11  ;;  %v1326_v23 = vrot.slane %v5084_v51, 5 }
  0x5b   : > { %6213 = vst [vmem:[#allocation18_spill] sm:$0xff] %v5366_v50  ;;  %v587_v26 = vor.u32 %v586_v17, %v582_v56  ;;  %v1329_v38 = vrot.slane %v5093_v62, 5  ;;  %v595_v3 = vshrl.u32 %v5344_v21, 16  ;;  %v578_v63 = vrot.slane %v577_v28, 4  ;;  %v5385_v17 = vld [vmem:[%s4957_s28 + $0xa8] sm:$0xf] }
  0x5c   : > { %6214 = vst [vmem:[#allocation19_spill] sm:$0xff] %v5368_v44  ;;  %4090 = vmatmul.mubr.msk.bf16.gmra.mrb[20].mxu1 %vm747_vm2, %v5368_v44  ;;  %4274 = vmatmul.mubr.msk.bf16.gmra.mrb[4].mxu0 %vm747_vm2, %v5366_v50  ;;  %v598_v33 = vshll.u32 %v5344_v21, 16  ;;  %v604_v24 = vshll.u32 %v5354_v41, 16  ;;  %v608_v30 = vshrl.u32 %v5354_v41, 16  ;;  %v1327_v62 = vsel %vm5203_vm6, %v3563_v47, %v1326_v23  ;;  %v5394_v44 = vld [vmem:[%s6160_s1 + $0xe0] sm:$0xff]  }
  0x5d   : > { %v588_v20 = vrot.slane %v587_v26, 4  ;;  %v1328_v22 = vrot.slane %v1326_v23, 4  ;;  %v597_v49 = vrot.slane %v595_v3, 4  ;;  %4306 = vmatpush3.bf16.msra.mxu0 %v4748_v11  ;;  %v583_v57 = vsel %vm4996_vm3, %v578_v63, %v582_v56  ;;  %6215 = vst [vmem:[#allocation20_spill] sm:$0xff] %v5394_v44  ;;  %v5403_v56 = vld [vmem:[%s4957_s28 + $0xac] sm:$0xf] }
  0x5e   : > { %v600_v43 = vrot.slane %v598_v33, 5  ;;  %v606_v25 = vrot.slane %v604_v24, 5  ;;  %v610_v28 = vrot.slane %v608_v30, 4  ;;  %4307 = vmatprep.subr.bf16.mxu0 %v4753_v60  ;;  %v614_v11 = vshll.u32 %v5372_v59, 16  ;;  %v5410_v30 = vld [vmem:[%s4957_s28 + $0xb0] sm:$0x1] }
  0x5f   : > { %v593_v26 = vsel %vm4996_vm3, %v588_v20, %v592_v2  ;;  %v1330_v23 = vsel %vm5203_vm6, %v1328_v22, %v1329_v38  ;;  %v3564_v47 = vrot.slane %v5101_v6, 9  ;;  %v1333_v2 = vrot.slane %v5109_v15, 5 }
  0x60   : > { %v5405_v3 = vcombine.low %v583_v57, %v593_v26  ;;  %v5407_v63 = vcombine.low %v1327_v62, %v1330_v23  ;;  %v601_v33 = vor.u32 %v600_v43, %v597_v49  ;;  %v611_v24 = vor.u32 %v610_v28, %v606_v25  ;;  %v5422_v43 = vld [vmem:[%s4957_s28 + $0xb4] sm:$0xf] }
  0x61   : > { %v616_v50 = vrot.slane %v614_v11, 5  ;;  %v1336_v38 = vrot.slane %v5121_v31, 5  ;;  %v619_v20 = vshrl.u32 %v5385_v17, 16  ;;  %4308 = vmatpush3.bf16.msra.mxu0 %v4753_v60  ;;  %v622_v49 = vshll.u32 %v5385_v17, 16 }
  0x62   : > { %6216 = vst [vmem:[#allocation21_spill] sm:$0xff] %v5405_v3  ;;  %6217 = vst [vmem:[#allocation22_spill] sm:$0xff] %v5407_v63  ;;  %4093 = vmatprep.mubr.msk.bf16.mxu1 %vm747_vm2, %v5405_v3  ;;  %4277 = vmatprep.mubr.msk.bf16.mxu0 %vm747_vm2, %v5407_v63  ;;  %v602_v62 = vrot.slane %v601_v33, 4  ;;  %v612_v22 = vrot.slane %v611_v24, 4  ;;  %v628_v57 = vshll.u32 %v5403_v56, 16  ;;  %v1334_v31 = vsel %vm5203_vm6, %v3564_v47, %v1333_v2 }
  0x63   : > { %v1335_v60 = vrot.slane %v1333_v2, 4  ;;  %v621_v28 = vrot.slane %v619_v20, 4  ;;  %v632_v26 = vshrl.u32 %v5403_v56, 16  ;;  %4341 = vmatprep.subr.bf16.mxu0 %v5394_v44  ;;  %v624_v33 = vrot.slane %v622_v49, 5  ;;  %v5433_v3 = vld [vmem:[%s4957_s28 + $0xb8] sm:$0xf] }
  0x64   : > { %v607_v23 = vsel %vm4996_vm3, %v602_v62, %v606_v25  ;;  %v617_v11 = vsel %vm4996_vm3, %v612_v22, %v616_v50  ;;  %v630_v24 = vrot.slane %v628_v57, 5  ;;  %v638_v20 = vshll.u32 %v5410_v30, 16 }
  0x65   : > { %v5435_v63 = vcombine.low %v607_v23, %v617_v11  ;;  %v1337_v47 = vsel %vm5203_vm6, %v1335_v60, %v1336_v38  ;;  %v634_v2 = vrot.slane %v632_v26, 4  ;;  %v625_v25 = vor.u32 %v624_v33, %v621_v28 }
  0x66   : > { %v5443_v13 = vcombine.low %v1334_v31, %v1337_v47  ;;  %v3565_v62 = vrot.slane %v5131_v39, 9  ;;  %v1340_v50 = vrot.slane %v5140_v52, 5  ;;  %v640_v49 = vrot.slane %v638_v20, 5 }
  0x67   : > { %6218 = vst [vmem:[#allocation23_spill] sm:$0xff] %v5435_v63  ;;  %4094 = vmatmul.mubr.msk.bf16.gmra.mrb[24].mxu1 %vm747_vm2, %v5435_v63  ;;  %v635_v22 = vor.u32 %v634_v2, %v630_v24  ;;  %v1343_v57 = vrot.slane %v5150_v61, 5  ;;  %v643_v38 = vshrl.u32 %v5422_v43, 16  ;;  %v626_v60 = vrot.slane %v625_v25, 4 }
  0x68   : > { %6219 = vst [vmem:[#allocation24_spill] sm:$0xff] %v5443_v13  ;;  %4278 = vmatmul.mubr.msk.bf16.gmra.mrb[8].mxu0 %vm747_vm2, %v5443_v13  ;;  %v1341_v31 = vsel %vm5203_vm6, %v3565_v62, %v1340_v50  ;;  %v1342_v28 = vrot.slane %v1340_v50, 4  ;;  %v646_v26 = vshll.u32 %v5422_v43, 16  ;;  %v652_v33 = vshll.u32 %v5433_v3, 16 }
  0x69   : > { %v636_v23 = vrot.slane %v635_v22, 4  ;;  %v645_v11 = vrot.slane %v643_v38, 4  ;;  %v656_v47 = vshrl.u32 %v5433_v3, 16  ;;  %v631_v61 = vsel %vm4996_vm3, %v626_v60, %v630_v24 }
  0x6a   : > { %v1344_v2 = vsel %vm5203_vm6, %v1342_v28, %v1343_v57  ;;  %v648_v20 = vrot.slane %v646_v26, 5  ;;  %v662_v25 = vshll.u32 %v5441_v40, 16  ;;  %v654_v22 = vrot.slane %v652_v33, 5 }
  0x6b   : > { %v641_v62 = vsel %vm4996_vm3, %v636_v23, %v640_v49  ;;  %v5465_v50 = vcombine.low %v1341_v31, %v1344_v2  ;;  %v658_v38 = vrot.slane %v656_v47, 4  ;;  %v3566_v39 = vrot.slane %v5164_v19, 9 }
  0x6c   : > { %v5467_v63 = vcombine.low %v631_v61, %v641_v62  ;;  %v649_v13 = vor.u32 %v648_v20, %v645_v11  ;;  %v664_v44 = vrot.slane %v662_v25, 5  ;;  %v1347_v57 = vrot.slane %v5169_v32, 5 }
  0x6d   : > { %4281 = vmatprep.mubr.msk.bf16.mxu0 %vm747_vm2, %v5465_v50  ;;  %v659_v24 = vor.u32 %v658_v38, %v654_v22  ;;  %v1350_v60 = vrot.slane %v5183_v48, 5  ;;  %v3567_v49 = vrot.slane %v5197_v4, 9  ;;  %v3522_v28 = vcombine.low %v4963_v8, %v4966_v9 }
  0x6e   : > { %4097 = vmatprep.mubr.msk.bf16.mxu1 %vm747_vm2, %v5467_v63  ;;  %v650_v31 = vrot.slane %v649_v13, 4  ;;  %v1354_v26 = vrot.slane %v5217_v27, 5  ;;  %v1357_v23 = vrot.slane %v5222_v34, 5  ;;  %v1348_v33 = vsel %vm5203_vm6, %v3566_v39, %v1347_v57 }
  0x6f   : > { %v660_v11 = vrot.slane %v659_v24, 4  ;;  %v1349_v47 = vrot.slane %v1347_v57, 4  ;;  %v1361_v48 = vrot.slane %v5254_v35, 5  ;;  %v3568_v8 = vrot.slane %v5242_v5, 9 }
  0x70   : > { %v655_v61 = vsel %vm4996_vm3, %v650_v31, %v654_v22  ;;  %v1355_v13 = vsel %vm5203_vm6, %v3567_v49, %v1354_v26  ;;  %v1356_v2 = vrot.slane %v1354_v26, 4  ;;  %v1364_v39 = vrot.slane %v5257_v18, 5 }
  0x71   : > { %v665_v9 = vsel %vm4996_vm3, %v660_v11, %v664_v44  ;;  %v1351_v34 = vsel %vm5203_vm6, %v1349_v47, %v1350_v60  ;;  %v1363_v20 = vrot.slane %v1361_v48, 4  ;;  %v3569_v24 = vrot.slane %v5274_v1, 9 }
  0x72   : > { %v5494_v25 = vcombine.low %v655_v61, %v665_v9  ;;  %v5496_v62 = vcombine.low %v1348_v33, %v1351_v34  ;;  %v1358_v22 = vsel %vm5203_vm6, %v1356_v2, %v1357_v23  ;;  %v1368_v57 = vrot.slane %v5284_v12, 5  ;;  %v4752_v2 = vld [vmem:[%s6160_s1 + $0x48] sm:$0xff]  }
  0x73   : > { %v5500_v38 = vcombine.low %v1355_v13, %v1358_v22  ;;  %v1371_v44 = vrot.slane %v5287_v7, 5  ;;  %v1362_v18 = vsel %vm5203_vm6, %v3568_v8, %v1361_v48  ;;  %v1365_v60 = vsel %vm5203_vm6, %v1363_v20, %v1364_v39 }
  0x74   : > { %4098 = vmatmul.mubr.msk.bf16.gmra.mrb[28].mxu1 %vm747_vm2, %v5494_v25  ;;  %4282 = vmatmul.mubr.msk.bf16.gmra.mrb[12].mxu0 %vm747_vm2, %v5496_v62  ;;  %v1370_v49 = vrot.slane %v1368_v57, 4  ;;  %v1375_v31 = vrot.slane %v5322_v58, 5  ;;  %v1382_v26 = vrot.slane %v5354_v41, 5  ;;  %v1369_v23 = vsel %vm5203_vm6, %v3569_v24, %v1368_v57 }
  0x75   : > { %4109 = vmatprep.mubr.msk.bf16.mxu1 %vm747_vm2, %v3522_v28  ;;  %4285 = vmatprep.mubr.msk.bf16.mxu0 %vm747_vm2, %v5500_v38  ;;  %v5522_v28 = vcombine.low %v1362_v18, %v1365_v60  ;;  %v3570_v11 = vrot.slane %v5314_v45, 9  ;;  %v1378_v47 = vrot.slane %v5331_v0, 5  ;;  %v5528_v48 = vcombine.low %v5009_v42, %v5016_v46 }
  0x76   : > { %v1372_v7 = vsel %vm5203_vm6, %v1370_v49, %v1371_v44  ;;  %v1377_v33 = vrot.slane %v1375_v31, 4  ;;  %v3571_v61 = vrot.slane %v5344_v21, 9  ;;  %v1384_v8 = vrot.slane %v1382_v26, 4 }
  0x77   : > { %v5531_v13 = vcombine.low %v1369_v23, %v1372_v7  ;;  %v1385_v9 = vrot.slane %v5372_v59, 5  ;;  %v1389_v34 = vrot.slane %v5403_v56, 5  ;;  %v1376_v42 = vsel %vm5203_vm6, %v3570_v11, %v1375_v31  ;;  %v5647_v31 = vld [vmem:[%s6160_s1 + $0x60] sm:$0xff]  }
  0x78   : > { %v1379_v46 = vsel %vm5203_vm6, %v1377_v33, %v1378_v47  ;;  %v5551_v0 = vcombine.low %v5027_v53, %v5030_v54  ;;  %v1383_v59 = vsel %vm5203_vm6, %v3571_v61, %v1382_v26  ;;  %v5557_v20 = vcombine.low %v5164_v19, %v5169_v32  ;;  %v4758_v53 = vld [vmem:[%s6160_s1 + $0x50] sm:$0xff]  }
  0x79   : > { %v3572_v39 = vrot.slane %v5385_v17, 9  ;;  %v1396_v22 = vrot.slane %v5433_v3, 5  ;;  %v5570_v54 = vcombine.low %v5197_v4, %v5217_v27  ;;  %v5572_v19 = vcombine.low %v1376_v42, %v1379_v46 }
  0x7a   : > { %v1391_v32 = vrot.slane %v1389_v34, 4  ;;  %v1392_v24 = vrot.slane %v5410_v30, 5  ;;  %v5577_v57 = vcombine.low %v5242_v5, %v5254_v35  ;;  %v5581_v44 = vcombine.low %v5274_v1, %v5284_v12  ;;  %v267_v30 = vld [vmem:[%s4957_s28 + $0xc8] sm:$0x1] }
  0x7b   : > { %v5585_v18 = vcombine.low %v5314_v45, %v5322_v58  ;;  %v5589_v4 = vcombine.low %v5344_v21, %v5354_v41  ;;  %v5593_v27 = vcombine.low %v5385_v17, %v5403_v56  ;;  %v5597_v5 = vcombine.low %v5046_v10, %v5054_v16  ;;  %v5608_v21 = vld [vmem:[%s4957_s28 + $0xc4] sm:$0xf]  ;;  %v4764_v10 = vld [vmem:[%s6160_s1 + $0x58] sm:$0xff]  }
  0x7c   : > { %4110 = vmatmul.mubr.msk.bf16.vlgmr.msra.gmra.mrb[0].mxu1 %vm747_vm2, %v5005_v37  ;;  %4286 = vmatmul.mubr.msk.bf16.gmra.mrb[16].mxu0 %vm747_vm2, %v5522_v28  ;;  %v5603_v1 = vcombine.low %v5422_v43, %v5433_v3  ;;  %v3573_v12 = vrot.slane %v5422_v43, 9  ;;  %v1398_v58 = vrot.slane %v1396_v22, 4  ;;  %v1399_v45 = vrot.slane %v5441_v40, 5  ;;  %v5631_v3 = vld [vmem:[%s4957_s28 + $0xc0] sm:$0xf] }
  0x7d   : > { %4142 = vmatpush3.bf16.msra.mxu1 %v5145_v55  ;;  %4113 = vmatprep.mubr.msk.bf16.mxu1 %vm747_vm2, %v5528_v48  ;;  %v1386_v55 = vsel %vm5203_vm6, %v1384_v8, %v1385_v9  ;;  %v1390_v16 = vsel %vm5203_vm6, %v3572_v39, %v1389_v34  ;;  %v1393_v41 = vsel %vm5203_vm6, %v1391_v32, %v1392_v24  ;;  %v2216_v40 = vrot.slane %v5608_v21, 5 }
  0x7e   : > { %4289 = vmatprep.mubr.msk.bf16.mxu0 %vm747_vm2, %v5531_v13  ;;  %4143 = vmatprep.subr.bf16.mxu1 %v4752_v2  ;;  %v5599_v35 = vcombine.low %v1383_v59, %v1386_v55  ;;  %v1397_v17 = vsel %vm5203_vm6, %v3573_v12, %v1396_v22  ;;  %v1400_v56 = vsel %vm5203_vm6, %v1398_v58, %v1399_v45  ;;  %v1958_v26 = vshrl.u32 %v5631_v3, 16  ;;  %v6220_v22 = vld [vmem:[#allocation7_spill] sm:$0xff]  ;;  %v6221_v45 = vld [vmem:[#allocation20_spill] sm:$0xff] }
  0x7f   : > { %v5636_v43 = vcombine.low %v5069_v36, %v5084_v51  ;;  %v5638_v60 = vcombine.low %v1390_v16, %v1393_v41  ;;  %v5642_v49 = vcombine.low %v5101_v6, %v5109_v15  ;;  %v1961_v23 = vshll.u32 %v5631_v3, 16  ;;  %v4772_v16 = vld [vmem:[%s6160_s1 + $0xf8] sm:$0xff]   ;;  %v4781_v41 = vld [vmem:[%s4957_s28 + $0x4] sm:$0xf] }
  0x80   : > { %v1967_v7 = vshll.u32 %v5608_v21, 16  ;;  %v1971_v36 = vshrl.u32 %v5608_v21, 16  ;;  %v5653_v51 = vcombine.low %v1397_v17, %v1400_v56  ;;  %v3676_v11 = vrot.slane %v5631_v3, 9  ;;  %v4776_v17 = vld [vmem:[%s6160_s1 + $0x100] sm:$0xff]   ;;  %v4782_v56 = vld [vmem:[%s4957_s28 + $0x8] sm:$0x1] }
  0x81   : > { %4144 = vmatpush3.bf16.msra.mxu1 %v4752_v2  ;;  %v2218_v6 = vrot.slane %v2216_v40, 4  ;;  %v2219_v15 = vrot.slane %v267_v30, 5  ;;  %v1960_v33 = vrot.slane %v1958_v26, 4  ;;  %v1963_v47 = vrot.slane %v1961_v23, 5  ;;  %v4783_v26 = vld [vmem:[%s4957_s28] sm:$0xf] }
  0x82   : > { %4145 = vmatprep.subr.bf16.mxu1 %v4758_v53  ;;  %v1969_v61 = vrot.slane %v1967_v7, 5  ;;  %v1973_v2 = vrot.slane %v1971_v36, 4  ;;  %v1977_v34 = vshll.u32 %v267_v30, 16  ;;  %v2217_v42 = vsel %vm5203_vm6, %v3676_v11, %v2216_v40 }
  0x83   : > { %v1964_v8 = vor.u32 %v1963_v47, %v1960_v33  ;;  %v2220_v46 = vsel %vm5203_vm6, %v2218_v6, %v2219_v15  ;;  %v1291_v40 = vrot.slane %v4781_v41, 5  ;;  %v1294_v30 = vrot.slane %v4782_v56, 5  ;;  %v4771_v15 = vld [vmem:[%s6160_s1 + $0x68] sm:$0xff]   ;;  %v6222_v33 = vld [vmem:[#allocation12_spill] sm:$0xff]  ;;  %v6234_v41 = vld [vmem:[#allocation13_spill] sm:$0xff] }
  0x84   : > { %4114 = vmatmul.mubr.msk.bf16.gmra.mrb[4].mxu1 %vm747_vm2, %v5551_v0  ;;  %4290 = vmatmul.mubr.msk.bf16.gmra.mrb[20].mxu0 %vm747_vm2, %v5572_v19  ;;  %v1974_v9 = vor.u32 %v1973_v2, %v1969_v61  ;;  %v1979_v39 = vrot.slane %v1977_v34, 5  ;;  %v5673_v32 = vcombine.low %v2217_v42, %v2220_v46  ;;  %v3558_v23 = vrot.slane %v4783_v26, 9  ;;  %v6223_v47 = vld [vmem:[#allocation14_spill] sm:$0xff]  ;;  %v4777_v2 = vld [vmem:[%s6160_s1 + $0x78] sm:$0xff]   ;;  %v4784_v34 = vld [vmem:[%s6160_s1 + $0x80] sm:$0xff]  }
  0x85   : > { %4117 = vmatprep.mubr.msk.bf16.mxu1 %vm747_vm2, %v5597_v5  ;;  %4293 = vmatprep.mubr.msk.bf16.mxu0 %vm747_vm2, %v5599_v35  ;;  %v1965_v59 = vrot.slane %v1964_v8, 4  ;;  %v1293_v7 = vrot.slane %v1291_v40, 4  ;;  %v6224_v8 = vld [vmem:[#allocation16_spill] sm:$0xff]  ;;  %v6226_v42 = vld [vmem:[#allocation22_spill] sm:$0xff]  ;;  %v6237_v56 = vld [vmem:[#allocation19_spill] sm:$0xff] }
  0x86   : > { %4146 = vmatpush3.bf16.msra.mxu1 %v4758_v53  ;;  %v1975_v55 = vrot.slane %v1974_v9, 4  ;;  %v5671_v53 = vcombine.low %v6220_v22, %v5140_v52  ;;  %v4765_v52 = vld [vmem:[%s6160_s1 + $0xe8] sm:$0xff]   ;;  %v1292_v36 = vsel %vm5203_vm6, %v3558_v23, %v1291_v40  ;;  %v5768_v9 = vcombine.low %v5631_v3, %v5608_v21  ;;  %v6227_v46 = vld [vmem:[#allocation24_spill] sm:$0xff]  ;;  %v5785_v3 = vld [vmem:[%s4957_s28 + $0xd0] sm:$0xf] }
  0x87   : > { %4147 = vmatprep.subr.bf16.mxu1 %v4764_v10  ;;  %v1970_v24 = vsel %vm4996_vm3, %v1965_v59, %v1969_v61  ;;  %v1295_v11 = vsel %vm5203_vm6, %v1293_v7, %v1294_v30  ;;  %v4775_v61 = vld [vmem:[%s6160_s1 + $0x70] sm:$0xff]   ;;  %v5782_v21 = vld [vmem:[%s4957_s28 + $0xcc] sm:$0xf]  ;;  %v2701_v23 = vshrl.u32 %v5785_v3, 16  ;;  %v6238_v7 = vld [vmem:[#allocation21_spill] sm:$0xff]  ;;  %v2946_v29 = vrot.slane %v5785_v3, 5 }
  0x88   : > { %v1980_v12 = vsel %vm4996_vm3, %v1975_v55, %v1979_v39  ;;  %v3582_v6 = vcombine.low %v1292_v36, %v1295_v11  ;;  %v3714_v59 = vcombine.low %v5782_v21, %v5785_v3  ;;  %v6228_v55 = vld [vmem:[#allocation5_spill] sm:$0xff]  ;;  %v4778_v39 = vld [vmem:[%s6160_s1 + $0x108] sm:$0xff]   ;;  %v6235_v40 = vld [vmem:[#allocation15_spill] sm:$0xff]  ;;  %v2688_v30 = vshrl.u32 %v5782_v21, 16 }
  0x89   : > { %v5679_v58 = vcombine.low %v1970_v24, %v1980_v12  ;;  %v6229_v22 = vld [vmem:[#allocation6_spill] sm:$0xff]  ;;  %v6230_v24 = vld [vmem:[#allocation8_spill] sm:$0xff]  ;;  %v4779_v12 = vld [vmem:[%s6160_s1 + $0x110] sm:$0xff]   ;;  %v2691_v26 = vshll.u32 %v5782_v21, 16 }
  0x8a   : > { %4148 = vmatpush3.bf16.msra.mxu1 %v4764_v10  ;;  %v4770_v10 = vld [vmem:[%s6160_s1 + $0xf0] sm:$0xff]   ;;  %v2690_v36 = vrot.slane %v2688_v30, 4 }
  0x8b   : > { %4181 = vmatprep.subr.bf16.mxu1 %v5647_v31  ;;  %v2693_v11 = vrot.slane %v2691_v26, 5 }
  0x8c   : > { %4118 = vmatmul.mubr.msk.bf16.gmra.mrb[8].mxu1 %vm747_vm2, %v5636_v43  ;;  %4294 = vmatmul.mubr.msk.bf16.gmra.mrb[24].mxu0 %vm747_vm2, %v5638_v60 }
  0x8d   : > { %4121 = vmatprep.mubr.msk.bf16.mxu1 %vm747_vm2, %v5642_v49  ;;  %4297 = vmatprep.mubr.msk.bf16.mxu0 %vm747_vm2, %v5653_v51 }
  0x94   : > { %4122 = vmatmul.mubr.msk.bf16.gmra.mrb[12].mxu1 %vm747_vm2, %v5671_v53  ;;  %4298 = vmatmul.mubr.msk.bf16.gmra.mrb[28].mxu0 %vm747_vm2, %v5673_v32 }
  0x95   : > { %4125 = vmatprep.mubr.msk.bf16.mxu1 %vm747_vm2, %v5557_v20  ;;  %4309 = vmatprep.mubr.msk.bf16.mxu0 %vm747_vm2, %v5528_v48 }
  0x9c   : > { %4126 = vmatmul.mubr.msk.bf16.gmra.mrb[16].mxu1 %vm747_vm2, %v5570_v54  ;;  %4310 = vmatmul.mubr.msk.bf16.vlgmr.msra.gmra.mrb[0].mxu0 %vm747_vm2, %v5551_v0 }
  0x9d   : > { %4342 = vmatpush3.bf16.msra.mxu0 %v6221_v45  ;;  %4129 = vmatprep.mubr.msk.bf16.mxu1 %vm747_vm2, %v5577_v57  ;;  %v6231_v45 = vld [vmem:[#allocation9_spill] sm:$0xff] }
  0x9e   : > { %4313 = vmatprep.mubr.msk.bf16.mxu0 %vm747_vm2, %v5597_v5  ;;  %4343 = vmatprep.subr.bf16.mxu0 %v4765_v52 }
  0xa1   : > { %4344 = vmatpush3.bf16.msra.mxu0 %v4765_v52  ;;  %v4780_v52 = vld [vmem:[%s6160_s1 + $0x118] sm:$0xff]  }
  0xa2   : > { %4345 = vmatprep.subr.bf16.mxu0 %v4770_v10 }
  0xa4   : > { %4130 = vmatmul.mubr.msk.bf16.gmra.mrb[20].mxu1 %vm747_vm2, %v5581_v44  ;;  %4314 = vmatmul.mubr.msk.bf16.gmra.mrb[4].mxu0 %vm747_vm2, %v5636_v43 }
  0xa5   : > { %4133 = vmatprep.mubr.msk.bf16.mxu1 %vm747_vm2, %v5585_v18  ;;  %4317 = vmatprep.mubr.msk.bf16.mxu0 %vm747_vm2, %v5642_v49 }
  0xa6   : > { %4346 = vmatpush3.bf16.msra.mxu0 %v4770_v10  ;;  %v6232_v10 = vld [vmem:[#allocation10_spill] sm:$0xff] }
  0xa7   : > { %4347 = vmatprep.subr.bf16.mxu0 %v4772_v16 }
  0xaa   : > { %4348 = vmatpush3.bf16.msra.mxu0 %v4772_v16  ;;  %v6233_v16 = vld [vmem:[#allocation11_spill] sm:$0xff] }
  0xab   : > { %4381 = vmatprep.subr.bf16.mxu0 %v4776_v17 }
  0xac   : > { %4134 = vmatmul.mubr.msk.bf16.gmra.mrb[24].mxu1 %vm747_vm2, %v5589_v4  ;;  %4318 = vmatmul.mubr.msk.bf16.gmra.mrb[8].mxu0 %vm747_vm2, %v5671_v53 }
  0xad   : > { %4137 = vmatprep.mubr.msk.bf16.mxu1 %vm747_vm2, %v5593_v27  ;;  %4321 = vmatprep.mubr.msk.bf16.mxu0 %vm747_vm2, %v5557_v20 }
  0xb4   : > { %4138 = vmatmul.mubr.msk.bf16.gmra.mrb[28].mxu1 %vm747_vm2, %v5603_v1  ;;  %4322 = vmatmul.mubr.msk.bf16.gmra.mrb[12].mxu0 %vm747_vm2, %v5570_v54 }
  0xb5   : > { %4149 = vmatprep.mubr.msk.bf16.mxu1 %vm747_vm2, %v3582_v6  ;;  %4325 = vmatprep.mubr.msk.bf16.mxu0 %vm747_vm2, %v5577_v57 }
  0xbc   : > { %4150 = vmatmul.mubr.msk.bf16.vlgmr.msra.gmra.mrb[0].mxu1 %vm747_vm2, %v6222_v33  ;;  %4326 = vmatmul.mubr.msk.bf16.gmra.mrb[16].mxu0 %vm747_vm2, %v5581_v44  ;;  %v5853_v33 = vld [vmem:[%s4957_s28 + $0xd4] sm:$0x1]  ;;  %s4852_s28 = smov [#allocation2]  }
  0xbd   : > { %4182 = vmatpush3.bf16.msra.mxu1 %v5647_v31  ;;  %4153 = vmatprep.mubr.msk.bf16.mxu1 %vm747_vm2, %v6223_v47  ;;  %v6225_v31 = vld [vmem:[#allocation18_spill] sm:$0xff]  ;;  %s4792_s8 = sshll.u32 %s4852_s28, 4  ;;  %s4793_s8 = int_to_ptr.vmem [resolvable:$false] %s4792_s8 }
  0xbe   : > { %4329 = vmatprep.mubr.msk.bf16.mxu0 %vm747_vm2, %v5585_v18  ;;  %4183 = vmatprep.subr.bf16.mxu1 %v4771_v15  ;;  %s4794_s9 = scalar_lea.vmem %s4793_s8, 8192  ;;  %p4795_p0 = scmp.lt.s32.totalorder %s6108_s27, %s4793_s8 }
  0xbf   : > { %p4796_p1 = scmp.lt.s32.totalorder %s4794_s9, %s4788_s6 }
  0xc1   : > { %4184 = vmatpush3.bf16.msra.mxu1 %v4771_v15  ;;  %v2703_v15 = vrot.slane %v2701_v23, 4  ;;  %p4797_p2 = por %p4796_p1, %p4795_p0 }
  0xc2   : > { %4185 = vmatprep.subr.bf16.mxu1 %v4775_v61 }
  0xc3   : > { %p4798_p3 = pnand %p4797_p2, %p4791_p13 }
  0xc4   : > { %4154 = vmatmul.mubr.msk.bf16.gmra.mrb[4].mxu1 %vm747_vm2, %v6224_v8  ;;  %4330 = vmatmul.mubr.msk.bf16.gmra.mrb[20].mxu0 %vm747_vm2, %v5589_v4 }
  0xc5   : > { %4157 = vmatprep.mubr.msk.bf16.mxu1 %vm747_vm2, %v6225_v31  ;;  %4333 = vmatprep.mubr.msk.bf16.mxu0 %vm747_vm2, %v5593_v27 }
  0xc6   : > { %4186 = vmatpush3.bf16.msra.mxu1 %v4775_v61  ;;  %v6239_v61 = vld [vmem:[#allocation23_spill] sm:$0xff] }
  0xc7   : > { %4187 = vmatprep.subr.bf16.mxu1 %v4777_v2 }
  0xca   : > { %4188 = vmatpush3.bf16.msra.mxu1 %v4777_v2  ;;  %v2694_v2 = vor.u32 %v2693_v11, %v2690_v36  ;;  %v3867_v36 = vld [vmem:[%s5975_s12 + $0x10] sm:$0xff]  }
  0xcb   : > { %4421 = vmatprep.subr.bf16.mxu1 %v4784_v34 }
  0xcc   : > { %4158 = vmatmul.mubr.msk.bf16.gmra.mrb[8].mxu1 %vm747_vm2, %v6226_v42  ;;  %4334 = vmatmul.mubr.msk.bf16.gmra.mrb[24].mxu0 %vm747_vm2, %v5603_v1 }
  0xcd   : > { %4161 = vmatprep.mubr.msk.bf16.mxu1 %vm747_vm2, %v6227_v46  ;;  %4337 = vmatprep.mubr.msk.bf16.mxu0 %vm747_vm2, %v5768_v9 }
  0xd4   : > { %4162 = vmatmul.mubr.msk.bf16.gmra.mrb[12].mxu1 %vm747_vm2, %v5465_v50  ;;  %4338 = vmatmul.mubr.msk.bf16.gmra.mrb[28].mxu0 %vm747_vm2, %v3714_v59  ;;  %v2707_v59 = vshll.u32 %v5853_v33, 16 }
  0xd5   : > { %4165 = vmatprep.mubr.msk.bf16.mxu1 %vm747_vm2, %v5496_v62  ;;  %4349 = vmatprep.mubr.msk.bf16.mxu0 %vm747_vm2, %v6228_v55  ;;  %v4787_v55 = vld [vmem:[%s6160_s1 + $0x98] sm:$0xff]  }
  0xdc   : > { %4166 = vmatmul.mubr.msk.bf16.gmra.mrb[16].mxu1 %vm747_vm2, %v5500_v38  ;;  %4350 = vmatmul.mubr.msk.bf16.vlgmr.msra.gmra.mrb[0].mxu0 %vm747_vm2, %v6229_v22  ;;  %v2709_v22 = vrot.slane %v2707_v59, 5 }
  0xdd   : > { %4382 = vmatpush3.bf16.msra.mxu0 %v4776_v17  ;;  %4169 = vmatprep.mubr.msk.bf16.mxu1 %vm747_vm2, %v5522_v28  ;;  %v6236_v17 = vld [vmem:[#allocation17_spill] sm:$0xff] }
  0xde   : > { %4353 = vmatprep.mubr.msk.bf16.mxu0 %vm747_vm2, %v6230_v24  ;;  %4383 = vmatprep.subr.bf16.mxu0 %v4778_v39 }
  0xe1   : > { %4384 = vmatpush3.bf16.msra.mxu0 %v4778_v39 }
  0xe2   : > { %4385 = vmatprep.subr.bf16.mxu0 %v4779_v12 }
  0xe4   : > { %4170 = vmatmul.mubr.msk.bf16.gmra.mrb[20].mxu1 %vm747_vm2, %v5531_v13  ;;  %4354 = vmatmul.mubr.msk.bf16.gmra.mrb[4].mxu0 %vm747_vm2, %v6231_v45 }
  0xe5   : > { %4173 = vmatprep.mubr.msk.bf16.mxu1 %vm747_vm2, %v5572_v19  ;;  %4357 = vmatprep.mubr.msk.bf16.mxu0 %vm747_vm2, %v6232_v10 }
  0xe6   : > { %4386 = vmatpush3.bf16.msra.mxu0 %v4779_v12 }
  0xe7   : > { %4387 = vmatprep.subr.bf16.mxu0 %v4780_v52 }
  0xea   : > { %4388 = vmatpush3.bf16.msra.mxu0 %v4780_v52 }
  0xec   : > { %4174 = vmatmul.mubr.msk.bf16.gmra.mrb[24].mxu1 %vm747_vm2, %v5599_v35  ;;  %4358 = vmatmul.mubr.msk.bf16.gmra.mrb[8].mxu0 %vm747_vm2, %v6233_v16 }
  0xed   : > { %4177 = vmatprep.mubr.msk.bf16.mxu1 %vm747_vm2, %v5638_v60  ;;  %4361 = vmatprep.mubr.msk.bf16.mxu0 %vm747_vm2, %v6234_v41 }
  0xf4   : > { %4178 = vmatmul.mubr.msk.bf16.gmra.mrb[28].mxu1 %vm747_vm2, %v5653_v51  ;;  %4362 = vmatmul.mubr.msk.bf16.gmra.mrb[12].mxu0 %vm747_vm2, %v6235_v40 }
  0xf5   : > { %4189 = vmatprep.mubr.msk.bf16.mxu1 %vm747_vm2, %v5005_v37  ;;  %4365 = vmatprep.mubr.msk.bf16.mxu0 %vm747_vm2, %v6236_v17  ;;  %v2697_v37 = vshll.u32 %v5785_v3, 16 }
  0xf7   : > { %v2699_v6 = vrot.slane %v2697_v37, 5  ;;  %v3868_v37 = vld [vmem:[%s5975_s12 + $0x18] sm:$0xff]  }
  0xfc   : > { %4190 = vmatmul.mubr.msk.bf16.vlgmr.msra.gmra.mrb[0].mxu1 %vm747_vm2, %v5528_v48  ;;  %4366 = vmatmul.mubr.msk.bf16.gmra.mrb[16].mxu0 %vm747_vm2, %v6237_v56  ;;  %v4785_v48 = vld [vmem:[%s6160_s1 + $0x88] sm:$0xff]  }
  0xfd   : > { %4425 = vmatpush3.bf16.msra.mxu1 %v4784_v34  ;;  %4193 = vmatprep.mubr.msk.bf16.mxu1 %vm747_vm2, %v5551_v0  ;;  %v4786_v0 = vld [vmem:[%s6160_s1 + $0x90] sm:$0xff]   ;;  %v2704_v34 = vor.u32 %v2703_v15, %v2699_v6 }
  0xfe   : > { %4369 = vmatprep.mubr.msk.bf16.mxu0 %vm747_vm2, %v6238_v7  ;;  %4422 = vmatprep.subr.bf16.mxu1 %v4785_v48 }
  0xff   : > { %v2705_v39 = vrot.slane %v2704_v34, 4 }
 0x101   : > { %4426 = vmatpush3.bf16.msra.mxu1 %v4785_v48  ;;  %v2710_v24 = vsel %vm4996_vm3, %v2705_v39, %v2709_v22 }
 0x102   : > { %4423 = vmatprep.subr.bf16.mxu1 %v4786_v0 }
 0x104   : > { %4194 = vmatmul.mubr.msk.bf16.gmra.mrb[4].mxu1 %vm747_vm2, %v5597_v5  ;;  %4370 = vmatmul.mubr.msk.bf16.gmra.mrb[20].mxu0 %vm747_vm2, %v6239_v61  ;;  %v2695_v5 = vrot.slane %v2694_v2, 4 }
 0x105   : > { %4197 = vmatprep.mubr.msk.bf16.mxu1 %vm747_vm2, %v5636_v43  ;;  %4373 = vmatprep.mubr.msk.bf16.mxu0 %vm747_vm2, %v5467_v63 }
 0x106   : > { %4427 = vmatpush3.bf16.msra.mxu1 %v4786_v0  ;;  %v2700_v43 = vsel %vm4996_vm3, %v2695_v5, %v2699_v6 }
 0x107   : > { %4424 = vmatprep.subr.bf16.mxu1 %v4787_v55  ;;  %v3743_v12 = vcombine.low %v2700_v43, %v2710_v24  ;;  %v3817_v43 = vunpack.c.h.bf16 %v3868_v37 }
 0x10a   : > { %4428 = vmatpush3.bf16.msra.mxu1 %v4787_v55  ;;  %v3812_v55 = vunpack.c.l.bf16 %v3867_v36 }
 0x10c   : > { %4198 = vmatmul.mubr.msk.bf16.gmra.mrb[8].mxu1 %vm747_vm2, %v5642_v49  ;;  %4374 = vmatmul.mubr.msk.bf16.gmra.mrb[24].mxu0 %vm747_vm2, %v5494_v25 }
 0x10d   : > { %4201 = vmatprep.mubr.msk.bf16.mxu1 %vm747_vm2, %v5671_v53  ;;  %4377 = vmatprep.mubr.msk.bf16.mxu0 %vm747_vm2, %v5679_v58 }
 0x114   : > { %4202 = vmatmul.mubr.msk.bf16.gmra.mrb[12].mxu1 %vm747_vm2, %v5557_v20  ;;  %4378 = vmatmul.mubr.msk.bf16.gmra.mrb[28].mxu0 %vm747_vm2, %v3743_v12 }
 0x115   : > { %4205 = vmatprep.mubr.msk.bf16.mxu1 %vm747_vm2, %v5570_v54  ;;  %4389 = vmatprep.mubr.msk.bf16.mxu0 %vm747_vm2, %v6223_v47 }
 0x11c   : > { %4206 = vmatmul.mubr.msk.bf16.gmra.mrb[16].mxu1 %vm747_vm2, %v5577_v57  ;;  %4390 = vmatmul.mubr.msk.bf16.vlgmr.msra.gmra.mrb[0].mxu0 %vm747_vm2, %v6224_v8  ;;  %v5983_v8 = vld [vmem:[%s6161_s2] ss:$0 sm:$0xff] }
 0x11d   : > { %4209 = vmatprep.mubr.msk.bf16.mxu1 %vm747_vm2, %v5581_v44  ;;  %4393 = vmatprep.mubr.msk.bf16.mxu0 %vm747_vm2, %v6225_v31 }
 0x124   : > { %4210 = vmatmul.mubr.msk.bf16.gmra.mrb[20].mxu1 %vm747_vm2, %v5585_v18  ;;  %4394 = vmatmul.mubr.msk.bf16.gmra.mrb[4].mxu0 %vm747_vm2, %v6226_v42 }
 0x125   : > { %4213 = vmatprep.mubr.msk.bf16.mxu1 %vm747_vm2, %v5589_v4  ;;  %4397 = vmatprep.mubr.msk.bf16.mxu0 %vm747_vm2, %v6227_v46 }
 0x12c   : > { %4214 = vmatmul.mubr.msk.bf16.gmra.mrb[24].mxu1 %vm747_vm2, %v5593_v27  ;;  %4398 = vmatmul.mubr.msk.bf16.gmra.mrb[8].mxu0 %vm747_vm2, %v5465_v50  ;;  %v3764_v50 = vrot.slane %v5782_v21, 9 }
 0x12d   : > { %4217 = vmatprep.mubr.msk.bf16.mxu1 %vm747_vm2, %v5603_v1  ;;  %4401 = vmatprep.mubr.msk.bf16.mxu0 %vm747_vm2, %v5496_v62  ;;  %v2948_v62 = vrot.slane %v2946_v29, 4 }
 0x134   : > { %4218 = vmatmul.mubr.msk.bf16.gmra.mrb[28].mxu1 %vm747_vm2, %v5768_v9  ;;  %4402 = vmatmul.mubr.msk.bf16.gmra.mrb[12].mxu0 %vm747_vm2, %v5500_v38  ;;  %v2949_v38 = vrot.slane %v5853_v33, 5 }
 0x135   : > { %4245 = vmatprep.mubr.msk.bf16.mxu1 %vm747_vm2, %v6235_v40  ;;  %4405 = vmatprep.mubr.msk.bf16.mxu0 %vm747_vm2, %v5522_v28  ;;  %v2947_v28 = vsel %vm5203_vm6, %v3764_v50, %v2946_v29  ;;  %v3813_v50 = vunpack.c.h.bf16 %v3867_v36 }
 0x13c   : > { %4246 = vmatmul.mubr.msk.bf16.vlgmr.msra.gmra.mrb[16].mxu1 %vm747_vm2, %v6236_v17  ;;  %4406 = vmatmul.mubr.msk.bf16.gmra.mrb[16].mxu0 %vm747_vm2, %v5531_v13  ;;  %v2950_v13 = vsel %vm5203_vm6, %v2948_v62, %v2949_v38 }
 0x13d   : > { %4249 = vmatprep.mubr.msk.bf16.mxu1 %vm747_vm2, %v6237_v56  ;;  %4409 = vmatprep.mubr.msk.bf16.mxu0 %vm747_vm2, %v5572_v19  ;;  %v3773_v20 = vcombine.low %v2947_v28, %v2950_v13 }
 0x144   : > { %4250 = vmatmul.mubr.msk.bf16.gmra.mrb[20].mxu1 %vm747_vm2, %v6238_v7  ;;  %4410 = vmatmul.mubr.msk.bf16.gmra.mrb[20].mxu0 %vm747_vm2, %v5599_v35 }
 0x145   : > { %4253 = vmatprep.mubr.msk.bf16.mxu1 %vm747_vm2, %v6239_v61  ;;  %4413 = vmatprep.mubr.msk.bf16.mxu0 %vm747_vm2, %v5638_v60  ;;  %v3816_v61 = vunpack.c.l.bf16 %v3868_v37 }
 0x14c   : > { %4254 = vmatmul.mubr.msk.bf16.gmra.mrb[24].mxu1 %vm747_vm2, %v5467_v63  ;;  %4414 = vmatmul.mubr.msk.bf16.gmra.mrb[24].mxu0 %vm747_vm2, %v5653_v51 }
 0x14d   : > { %4257 = vmatprep.mubr.msk.bf16.mxu1 %vm747_vm2, %v5494_v25  ;;  %4417 = vmatprep.mubr.msk.bf16.mxu0 %vm747_vm2, %v5673_v32  ;;  %v3866_v32 = vld [vmem:[%s5975_s12 + $0x8] sm:$0xff]  }
 0x14e   : > { %v3808_v9 = vunpack.c.l.bf16 %v3866_v32  ;;  %v3809_v10 = vunpack.c.h.bf16 %v3866_v32 }
 0x154   : > { %4258 = vmatmul.mubr.msk.bf16.gmra.mrb[28].mxu1 %vm747_vm2, %v5679_v58  ;;  %4418 = vmatmul.mubr.msk.bf16.gmra.mrb[28].mxu0 %vm747_vm2, %v3773_v20  ;;  %v3803_v58 = vld [vmem:[%s5975_s12] sm:$0xff]   ;;  %v3870_v20 = vld [vmem:[%s5975_s12 + $0x28] sm:$0xff]  }
 0x155   : > { %v3804_v21 = vunpack.c.l.bf16 %v3803_v58  ;;  %v3805_v17 = vunpack.c.h.bf16 %v3803_v58  ;;  %v3824_v32 = vunpack.c.l.bf16 %v3870_v20 }
 0x1cf   : > { %v4191_v63 = vpop.f32.mrb[0].mxu1 }
 0x1d0   : > { %v1798_v54 = vpop.f32.mrb[1].mxu1 }
 0x1d1   : > { %v4192_v19 = vpop.f32.mrb[2].mxu1 }
 0x1d2   : > { %v1801_v25 = vpop.f32.mrb[3].mxu1 }
 0x1d7   : > { %v4195_v57 = vpop.f32.mrb[4].mxu1 }
 0x1d8   : > { %v1814_v44 = vpop.f32.mrb[5].mxu1 }
 0x1d9   : > { %v4196_v18 = vpop.f32.mrb[6].mxu1 }
 0x1da   : > { %v1817_v4 = vpop.f32.mrb[7].mxu1 }
 0x1df   : > { %v5955_v27 = vpop.f32.mrb[8].mxu1 }
 0x1e0   : > { %v5957_v14 = vpop.f32.mrb[9].mxu1 }
 0x1e1   : > { %v5959_v35 = vpop.f32.mrb[10].mxu1 }
 0x1e2   : > { %v5961_v1 = vpop.f32.mrb[11].mxu1 }
 0x1e7   : > { %v5963_v60 = vpop.f32.mrb[12].mxu1 }
 0x1e8   : > { %v5966_v49 = vpop.f32.mrb[13].mxu1 }
 0x1e9   : > { %v5968_v51 = vpop.f32.mrb[14].mxu1 }
 0x1ea   : > { %v5970_v53 = vpop.f32.mrb[15].mxu1 }
 0x1ef   : > { %v4391_v47 = vpop.f32.mrb[0].mxu0 }
 0x1f0   : > { %v4429_v31 = vadd.f32 %v4391_v47, %v4191_v63  ;;  %v3024_v42 = vpop.f32.mrb[1].mxu0 }
 0x1f1   : > { %v4430_v46 = vadd.f32 %v3024_v42, %v1798_v54  ;;  %v4392_v3 = vpop.f32.mrb[2].mxu0 }
 0x1f2   : > { %v3192_v52 = vadd.f32 %v4429_v31, %v5983_v8  ;;  %v4431_v45 = vadd.f32 %v4392_v3, %v4192_v19  ;;  %v3027_v16 = vpop.f32.mrb[3].mxu0  ;;  %v3869_v19 = vld [vmem:[%s5975_s12 + $0x20] sm:$0xff]   ;;  %v3825_v3 = vunpack.c.h.bf16 %v3870_v20 }
 0x1f3   : > { %v3190_v41 = vadd.f32 %v4430_v46, %v5983_v8  ;;  %v4432_v40 = vadd.f32 %v3027_v16, %v1801_v25 }
 0x1f4   : > { %v3288_v56 = vadd.f32 %v3808_v9, %v3192_v52  ;;  %v3193_v30 = vadd.f32 %v4431_v45, %v5983_v8  ;;  %v3820_v9 = vunpack.c.l.bf16 %v3869_v19 }
 0x1f5   : > { %v3286_v26 = vadd.f32 %v3804_v21, %v3190_v41  ;;  %v3191_v23 = vadd.f32 %v4432_v40, %v5983_v8 }
 0x1f6   : > { %v3320_v7 = vmax.f32 %v3288_v56, 0.0  ;;  %v3289_v48 = vadd.f32 %v3809_v10, %v3193_v30  ;;  %v3871_v30 = vld [vmem:[%s5975_s12 + $0x30] sm:$0xff]  }
 0x1f7   : > { %v3318_v11 = vmax.f32 %v3286_v26, 0.0  ;;  %v3287_v6 = vadd.f32 %v3805_v17, %v3191_v23  ;;  %v4395_v15 = vpop.f32.mrb[4].mxu0  ;;  %v3872_v17 = vld [vmem:[%s5975_s12 + $0x38] sm:$0xff]  }
 0x1f8   : > { %3352 = vst.msk [vmem:[%s5993_s22 + $0x10] sm:$0xff] %vm747_vm2, %v3320_v7  ;;  %v3321_v33 = vmax.f32 %v3289_v48, 0.0  ;;  %v4433_v0 = vadd.f32 %v4395_v15, %v4195_v57  ;;  %v3040_v2 = vpop.f32.mrb[5].mxu0  ;;  %v3832_v48 = vunpack.c.l.bf16 %v3872_v17  ;;  %v3828_v15 = vunpack.c.l.bf16 %v3871_v30 }
 0x1f9   : > { %3350 = vst.msk [vmem:[%s5993_s22] sm:$0xff] %vm747_vm2, %v3318_v11  ;;  %v3319_v34 = vmax.f32 %v3287_v6, 0.0  ;;  %v4434_v59 = vadd.f32 %v3040_v2, %v1814_v44  ;;  %v4396_v5 = vpop.f32.mrb[6].mxu0  ;;  %v3833_v2 = vunpack.c.h.bf16 %v3872_v17 }
 0x1fa   : > { %3353 = vst.msk [vmem:[%s5993_s22 + $0x18] sm:$0xff] %vm747_vm2, %v3321_v33  ;;  %v3196_v39 = vadd.f32 %v4433_v0, %v5983_v8  ;;  %v4435_v22 = vadd.f32 %v4396_v5, %v4196_v18  ;;  %v3043_v24 = vpop.f32.mrb[7].mxu0 }
 0x1fb   : > { %3351 = vst.msk [vmem:[%s5993_s22 + $0x8] sm:$0xff] %vm747_vm2, %v3319_v34  ;;  %v3194_v12 = vadd.f32 %v4434_v59, %v5983_v8  ;;  %v4436_v29 = vadd.f32 %v3043_v24, %v1817_v4 }
 0x1fc   : > { %v3292_v62 = vadd.f32 %v3816_v61, %v3196_v39  ;;  %v3197_v38 = vadd.f32 %v4435_v22, %v5983_v8 }
 0x1fd   : > { %v3290_v28 = vadd.f32 %v3812_v55, %v3194_v12  ;;  %v3195_v13 = vadd.f32 %v4436_v29, %v5983_v8  ;;  %v3873_v12 = vld [vmem:[%s5975_s12 + $0x40] sm:$0xff]  }
 0x1fe   : > { %v3324_v63 = vmax.f32 %v3292_v62, 0.0  ;;  %v3293_v54 = vadd.f32 %v3817_v43, %v3197_v38  ;;  %v3874_v43 = vld [vmem:[%s5975_s12 + $0x48] sm:$0xff]  }
 0x1ff   : > { %v3322_v25 = vmax.f32 %v3290_v28, 0.0  ;;  %v3291_v57 = vadd.f32 %v3813_v50, %v3195_v13  ;;  %v4399_v44 = vpop.f32.mrb[8].mxu0  ;;  %v3840_v13 = vunpack.c.l.bf16 %v3874_v43 }
 0x200   : > { %3356 = vst.msk [vmem:[%s5993_s22 + $0x30] sm:$0xff] %vm747_vm2, %v3324_v63  ;;  %v3325_v18 = vmax.f32 %v3293_v54, 0.0  ;;  %v4437_v4 = vadd.f32 %v4399_v44, %v5955_v27  ;;  %v3056_v58 = vpop.f32.mrb[9].mxu0 }
 0x201   : > { %3354 = vst.msk [vmem:[%s5993_s22 + $0x20] sm:$0xff] %vm747_vm2, %v3322_v25  ;;  %v3323_v47 = vmax.f32 %v3291_v57, 0.0  ;;  %v4438_v31 = vadd.f32 %v3056_v58, %v5957_v14  ;;  %v4400_v42 = vpop.f32.mrb[10].mxu0  ;;  %v3821_v14 = vunpack.c.h.bf16 %v3869_v19  ;;  %v3836_v25 = vunpack.c.l.bf16 %v3873_v12 }
 0x202   : > { %3357 = vst.msk [vmem:[%s5993_s22 + $0x38] sm:$0xff] %vm747_vm2, %v3325_v18  ;;  %v3200_v46 = vadd.f32 %v4437_v4, %v5983_v8  ;;  %v4439_v21 = vadd.f32 %v4400_v42, %v5959_v35  ;;  %v3059_v52 = vpop.f32.mrb[11].mxu0  ;;  %v3837_v42 = vunpack.c.h.bf16 %v3873_v12 }
 0x203   : > { %3355 = vst.msk [vmem:[%s5993_s22 + $0x28] sm:$0xff] %vm747_vm2, %v3323_v47  ;;  %v3198_v27 = vadd.f32 %v4438_v31, %v5983_v8  ;;  %v4440_v45 = vadd.f32 %v3059_v52, %v5961_v1 }
 0x204   : > { %v3296_v10 = vadd.f32 %v3824_v32, %v3200_v46  ;;  %v3201_v16 = vadd.f32 %v4439_v21, %v5983_v8  ;;  %v3841_v32 = vunpack.c.h.bf16 %v3874_v43  ;;  %v3877_v43 = vld [vmem:[%s5975_s12 + $0x60] sm:$0xff]  }
 0x205   : > { %v3294_v41 = vadd.f32 %v3820_v9, %v3198_v27  ;;  %v3199_v40 = vadd.f32 %v4440_v45, %v5983_v8  ;;  %v3876_v27 = vld [vmem:[%s5975_s12 + $0x58] sm:$0xff]  }
 0x206   : > { %v3328_v56 = vmax.f32 %v3296_v10, 0.0  ;;  %v3297_v35 = vadd.f32 %v3825_v3, %v3201_v16  ;;  %v3875_v10 = vld [vmem:[%s5975_s12 + $0x50] sm:$0xff]  }
 0x207   : > { %v3326_v26 = vmax.f32 %v3294_v41, 0.0  ;;  %v3295_v23 = vadd.f32 %v3821_v14, %v3199_v40  ;;  %v4403_v37 = vpop.f32.mrb[12].mxu0 }
 0x208   : > { %3360 = vst.msk [vmem:[%s5993_s22 + $0x50] sm:$0xff] %vm747_vm2, %v3328_v56  ;;  %v3329_v1 = vmax.f32 %v3297_v35, 0.0  ;;  %v4441_v7 = vadd.f32 %v4403_v37, %v5963_v60  ;;  %v3072_v36 = vpop.f32.mrb[13].mxu0 }
 0x209   : > { %3358 = vst.msk [vmem:[%s5993_s22 + $0x40] sm:$0xff] %vm747_vm2, %v3326_v26  ;;  %v3327_v11 = vmax.f32 %v3295_v23, 0.0  ;;  %v4442_v6 = vadd.f32 %v3072_v36, %v5966_v49  ;;  %v4404_v33 = vpop.f32.mrb[14].mxu0  ;;  %v3829_v49 = vunpack.c.h.bf16 %v3871_v30  ;;  %v3848_v30 = vunpack.c.l.bf16 %v3876_v27 }
 0x20a   : > { %3361 = vst.msk [vmem:[%s5993_s22 + $0x58] sm:$0xff] %vm747_vm2, %v3329_v1  ;;  %v3204_v0 = vadd.f32 %v4441_v7, %v5983_v8  ;;  %v4443_v61 = vadd.f32 %v4404_v33, %v5968_v51  ;;  %v3075_v34 = vpop.f32.mrb[15].mxu0  ;;  %v3844_v7 = vunpack.c.l.bf16 %v3875_v10 }
 0x20b   : > { %3359 = vst.msk [vmem:[%s5993_s22 + $0x48] sm:$0xff] %vm747_vm2, %v3327_v11  ;;  %v3202_v60 = vadd.f32 %v4442_v6, %v5983_v8  ;;  %v4444_v59 = vadd.f32 %v3075_v34, %v5970_v53  ;;  %v3845_v34 = vunpack.c.h.bf16 %v3875_v10 }
 0x20c   : > { %v3300_v55 = vadd.f32 %v3832_v48, %v3204_v0  ;;  %v3205_v5 = vadd.f32 %v4443_v61, %v5983_v8 }
 0x20d   : > { %v3298_v39 = vadd.f32 %v3828_v15, %v3202_v60  ;;  %v3203_v22 = vadd.f32 %v4444_v59, %v5983_v8  ;;  %v3849_v15 = vunpack.c.h.bf16 %v3876_v27  ;;  %v3879_v27 = vld [vmem:[%s5975_s12 + $0x70] sm:$0xff]  }
 0x20e   : > { %v3332_v24 = vmax.f32 %v3300_v55, 0.0  ;;  %v3301_v51 = vadd.f32 %v3833_v2, %v3205_v5  ;;  %v3878_v5 = vld [vmem:[%s5975_s12 + $0x68] sm:$0xff]  }
 0x20f   : > { %v3330_v29 = vmax.f32 %v3298_v39, 0.0  ;;  %v3299_v50 = vadd.f32 %v3829_v49, %v3203_v22  ;;  %v4247_v62 = vpop.f32.mrb[16].mxu1  ;;  %v4407_v38 = vpop.f32.mrb[16].mxu0 }
 0x210   : > { %3364 = vst.msk [vmem:[%s5993_s22 + $0x70] sm:$0xff] %vm747_vm2, %v3332_v24  ;;  %v3333_v53 = vmax.f32 %v3301_v51, 0.0  ;;  %v4445_v28 = vadd.f32 %v4407_v38, %v4247_v62  ;;  %v2118_v20 = vpop.f32.mrb[17].mxu1  ;;  %v3088_v63 = vpop.f32.mrb[17].mxu0  ;;  %v3856_v38 = vunpack.c.l.bf16 %v3878_v5 }
 0x211   : > { %3362 = vst.msk [vmem:[%s5993_s22 + $0x60] sm:$0xff] %vm747_vm2, %v3330_v29  ;;  %v3331_v54 = vmax.f32 %v3299_v50, 0.0  ;;  %v4446_v19 = vadd.f32 %v3088_v63, %v2118_v20  ;;  %v4248_v57 = vpop.f32.mrb[18].mxu1  ;;  %v4408_v44 = vpop.f32.mrb[18].mxu0  ;;  %v3852_v63 = vunpack.c.l.bf16 %v3877_v43 }
 0x212   : > { %3365 = vst.msk [vmem:[%s5993_s22 + $0x78] sm:$0xff] %vm747_vm2, %v3333_v53  ;;  %v3208_v18 = vadd.f32 %v4445_v28, %v5983_v8  ;;  %v4447_v4 = vadd.f32 %v4408_v44, %v4248_v57  ;;  %v2121_v58 = vpop.f32.mrb[19].mxu1  ;;  %v3091_v47 = vpop.f32.mrb[19].mxu0  ;;  %v3857_v44 = vunpack.c.h.bf16 %v3878_v5 }
 0x213   : > { %3363 = vst.msk [vmem:[%s5993_s22 + $0x68] sm:$0xff] %vm747_vm2, %v3331_v54  ;;  %v3206_v31 = vadd.f32 %v4446_v19, %v5983_v8  ;;  %v4448_v9 = vadd.f32 %v3091_v47, %v2121_v58  ;;  %v3853_v47 = vunpack.c.h.bf16 %v3877_v43 }
 0x214   : > { %v3304_v46 = vadd.f32 %v3840_v13, %v3208_v18  ;;  %v3209_v21 = vadd.f32 %v4447_v4, %v5983_v8 }
 0x215   : > { %v3302_v3 = vadd.f32 %v3836_v25, %v3206_v31  ;;  %v3207_v52 = vadd.f32 %v4448_v9, %v5983_v8 }
 0x216   : > { %v3336_v45 = vmax.f32 %v3304_v46, 0.0  ;;  %v3305_v14 = vadd.f32 %v3841_v32, %v3209_v21  ;;  %v3880_v21 = vld [vmem:[%s5975_s12 + $0x78] sm:$0xff]  }
 0x217   : > { %v3334_v16 = vmax.f32 %v3302_v3, 0.0  ;;  %v3303_v41 = vadd.f32 %v3837_v42, %v3207_v52  ;;  %v4251_v40 = vpop.f32.mrb[20].mxu1  ;;  %v4411_v17 = vpop.f32.mrb[20].mxu0 }
 0x218   : > { %3368 = vst.msk [vmem:[%s5993_s22 + $0x90] sm:$0xff] %vm747_vm2, %v3336_v45  ;;  %v3337_v56 = vmax.f32 %v3305_v14, 0.0  ;;  %v4449_v35 = vadd.f32 %v4411_v17, %v4251_v40  ;;  %v2134_v26 = vpop.f32.mrb[21].mxu1  ;;  %v3104_v23 = vpop.f32.mrb[21].mxu0  ;;  %v3864_v17 = vunpack.c.l.bf16 %v3880_v21 }
 0x219   : > { %3366 = vst.msk [vmem:[%s5993_s22 + $0x80] sm:$0xff] %vm747_vm2, %v3334_v16  ;;  %v3335_v37 = vmax.f32 %v3303_v41, 0.0  ;;  %v4450_v1 = vadd.f32 %v3104_v23, %v2134_v26  ;;  %v4252_v48 = vpop.f32.mrb[22].mxu1  ;;  %v4412_v36 = vpop.f32.mrb[22].mxu0  ;;  %v3860_v23 = vunpack.c.l.bf16 %v3879_v27 }
 0x21a   : > { %3369 = vst.msk [vmem:[%s5993_s22 + $0x98] sm:$0xff] %vm747_vm2, %v3337_v56  ;;  %v3212_v11 = vadd.f32 %v4449_v35, %v5983_v8  ;;  %v4451_v6 = vadd.f32 %v4412_v36, %v4252_v48  ;;  %v2137_v33 = vpop.f32.mrb[23].mxu1  ;;  %v3107_v0 = vpop.f32.mrb[23].mxu0  ;;  %v3865_v36 = vunpack.c.h.bf16 %v3880_v21 }
 0x21b   : > { %3367 = vst.msk [vmem:[%s5993_s22 + $0x88] sm:$0xff] %vm747_vm2, %v3335_v37  ;;  %v3210_v61 = vadd.f32 %v4450_v1, %v5983_v8  ;;  %v4452_v2 = vadd.f32 %v3107_v0, %v2137_v33  ;;  %v3861_v0 = vunpack.c.h.bf16 %v3879_v27 }
 0x21c   : > { %v3308_v60 = vadd.f32 %v3848_v30, %v3212_v11  ;;  %v3213_v59 = vadd.f32 %v4451_v6, %v5983_v8 }
 0x21d   : > { %v3306_v49 = vadd.f32 %v3844_v7, %v3210_v61  ;;  %v3211_v55 = vadd.f32 %v4452_v2, %v5983_v8 }
 0x21e   : > { %v3340_v39 = vmax.f32 %v3308_v60, 0.0  ;;  %v3309_v22 = vadd.f32 %v3849_v15, %v3213_v59 }
 0x21f   : > { %v3338_v24 = vmax.f32 %v3306_v49, 0.0  ;;  %v3307_v51 = vadd.f32 %v3845_v34, %v3211_v55  ;;  %v4255_v12 = vpop.f32.mrb[24].mxu1  ;;  %v4415_v29 = vpop.f32.mrb[24].mxu0 }
 0x220   : > { %3372 = vst.msk [vmem:[%s5993_s22 + $0xb0] sm:$0xff] %vm747_vm2, %v3340_v39  ;;  %v3341_v50 = vmax.f32 %v3309_v22, 0.0  ;;  %v4453_v62 = vadd.f32 %v4415_v29, %v4255_v12  ;;  %v2150_v53 = vpop.f32.mrb[25].mxu1  ;;  %v3120_v28 = vpop.f32.mrb[25].mxu0 }
 0x221   : > { %3370 = vst.msk [vmem:[%s5993_s22 + $0xa0] sm:$0xff] %vm747_vm2, %v3338_v24  ;;  %v3339_v13 = vmax.f32 %v3307_v51, 0.0  ;;  %v4454_v20 = vadd.f32 %v3120_v28, %v2150_v53  ;;  %v4256_v54 = vpop.f32.mrb[26].mxu1  ;;  %v4416_v19 = vpop.f32.mrb[26].mxu0 }
 0x222   : > { %3373 = vst.msk [vmem:[%s5993_s22 + $0xb8] sm:$0xff] %vm747_vm2, %v3341_v50  ;;  %v3216_v25 = vadd.f32 %v4453_v62, %v5983_v8  ;;  %v4455_v57 = vadd.f32 %v4416_v19, %v4256_v54  ;;  %v2153_v18 = vpop.f32.mrb[27].mxu1  ;;  %v3123_v4 = vpop.f32.mrb[27].mxu0 }
 0x223   : > { %3371 = vst.msk [vmem:[%s5993_s22 + $0xa8] sm:$0xff] %vm747_vm2, %v3339_v13  ;;  %v3214_v32 = vadd.f32 %v4454_v20, %v5983_v8  ;;  %v4456_v58 = vadd.f32 %v3123_v4, %v2153_v18 }
 0x224   : > { %v3312_v31 = vadd.f32 %v3856_v38, %v3216_v25  ;;  %v3217_v9 = vadd.f32 %v4455_v57, %v5983_v8 }
 0x225   : > { %v3310_v42 = vadd.f32 %v3852_v63, %v3214_v32  ;;  %v3215_v46 = vadd.f32 %v4456_v58, %v5983_v8 }
 0x226   : > { %v3344_v3 = vmax.f32 %v3312_v31, 0.0  ;;  %v3313_v52 = vadd.f32 %v3857_v44, %v3217_v9 }
 0x227   : > { %v3342_v45 = vmax.f32 %v3310_v42, 0.0  ;;  %v3311_v14 = vadd.f32 %v3853_v47, %v3215_v46  ;;  %v4259_v10 = vpop.f32.mrb[28].mxu1  ;;  %v4419_v16 = vpop.f32.mrb[28].mxu0 }
 0x228   : > { %3376 = vst.msk [vmem:[%s5993_s22 + $0xd0] sm:$0xff] %vm747_vm2, %v3344_v3  ;;  %v3345_v41 = vmax.f32 %v3313_v52, 0.0  ;;  %v4457_v40 = vadd.f32 %v4419_v16, %v4259_v10  ;;  %v2166_v56 = vpop.f32.mrb[29].mxu1  ;;  %v3136_v35 = vpop.f32.mrb[29].mxu0 }
 0x229   : > { %3374 = vst.msk [vmem:[%s5993_s22 + $0xc0] sm:$0xff] %vm747_vm2, %v3342_v45  ;;  %v3343_v30 = vmax.f32 %v3311_v14, 0.0  ;;  %v4458_v26 = vadd.f32 %v3136_v35, %v2166_v56  ;;  %v4260_v37 = vpop.f32.mrb[30].mxu1  ;;  %v4420_v1 = vpop.f32.mrb[30].mxu0 }
 0x22a   : > { %3377 = vst.msk [vmem:[%s5993_s22 + $0xd8] sm:$0xff] %vm747_vm2, %v3345_v41  ;;  %v3220_v7 = vadd.f32 %v4457_v40, %v5983_v8  ;;  %v4459_v48 = vadd.f32 %v4420_v1, %v4260_v37  ;;  %v2169_v11 = vpop.f32.mrb[31].mxu1  ;;  %v3139_v6 = vpop.f32.mrb[31].mxu0 }
 0x22b   : > { %3375 = vst.msk [vmem:[%s5993_s22 + $0xc8] sm:$0xff] %vm747_vm2, %v3343_v30  ;;  %v3218_v15 = vadd.f32 %v4458_v26, %v5983_v8  ;;  %v4460_v33 = vadd.f32 %v3139_v6, %v2169_v11 }
 0x22c   : > { %v3316_v61 = vadd.f32 %v3864_v17, %v3220_v7  ;;  %v3221_v2 = vadd.f32 %v4459_v48, %v5983_v8 }
 0x22d   : > { %v3314_v34 = vadd.f32 %v3860_v23, %v3218_v15  ;;  %v3219_v60 = vadd.f32 %v4460_v33, %v5983_v8 }
 0x22e   : > { %v3348_v59 = vmax.f32 %v3316_v61, 0.0  ;;  %v3317_v49 = vadd.f32 %v3865_v36, %v3221_v2 }
 0x22f   : > { %v3346_v55 = vmax.f32 %v3314_v34, 0.0  ;;  %v3315_v5 = vadd.f32 %v3861_v0, %v3219_v60 }
 0x230   : > { %3380 = vst.msk [vmem:[%s5993_s22 + $0xf0] sm:$0xff] %vm747_vm2, %v3348_v59  ;;  %v3349_v39 = vmax.f32 %v3317_v49, 0.0 }
 0x231   : > { %3378 = vst.msk [vmem:[%s5993_s22 + $0xe0] sm:$0xff] %vm747_vm2, %v3346_v55  ;;  %v3347_v8 = vmax.f32 %v3315_v5, 0.0 }
 0x232   : > { %3381 = vst.msk [vmem:[%s5993_s22 + $0xf8] sm:$0xff] %vm747_vm2, %v3349_v39 }
 0x233   : > { %3379 = vst.msk [vmem:[%s5993_s22 + $0xe8] sm:$0xff] %vm747_vm2, %v3347_v8 }
 0x234   : > { %4801 = shalt.err (!%p4798_p3)
}
 0x235   : > { %s4802_s10 = scalar_lea.hbm %s6106_s5, 4096  ;;  %s4806_s13 = scalar_lea.hbm %s6163_s4, 8192 }
 0x236   : > { %p4803_p4 = scmp.ne.s32.totalorder %s6106_s5, %s4802_s10  ;;  %p4807_p9 = scmp.lt.u32.totalorder %s6106_s5, %s6163_s4 }
 0x237   : > { %p4808_p10 = scmp.lt.u32.totalorder %s4806_s13, %s4802_s10  ;;  %p4810_p12 = scmp.lt.u32.totalorder %s4802_s10, %s6106_s5 }
 0x238   : > { %p4804_p7 = pnand %p4803_p4, %p4918_p5 }
 0x239   : > { %p4809_p11 = por %p4808_p10, %p4807_p9 }
 0x23a   : > { %p4805_p8 = pneg %p4804_p7 }
 0x23b   : > { %p4811_p13 = por %p4810_p12, %p4809_p11 }
 0x23d   : > { %p4812_p0 = pnand %p4811_p13, %p4805_p8 }
 0x23f   : > { %4815 = shalt.err (!%p4812_p0)
}
 0x240   : > { %s4853_s20 = smov 128   ;;  %s4854_s22 = smov 8  }
 0x241   : > { %4686 = dma.vmem_to_hbm [thread:$0]  (%p4918_p5), %s6108_s27, 4096, %s6106_s5, %s6118_s19, %s4853_s20, %s4853_s20, %s4854_s22  }
 0x242 PF: > { %p4692_p1 = scmp.ge.s32.totalorder %s4850_s18, 2  ;;  %s3411_s23 = sand.u32 1, %s4838_s15  }
 0x243   : > { %s3412_s29 = scalar_lea.sflag [#allocation3], %s3411_s23 }
 0x244   : > { %p4689_p2 = pnand %p4692_p1, %p4922_p6 }
 0x246   : > { %4833 = dma.done.wait (!%p4689_p2), %s3412_s29, 4096  }
 0x247   : > { %4835 = vsyncadd (!%p4689_p2), %s3412_s29, 4294963200  ;;  %p14_p3 = scmp.ge.s32.totalorder %s4905_s21, 4   ;;  %s6240_s15 = smov %s4842_s16 }
 0x248   : > { %s6241_s16 = smov %s4846_s17  ;;  %s6242_s17 = smov %s4916_s24 }
 0x249   : > { %s6243_s18 = smov %s4905_s21  ;;  %16 = sbr.rel (!%p14_p3) target bundleno = 3 (0x3), region = 82 }
 0x250   :  { %3417 = vsyncpa [#allocation3], 1 }
 0x251   :  { %3419 = vsyncpa [#allocation3 + $0x1], 1 }

// kernel: residual_block.2
= control target key start
LH: loop header
LB: loop body
LE: loop exit
PB: predicated region body
PF: predicated region fallthrough
CT: control target
= control target key end

     0   :  { %s4719_s12 = smov 0   ;;  %s5880_s0 = inlined_call_operand.vmem [shape: bf16[2,18,18,64], index: 0, kind: input, shape index: {}]   ;;  %s5881_s1 = inlined_call_operand.vmem [shape: bf16[9,64,64], index: 1, kind: input, shape index: {}]   ;;  %s5882_s2 = inlined_call_operand.vmem [shape: f32[1,64], index: 2, kind: input, shape index: {}]   ;;  %s5883_s3 = inlined_call_operand.vmem [shape: bf16[2,16,16,64], index: 3, kind: output, shape index: {}]  }
   0x1 LB: > { %s3425_s13 = sadd.s32 4294967295, %s4697_s12   ;;  %p3429_p0 = scmp.ge.s32.totalorder %s4697_s12, 1  ;;  %s4697_s12 = sphi %s4719_s12, %s13_s12  }
   0x2   : > { %p137_p1 = scmp.lt.s32.totalorder %s4697_s12, 3 }
   0x4   : > { %p138_p2 = pnand %p3429_p0, %p137_p1 }
   0x6   : > { %141 = sbr.rel (%p138_p2) target bundleno = 555 (0x22b), region = 32 }
   0xd   : > { %v4630_v0 = vld [vmem:[%s5881_s1 + $0x20] sm:$0xff]   ;;  %p161_p3 = scmp.lt.s32.totalorder %s3425_s13, 1  ;;  %v4632_v2 = vld [vmem:[%s5881_s1 + $0x28] sm:$0xff]   ;;  %v4634_v4 = vld [vmem:[%s5881_s1 + $0x30] sm:$0xff]   ;;  %vm234_vm0 = vsmask.f32 3328 }
   0xe   : > { %v4631_v1 = vld [vmem:[%s5881_s1 + $0x80] sm:$0xff]   ;;  %3997 = vmatprep.subr.bf16.mxu1 %v4630_v0  ;;  %v4633_v3 = vld [vmem:[%s5881_s1 + $0x88] sm:$0xff]   ;;  %v4635_v5 = vld [vmem:[%s5881_s1 + $0x90] sm:$0xff]   ;;  %vm235_vm1 = vsmask.f32 7440  ;;  %vm702_vm2 = vcmask 523264  }
   0xf   : > { %s5959_s13 = smov (!%p161_p3, %s3425_s13), 1  ;;  %4157 = vmatprep.subr.bf16.mxu0 %v4631_v1  ;;  %3998 = vmatpush3.bf16.msra.mxu1 %v4630_v0  ;;  %v4636_v6 = vld [vmem:[%s5881_s1 + $0x38] sm:$0xff]   ;;  %v4773_v18 = vld [vmem:[%s5881_s1] sm:$0xff]   ;;  %vm4793_vm3 = vmor %vm234_vm0, %vm235_vm1  ;;  %vm1241_vm4 = vcmask 1042432   ;;  %vm1242_vm5 = vcmask 1046532   ;;  %vm3337_vm7 = vcmask 519168  }
  0x10   : > { %4158 = vmatpush3.bf16.msra.mxu0 %v4631_v1  ;;  %3999 = vmatprep.subr.bf16.mxu1 %v4632_v2  ;;  %s4621_s24 = smul.u32 216, %s5959_s13  ;;  %v4637_v7 = vld [vmem:[%s5881_s1 + $0x98] sm:$0xff]   ;;  %v4781_v23 = vld [vmem:[%s5881_s1 + $0xa0] sm:$0xff]   ;;  %vm5000_vm6 = vmor %vm1241_vm4, %vm1242_vm5  ;;  %s3784_s26 = sshll.u32 %s5959_s13, 7 }
  0x11   : > { %4159 = vmatprep.subr.bf16.mxu0 %v4633_v3  ;;  %s5776_s29 = scalar_lea.vmem %s5883_s3, %s3784_s26 }
  0x12   : > { %s4754_s4 = scalar_lea.vmem %s5880_s0, %s4621_s24 }
  0x13   : > { %4000 = vmatpush3.bf16.msra.mxu1 %v4632_v2  ;;  %v4760_v8 = vld [vmem:[%s4754_s4] sm:$0xf]  ;;  %v4763_v9 = vld [vmem:[%s4754_s4 + $0x4] sm:$0xf]  ;;  %v174_v10 = vld [vmem:[%s4754_s4 + $0x8] sm:$0x1] }
  0x14   : > { %4160 = vmatpush3.bf16.msra.mxu0 %v4633_v3  ;;  %4001 = vmatprep.subr.bf16.mxu1 %v4634_v4  ;;  %v238_v11 = vshrl.u32 %v4760_v8, 16  ;;  %v241_v12 = vshll.u32 %v4760_v8, 16  ;;  %v247_v13 = vshll.u32 %v4763_v9, 16  ;;  %v251_v14 = vshrl.u32 %v4763_v9, 16  ;;  %v4776_v22 = vld [vmem:[%s4754_s4 + $0xc] sm:$0xf] }
  0x15   : > { %4161 = vmatprep.subr.bf16.mxu0 %v4635_v5  ;;  %v257_v15 = vshll.u32 %v174_v10, 16  ;;  %v4784_v25 = vld [vmem:[%s4754_s4 + $0x10] sm:$0xf]  ;;  %v4787_v26 = vld [vmem:[%s4754_s4 + $0x14] sm:$0x1]  ;;  %v262_v27 = vshrl.u32 %v4776_v22, 16 }
  0x16   : > { %v240_v16 = vrot.slane %v238_v11, 4  ;;  %v243_v17 = vrot.slane %v241_v12, 5  ;;  %v249_v19 = vrot.slane %v247_v13, 5  ;;  %v253_v20 = vrot.slane %v251_v14, 4  ;;  %v4806_v42 = vld [vmem:[%s4754_s4 + $0x18] sm:$0xf] }
  0x17   : > { %4002 = vmatpush3.bf16.msra.mxu1 %v4634_v4  ;;  %v259_v21 = vrot.slane %v257_v15, 5  ;;  %v265_v28 = vshll.u32 %v4776_v22, 16  ;;  %v271_v31 = vshll.u32 %v4784_v25, 16  ;;  %v275_v32 = vshrl.u32 %v4784_v25, 16  ;;  %v4813_v46 = vld [vmem:[%s4754_s4 + $0x1c] sm:$0xf] }
  0x18   : > { %4162 = vmatpush3.bf16.msra.mxu0 %v4635_v5  ;;  %4003 = vmatprep.subr.bf16.mxu1 %v4636_v6  ;;  %v244_v24 = vor.u32 %v243_v17, %v240_v16  ;;  %v254_v30 = vor.u32 %v253_v20, %v249_v19  ;;  %v281_v33 = vshll.u32 %v4787_v26, 16  ;;  %v264_v35 = vrot.slane %v262_v27, 4  ;;  %v4816_v47 = vld [vmem:[%s4754_s4 + $0x20] sm:$0x1]  ;;  %v4824_v53 = vld [vmem:[%s4754_s4 + $0x24] sm:$0xf] }
  0x19   : > { %4163 = vmatprep.subr.bf16.mxu0 %v4637_v7  ;;  %v267_v36 = vrot.slane %v265_v28, 5  ;;  %v4802_v37 = vcombine.low %v4776_v22, %v4784_v25  ;;  %v273_v39 = vrot.slane %v271_v31, 5  ;;  %v277_v40 = vrot.slane %v275_v32, 4  ;;  %v4827_v54 = vld [vmem:[%s4754_s4 + $0x28] sm:$0xf] }
  0x1a   : > { %v245_v34 = vrot.slane %v244_v24, 4  ;;  %v255_v38 = vrot.slane %v254_v30, 4  ;;  %v283_v41 = vrot.slane %v281_v33, 5  ;;  %v1256_v45 = vrot.slane %v4787_v26, 5  ;;  %v4831_v59 = vld [vmem:[%s4754_s4 + $0x2c] sm:$0x1] }
  0x1b   : > { %4004 = vmatpush3.bf16.msra.mxu1 %v4636_v6  ;;  %v268_v44 = vor.u32 %v267_v36, %v264_v35  ;;  %v286_v48 = vshrl.u32 %v4806_v42, 16  ;;  %v278_v50 = vor.u32 %v277_v40, %v273_v39  ;;  %v289_v51 = vshll.u32 %v4806_v42, 16  ;;  %v4843_v10 = vld [vmem:[%s4754_s4 + $0x30] sm:$0xf]  ;;  %v4642_v11 = vld [vmem:[%s5881_s1 + $0x8] sm:$0xff]  }
  0x1c   : > { %4164 = vmatpush3.bf16.msra.mxu0 %v4637_v7  ;;  %4037 = vmatprep.subr.bf16.mxu1 %v4773_v18  ;;  %v250_v43 = vsel %vm4793_vm3, %v245_v34, %v249_v19  ;;  %v260_v49 = vsel %vm4793_vm3, %v255_v38, %v259_v21  ;;  %v295_v52 = vshll.u32 %v4813_v46, 16  ;;  %v299_v58 = vshrl.u32 %v4813_v46, 16  ;;  %v4851_v16 = vld [vmem:[%s4754_s4 + $0x34] sm:$0xf]  ;;  %v4858_v30 = vld [vmem:[%s4754_s4 + $0x38] sm:$0x1] }
  0x1d   : > { %4197 = vmatprep.subr.bf16.mxu0 %v4781_v23  ;;  %v3441_v55 = vcombine.low %v250_v43, %v260_v49  ;;  %v269_v56 = vrot.slane %v268_v44, 4  ;;  %v288_v57 = vrot.slane %v286_v48, 4  ;;  %v279_v60 = vrot.slane %v278_v50, 4  ;;  %v4866_v36 = vld [vmem:[%s4754_s4 + $0x3c] sm:$0xf]  ;;  %v4641_v40 = vld [vmem:[%s5881_s1 + $0xa8] sm:$0xff]  }
  0x1e   : > { %v291_v61 = vrot.slane %v289_v51, 5  ;;  %v297_v62 = vrot.slane %v295_v52, 5  ;;  %v305_v63 = vshll.u32 %v4816_v47, 16  ;;  %v301_v1 = vrot.slane %v299_v58, 4  ;;  %v4645_v43 = vld [vmem:[%s5881_s1 + $0x10] sm:$0xff]  }
  0x1f   : > { %4005 = vmatprep.mubr.msk.bf16.mxu1 %vm702_vm2, %v3441_v55  ;;  %v274_v0 = vsel %vm4793_vm3, %v269_v56, %v273_v39  ;;  %v1260_v2 = vrot.slane %v4813_v46, 5  ;;  %v1263_v3 = vrot.slane %v4816_v47, 5  ;;  %v284_v4 = vsel %vm4793_vm3, %v279_v60, %v283_v41  ;;  %v4881_v51 = vld [vmem:[%s4754_s4 + $0x40] sm:$0xf] }
  0x20   : > { %v292_v5 = vor.u32 %v291_v61, %v288_v57  ;;  %v307_v6 = vrot.slane %v305_v63, 5  ;;  %v310_v7 = vshrl.u32 %v4824_v53, 16  ;;  %v3442_v12 = vcombine.low %v274_v0, %v284_v4 }
  0x21   : > { %v302_v13 = vor.u32 %v301_v1, %v297_v62  ;;  %v313_v14 = vshll.u32 %v4824_v53, 16  ;;  %v319_v15 = vshll.u32 %v4827_v54, 16  ;;  %v323_v20 = vshrl.u32 %v4827_v54, 16 }
  0x22   : > { %v293_v17 = vrot.slane %v292_v5, 4  ;;  %v312_v19 = vrot.slane %v310_v7, 4  ;;  %v329_v21 = vshll.u32 %v4831_v59, 16  ;;  %4165 = vmatprep.mubr.msk.bf16.mxu0 %vm702_vm2, %v3442_v12  ;;  %4006 = vmatmul.mubr.msk.bf16.vlgmr.msra.gmra.mrb[0].mxu1 %vm702_vm2, %v3442_v12  ;;  %v334_v31 = vshrl.u32 %v4843_v10, 16 }
  0x23   : > { %v303_v24 = vrot.slane %v302_v13, 4  ;;  %v315_v27 = vrot.slane %v313_v14, 5  ;;  %v321_v28 = vrot.slane %v319_v15, 5  ;;  %4038 = vmatpush3.bf16.msra.mxu1 %v4773_v18  ;;  %v325_v33 = vrot.slane %v323_v20, 4  ;;  %v4906_v15 = vld [vmem:[%s4754_s4 + $0x4c] sm:$0xf] }
  0x24   : > { %v298_v32 = vsel %vm4793_vm3, %v293_v17, %v297_v62  ;;  %v331_v34 = vrot.slane %v329_v21, 5  ;;  %v337_v35 = vshll.u32 %v4843_v10, 16  ;;  %v336_v41 = vrot.slane %v334_v31, 4  ;;  %4039 = vmatprep.subr.bf16.mxu1 %v4642_v11  ;;  %v4890_v62 = vld [vmem:[%s4754_s4 + $0x44] sm:$0x1]  ;;  %v4647_v21 = vld [vmem:[%s5881_s1 + $0x18] sm:$0xff]  }
  0x25   : > { %v308_v38 = vsel %vm4793_vm3, %v303_v24, %v307_v6  ;;  %v316_v39 = vor.u32 %v315_v27, %v312_v19  ;;  %v343_v18 = vshll.u32 %v4851_v16, 16  ;;  %v326_v48 = vor.u32 %v325_v33, %v321_v28  ;;  %v4898_v6 = vld [vmem:[%s4754_s4 + $0x48] sm:$0xf]  ;;  %v4918_v31 = vld [vmem:[%s4754_s4 + $0x50] sm:$0x1] }
  0x26   : > { %v4877_v44 = vcombine.low %v298_v32, %v308_v38  ;;  %v339_v49 = vrot.slane %v337_v35, 5  ;;  %v347_v50 = vshrl.u32 %v4851_v16, 16  ;;  %v353_v56 = vshll.u32 %v4858_v30, 16 }
  0x27   : > { %v317_v52 = vrot.slane %v316_v39, 4  ;;  %v345_v55 = vrot.slane %v343_v18, 5  ;;  %v358_v57 = vshrl.u32 %v4866_v36, 16  ;;  %v327_v58 = vrot.slane %v326_v48, 4  ;;  %4040 = vmatpush3.bf16.msra.mxu1 %v4642_v11  ;;  %v4928_v39 = vld [vmem:[%s4754_s4 + $0x54] sm:$0xf] }
  0x28   : > { %5916 = vst [vmem:[#allocation2_spill] sm:$0xff] %v4877_v44  ;;  %4166 = vmatmul.mubr.msk.bf16.vlgmr.msra.gmra.mrb[0].mxu0 %vm702_vm2, %v4877_v44  ;;  %4009 = vmatprep.mubr.msk.bf16.mxu1 %vm702_vm2, %v4877_v44  ;;  %v340_v60 = vor.u32 %v339_v49, %v336_v41  ;;  %v349_v61 = vrot.slane %v347_v50, 4  ;;  %v361_v63 = vshll.u32 %v4866_v36, 16  ;;  %v355_v1 = vrot.slane %v353_v56, 5  ;;  %5918 = vst [vmem:[#allocation4_spill] sm:$0xff] %v4928_v39  ;;  %v4644_v41 = vld [vmem:[%s5881_s1 + $0xb8] sm:$0xff]  }
  0x29   : > { %4198 = vmatpush3.bf16.msra.mxu0 %v4781_v23  ;;  %v322_v0 = vsel %vm4793_vm3, %v317_v52, %v321_v28  ;;  %v360_v4 = vrot.slane %v358_v57, 4  ;;  %v367_v5 = vshll.u32 %v4881_v51, 16  ;;  %v332_v7 = vsel %vm4793_vm3, %v327_v58, %v331_v34  ;;  %v4643_v23 = vld [vmem:[%s5881_s1 + $0xb0] sm:$0xff]   ;;  %4041 = vmatprep.subr.bf16.mxu1 %v4645_v43  ;;  %v4937_v52 = vld [vmem:[%s4754_s4 + $0x58] sm:$0xf] }
  0x2a   : > { %4199 = vmatprep.subr.bf16.mxu0 %v4641_v40  ;;  %v341_v12 = vrot.slane %v340_v60, 4  ;;  %v350_v13 = vor.u32 %v349_v61, %v345_v55  ;;  %v363_v14 = vrot.slane %v361_v63, 5  ;;  %v4908_v17 = vcombine.low %v322_v0, %v332_v7  ;;  %v4947_v61 = vld [vmem:[%s4754_s4 + $0x5c] sm:$0x1] }
  0x2b   : > { %v369_v11 = vrot.slane %v367_v5, 5  ;;  %v371_v19 = vshrl.u32 %v4881_v51, 16  ;;  %v377_v20 = vshll.u32 %v4890_v62, 16  ;;  %v382_v32 = vshrl.u32 %v4898_v6, 16  ;;  %4042 = vmatpush3.bf16.msra.mxu1 %v4645_v43 }
  0x2c   : > { %5917 = vst [vmem:[#allocation3_spill] sm:$0xff] %v4908_v17  ;;  %v346_v24 = vsel %vm4793_vm3, %v341_v12, %v345_v55  ;;  %v351_v27 = vrot.slane %v350_v13, 4  ;;  %v364_v28 = vor.u32 %v363_v14, %v360_v4  ;;  %4169 = vmatprep.mubr.msk.bf16.mxu0 %vm702_vm2, %v4908_v17  ;;  %4010 = vmatmul.mubr.msk.bf16.gmra.mrb[4].mxu1 %vm702_vm2, %v4908_v17  ;;  %v385_v35 = vshll.u32 %v4898_v6, 16  ;;  %v4942_v55 = vld [vmem:[%s5881_s1 + $0x40] sm:$0xff]  }
  0x2d   : > { %v373_v33 = vrot.slane %v371_v19, 4  ;;  %v379_v34 = vrot.slane %v377_v20, 5  ;;  %v391_v38 = vshll.u32 %v4906_v15, 16  ;;  %4200 = vmatpush3.bf16.msra.mxu0 %v4641_v40  ;;  %v384_v49 = vrot.slane %v382_v32, 4  ;;  %4043 = vmatprep.subr.bf16.mxu1 %v4647_v21  ;;  %v4961_v19 = vld [vmem:[%s4754_s4 + $0x60] sm:$0xf] }
  0x2e   : > { %v356_v18 = vsel %vm4793_vm3, %v351_v27, %v355_v1  ;;  %v365_v48 = vrot.slane %v364_v28, 4  ;;  %v395_v50 = vshrl.u32 %v4906_v15, 16  ;;  %4201 = vmatprep.subr.bf16.mxu0 %v4643_v23  ;;  %v387_v58 = vrot.slane %v385_v35, 5  ;;  %v4966_v32 = vld [vmem:[%s4754_s4 + $0x64] sm:$0xf] }
  0x2f   : > { %v4944_v56 = vcombine.low %v346_v24, %v356_v18  ;;  %v374_v57 = vor.u32 %v373_v33, %v369_v11  ;;  %v393_v60 = vrot.slane %v391_v38, 5  ;;  %v401_v43 = vshll.u32 %v4918_v31, 16  ;;  %4044 = vmatpush3.bf16.msra.mxu1 %v4647_v21  ;;  %v4975_v21 = vld [vmem:[%s5881_s1 + $0xc0] sm:$0xff]  }
  0x30   : > { %v370_v40 = vsel %vm4793_vm3, %v365_v48, %v369_v11  ;;  %v397_v63 = vrot.slane %v395_v50, 4  ;;  %v406_v0 = vshrl.u32 %v4928_v39, 16  ;;  %v388_v4 = vor.u32 %v387_v58, %v384_v49  ;;  %4077 = vmatprep.subr.bf16.mxu1 %v4942_v55  ;;  %v4980_v48 = vld [vmem:[%s4754_s4 + $0x68] sm:$0x1] }
  0x31   : > { %5919 = vst [vmem:[#allocation5_spill] sm:$0xff] %v4944_v56  ;;  %4170 = vmatmul.mubr.msk.bf16.gmra.mrb[4].mxu0 %vm702_vm2, %v4944_v56  ;;  %4013 = vmatprep.mubr.msk.bf16.mxu1 %vm702_vm2, %v4944_v56  ;;  %v375_v1 = vrot.slane %v374_v57, 4  ;;  %v409_v5 = vshll.u32 %v4928_v39, 16  ;;  %v415_v7 = vshll.u32 %v4937_v52, 16  ;;  %v403_v13 = vrot.slane %v401_v43, 5 }
  0x32   : > { %v398_v12 = vor.u32 %v397_v63, %v393_v60  ;;  %4202 = vmatpush3.bf16.msra.mxu0 %v4643_v23  ;;  %v408_v14 = vrot.slane %v406_v0, 4  ;;  %v419_v11 = vshrl.u32 %v4937_v52, 16  ;;  %v389_v24 = vrot.slane %v388_v4, 4  ;;  %v4994_v4 = vld [vmem:[%s4754_s4 + $0x6c] sm:$0xf] }
  0x33   : > { %v380_v20 = vsel %vm4793_vm3, %v375_v1, %v379_v34  ;;  %v411_v27 = vrot.slane %v409_v5, 5  ;;  %v417_v28 = vrot.slane %v415_v7, 5  ;;  %4203 = vmatprep.subr.bf16.mxu0 %v4644_v41  ;;  %v425_v38 = vshll.u32 %v4947_v61, 16 }
  0x34   : > { %v4969_v33 = vcombine.low %v370_v40, %v380_v20  ;;  %v399_v23 = vrot.slane %v398_v12, 4  ;;  %v421_v35 = vrot.slane %v419_v11, 4  ;;  %v394_v34 = vsel %vm4793_vm3, %v389_v24, %v393_v60 }
  0x35   : > { %v412_v18 = vor.u32 %v411_v27, %v408_v14  ;;  %v430_v49 = vshrl.u32 %v4961_v19, 16  ;;  %v433_v50 = vshll.u32 %v4961_v19, 16  ;;  %v427_v40 = vrot.slane %v425_v38, 5  ;;  %v5014_v27 = vld [vmem:[%s4754_s4 + $0x70] sm:$0xf] }
  0x36   : > { %5920 = vst [vmem:[#allocation6_spill] sm:$0xff] %v4969_v33  ;;  %4173 = vmatprep.mubr.msk.bf16.mxu0 %vm702_vm2, %v4969_v33  ;;  %4014 = vmatmul.mubr.msk.bf16.gmra.mrb[8].mxu1 %vm702_vm2, %v4969_v33  ;;  %v404_v57 = vsel %vm4793_vm3, %v399_v23, %v403_v13  ;;  %v422_v58 = vor.u32 %v421_v35, %v417_v28  ;;  %v439_v60 = vshll.u32 %v4966_v32, 16  ;;  %v443_v12 = vshrl.u32 %v4966_v32, 16 }
  0x37   : > { %v4991_v63 = vcombine.low %v394_v34, %v404_v57  ;;  %v413_v43 = vrot.slane %v412_v18, 4  ;;  %v432_v0 = vrot.slane %v430_v49, 4  ;;  %v435_v1 = vrot.slane %v433_v50, 5  ;;  %4204 = vmatpush3.bf16.msra.mxu0 %v4644_v41  ;;  %v5019_v34 = vld [vmem:[%s4754_s4 + $0x74] sm:$0x1] }
  0x38   : > { %v423_v5 = vrot.slane %v422_v58, 4  ;;  %v441_v7 = vrot.slane %v439_v60, 5  ;;  %v449_v13 = vshll.u32 %v4980_v48, 16  ;;  %4237 = vmatprep.subr.bf16.mxu0 %v4975_v21  ;;  %v3514_v20 = vrot.slane %v4776_v22, 9 }
  0x39   : > { %5921 = vst [vmem:[#allocation7_spill] sm:$0xff] %v4991_v63  ;;  %4174 = vmatmul.mubr.msk.bf16.gmra.mrb[8].mxu0 %vm702_vm2, %v4991_v63  ;;  %4017 = vmatprep.mubr.msk.bf16.mxu1 %vm702_vm2, %v4991_v63  ;;  %v418_v41 = vsel %vm4793_vm3, %v413_v43, %v417_v28  ;;  %v436_v11 = vor.u32 %v435_v1, %v432_v0  ;;  %v1253_v24 = vrot.slane %v4784_v25, 5  ;;  %v445_v35 = vrot.slane %v443_v12, 4 }
  0x3a   : > { %v428_v23 = vsel %vm4793_vm3, %v423_v5, %v427_v40  ;;  %v451_v38 = vrot.slane %v449_v13, 5  ;;  %v454_v18 = vshrl.u32 %v4994_v4, 16  ;;  %v457_v58 = vshll.u32 %v4994_v4, 16  ;;  %v5039_v5 = vld [vmem:[%s4754_s4 + $0x78] sm:$0xf] }
  0x3b   : > { %v5022_v49 = vcombine.low %v418_v41, %v428_v23  ;;  %v437_v28 = vrot.slane %v436_v11, 4  ;;  %v1254_v22 = vsel %vm5000_vm6, %v3514_v20, %v1253_v24  ;;  %v1255_v50 = vrot.slane %v1253_v24, 4 }
  0x3c   : > { %v446_v25 = vor.u32 %v445_v35, %v441_v7  ;;  %v456_v57 = vrot.slane %v454_v18, 4  ;;  %v463_v40 = vshll.u32 %v5014_v27, 16  ;;  %v467_v0 = vshrl.u32 %v5014_v27, 16  ;;  %v5051_v35 = vld [vmem:[%s4754_s4 + $0x7c] sm:$0xf] }
  0x3d   : > { %5924 = vst [vmem:[#allocation8_spill] sm:$0xff] %v5022_v49  ;;  %4177 = vmatprep.mubr.msk.bf16.mxu0 %vm702_vm2, %v5022_v49  ;;  %v442_v60 = vsel %vm4793_vm3, %v437_v28, %v441_v7  ;;  %v1257_v43 = vsel %vm5000_vm6, %v1255_v50, %v1256_v45  ;;  %v473_v1 = vshll.u32 %v5019_v34, 16  ;;  %v459_v7 = vrot.slane %v457_v58, 5  ;;  %v5054_v18 = vld [vmem:[%s4754_s4 + $0x80] sm:$0x1] }
  0x3e   : > { %4018 = vmatmul.mubr.msk.bf16.gmra.mrb[12].mxu1 %vm702_vm2, %v5022_v49  ;;  %v447_v12 = vrot.slane %v446_v25, 4  ;;  %v5043_v13 = vcombine.low %v1254_v22, %v1257_v43  ;;  %v465_v41 = vrot.slane %v463_v40, 5  ;;  %v469_v26 = vrot.slane %v467_v0, 4 }
  0x3f   : > { %v475_v11 = vrot.slane %v473_v1, 5  ;;  %v3515_v20 = vrot.slane %v4806_v42, 9  ;;  %v1262_v45 = vrot.slane %v1260_v2, 4  ;;  %v460_v23 = vor.u32 %v459_v7, %v456_v57  ;;  %v5071_v1 = vld [vmem:[%s4754_s4 + $0x84] sm:$0xf] }
  0x40   : > { %5925 = vst [vmem:[#allocation9_spill] sm:$0xff] %v5043_v13  ;;  %v452_v24 = vsel %vm4793_vm3, %v447_v12, %v451_v38  ;;  %v478_v28 = vshrl.u32 %v5039_v5, 16  ;;  %v481_v22 = vshll.u32 %v5039_v5, 16  ;;  %v470_v25 = vor.u32 %v469_v26, %v465_v41  ;;  %v5081_v12 = vld [vmem:[%s4754_s4 + $0x88] sm:$0xf] }
  0x41   : > { %v5058_v50 = vcombine.low %v442_v60, %v452_v24  ;;  %v1261_v58 = vsel %vm5000_vm6, %v3515_v20, %v1260_v2  ;;  %v1264_v38 = vsel %vm5000_vm6, %v1262_v45, %v1263_v3  ;;  %v461_v57 = vrot.slane %v460_v23, 4  ;;  %v5084_v7 = vld [vmem:[%s4754_s4 + $0x8c] sm:$0x1] }
  0x42   : > { %v5068_v40 = vcombine.low %v1261_v58, %v1264_v38  ;;  %v480_v43 = vrot.slane %v478_v28, 4  ;;  %v483_v0 = vrot.slane %v481_v22, 5  ;;  %v471_v60 = vrot.slane %v470_v25, 4 }
  0x43   : > { %5926 = vst [vmem:[#allocation10_spill] sm:$0xff] %v5058_v50  ;;  %4178 = vmatmul.mubr.msk.bf16.gmra.mrb[12].mxu0 %vm702_vm2, %v5058_v50  ;;  %4021 = vmatprep.mubr.msk.bf16.mxu1 %vm702_vm2, %v5058_v50  ;;  %v487_v2 = vshll.u32 %v5051_v35, 16  ;;  %v491_v47 = vshrl.u32 %v5051_v35, 16  ;;  %v497_v3 = vshll.u32 %v5054_v18, 16  ;;  %v466_v26 = vsel %vm4793_vm3, %v461_v57, %v465_v41 }
  0x44   : > { %5927 = vst [vmem:[#allocation11_spill] sm:$0xff] %v5068_v40  ;;  %4205 = vmatprep.mubr.msk.bf16.mxu0 %vm702_vm2, %v5043_v13  ;;  %v484_v20 = vor.u32 %v483_v0, %v480_v43  ;;  %v3516_v45 = vrot.slane %v4824_v53, 9  ;;  %v1267_v24 = vrot.slane %v4827_v54, 5  ;;  %v476_v23 = vsel %vm4793_vm3, %v471_v60, %v475_v11 }
  0x45   : > { %v489_v28 = vrot.slane %v487_v2, 5  ;;  %v493_v22 = vrot.slane %v491_v47, 4  ;;  %v499_v25 = vrot.slane %v497_v3, 5  ;;  %v5094_v58 = vcombine.low %v466_v26, %v476_v23 }
  0x46   : > { %v485_v38 = vrot.slane %v484_v20, 4  ;;  %v1268_v50 = vsel %vm5000_vm6, %v3516_v45, %v1267_v24  ;;  %v1269_v49 = vrot.slane %v1267_v24, 4  ;;  %v1270_v57 = vrot.slane %v4831_v59, 5  ;;  %v5111_v45 = vld [vmem:[%s4754_s4 + $0x90] sm:$0xf]  ;;  %v4648_v24 = vld [vmem:[%s5881_s1 + $0xc8] sm:$0xff]  }
  0x47   : > { %5928 = vst [vmem:[#allocation12_spill] sm:$0xff] %v5094_v58  ;;  %v494_v41 = vor.u32 %v493_v22, %v489_v28  ;;  %v502_v43 = vshrl.u32 %v5071_v1, 16  ;;  %v505_v0 = vshll.u32 %v5071_v1, 16  ;;  %4022 = vmatmul.mubr.msk.bf16.gmra.mrb[16].mxu1 %vm702_vm2, %v5094_v58  ;;  %v511_v60 = vshll.u32 %v5081_v12, 16  ;;  %v5119_v58 = vld [vmem:[%s4754_s4 + $0x94] sm:$0xf] }
  0x48   : > { %v490_v11 = vsel %vm4793_vm3, %v485_v38, %v489_v28  ;;  %v515_v2 = vshrl.u32 %v5081_v12, 16  ;;  %v521_v47 = vshll.u32 %v5084_v7, 16  ;;  %v1271_v59 = vsel %vm5000_vm6, %v1269_v49, %v1270_v57 }
  0x49   : > { %v495_v3 = vrot.slane %v494_v41, 4  ;;  %v504_v26 = vrot.slane %v502_v43, 4  ;;  %v507_v20 = vrot.slane %v505_v0, 5  ;;  %v5116_v23 = vcombine.low %v1268_v50, %v1271_v59  ;;  %v5128_v0 = vld [vmem:[%s4754_s4 + $0x98] sm:$0x1] }
  0x4a   : > { %v513_v28 = vrot.slane %v511_v60, 5  ;;  %v517_v22 = vrot.slane %v515_v2, 4  ;;  %v523_v38 = vrot.slane %v521_v47, 5  ;;  %v3517_v57 = vrot.slane %v4843_v10, 9 }
  0x4b   : > { %5929 = vst [vmem:[#allocation13_spill] sm:$0xff] %v5116_v23  ;;  %4206 = vmatmul.mubr.msk.bf16.vlgmr.msra.gmra.mrb[0].mxu0 %vm702_vm2, %v5068_v40  ;;  %v500_v49 = vsel %vm4793_vm3, %v495_v3, %v499_v25  ;;  %v508_v41 = vor.u32 %v507_v20, %v504_v26  ;;  %v1274_v43 = vrot.slane %v4851_v16, 5  ;;  %v1277_v2 = vrot.slane %v4858_v30, 5  ;;  %v5238_v40 = vld [vmem:[%s4754_s4 + $0xbc] sm:$0x1] }
  0x4c   : > { %4238 = vmatpush3.bf16.msra.mxu0 %v4975_v21  ;;  %v5131_v50 = vcombine.low %v490_v11, %v500_v49  ;;  %4209 = vmatprep.mubr.msk.bf16.mxu0 %vm702_vm2, %v5116_v23  ;;  %v518_v60 = vor.u32 %v517_v22, %v513_v28  ;;  %v526_v25 = vshrl.u32 %v5111_v45, 16  ;;  %v529_v26 = vshll.u32 %v5111_v45, 16  ;;  %v5141_v21 = vld [vmem:[%s4754_s4 + $0x9c] sm:$0xf]  ;;  %v4651_v11 = vld [vmem:[%s5881_s1 + $0xd0] sm:$0xff]  }
  0x4d   : > { %v509_v47 = vrot.slane %v508_v41, 4  ;;  %v1275_v3 = vsel %vm5000_vm6, %v3517_v57, %v1274_v43  ;;  %v1276_v59 = vrot.slane %v1274_v43, 4  ;;  %4239 = vmatprep.subr.bf16.mxu0 %v4648_v24  ;;  %v535_v22 = vshll.u32 %v5119_v58, 16  ;;  %v5151_v41 = vld [vmem:[%s4754_s4 + $0xa0] sm:$0xf] }
  0x4e   : > { %5930 = vst [vmem:[#allocation14_spill] sm:$0xff] %v5131_v50  ;;  %4025 = vmatprep.mubr.msk.bf16.mxu1 %vm702_vm2, %v5131_v50  ;;  %v519_v30 = vrot.slane %v518_v60, 4  ;;  %v528_v20 = vrot.slane %v526_v25, 4  ;;  %v539_v49 = vshrl.u32 %v5119_v58, 16  ;;  %v531_v63 = vrot.slane %v529_v26, 5  ;;  %v4656_v60 = vld [vmem:[%s5881_s1 + $0xd8] sm:$0xff]  }
  0x4f   : > { %v514_v57 = vsel %vm4793_vm3, %v509_v47, %v513_v28  ;;  %v1278_v43 = vsel %vm5000_vm6, %v1276_v59, %v1277_v2  ;;  %v545_v33 = vshll.u32 %v5128_v0, 16  ;;  %v537_v56 = vrot.slane %v535_v22, 5  ;;  %v5169_v59 = vld [vmem:[%s4754_s4 + $0xa4] sm:$0x1] }
  0x50   : > { %v524_v25 = vsel %vm4793_vm3, %v519_v30, %v523_v38  ;;  %v5163_v50 = vcombine.low %v1275_v3, %v1278_v43  ;;  %v541_v17 = vrot.slane %v539_v49, 4  ;;  %4240 = vmatpush3.bf16.msra.mxu0 %v4648_v24  ;;  %v532_v28 = vor.u32 %v531_v63, %v528_v20 }
  0x51   : > { %v5165_v44 = vcombine.low %v514_v57, %v524_v25  ;;  %v547_v2 = vrot.slane %v545_v33, 5  ;;  %v3518_v47 = vrot.slane %v4866_v36, 9  ;;  %4241 = vmatprep.subr.bf16.mxu0 %v4651_v11  ;;  %v1281_v23 = vrot.slane %v4881_v51, 5 }
  0x52   : > { %5931 = vst [vmem:[#allocation15_spill] sm:$0xff] %v5163_v50  ;;  %v542_v26 = vor.u32 %v541_v17, %v537_v56  ;;  %v1284_v38 = vrot.slane %v4890_v62, 5  ;;  %v550_v3 = vshrl.u32 %v5141_v21, 16  ;;  %v533_v63 = vrot.slane %v532_v28, 4  ;;  %v5182_v17 = vld [vmem:[%s4754_s4 + $0xa8] sm:$0xf] }
  0x53   : > { %5932 = vst [vmem:[#allocation16_spill] sm:$0xff] %v5165_v44  ;;  %4026 = vmatmul.mubr.msk.bf16.gmra.mrb[20].mxu1 %vm702_vm2, %v5165_v44  ;;  %4210 = vmatmul.mubr.msk.bf16.gmra.mrb[4].mxu0 %vm702_vm2, %v5163_v50  ;;  %v553_v33 = vshll.u32 %v5141_v21, 16  ;;  %v559_v24 = vshll.u32 %v5151_v41, 16  ;;  %v563_v30 = vshrl.u32 %v5151_v41, 16  ;;  %v1282_v62 = vsel %vm5000_vm6, %v3518_v47, %v1281_v23  ;;  %v5191_v44 = vld [vmem:[%s5881_s1 + $0xe0] sm:$0xff]  }
  0x54   : > { %v543_v20 = vrot.slane %v542_v26, 4  ;;  %v1283_v22 = vrot.slane %v1281_v23, 4  ;;  %v552_v49 = vrot.slane %v550_v3, 4  ;;  %4242 = vmatpush3.bf16.msra.mxu0 %v4651_v11  ;;  %v538_v57 = vsel %vm4793_vm3, %v533_v63, %v537_v56  ;;  %5933 = vst [vmem:[#allocation17_spill] sm:$0xff] %v5191_v44  ;;  %v5200_v56 = vld [vmem:[%s4754_s4 + $0xac] sm:$0xf] }
  0x55   : > { %v555_v43 = vrot.slane %v553_v33, 5  ;;  %v561_v25 = vrot.slane %v559_v24, 5  ;;  %v565_v28 = vrot.slane %v563_v30, 4  ;;  %4243 = vmatprep.subr.bf16.mxu0 %v4656_v60  ;;  %v569_v11 = vshll.u32 %v5169_v59, 16  ;;  %v5207_v30 = vld [vmem:[%s4754_s4 + $0xb0] sm:$0x1] }
  0x56   : > { %v548_v26 = vsel %vm4793_vm3, %v543_v20, %v547_v2  ;;  %v1285_v23 = vsel %vm5000_vm6, %v1283_v22, %v1284_v38  ;;  %v3519_v47 = vrot.slane %v4898_v6, 9  ;;  %v1288_v2 = vrot.slane %v4906_v15, 5 }
  0x57   : > { %v5202_v3 = vcombine.low %v538_v57, %v548_v26  ;;  %v5204_v63 = vcombine.low %v1282_v62, %v1285_v23  ;;  %v556_v33 = vor.u32 %v555_v43, %v552_v49  ;;  %v566_v24 = vor.u32 %v565_v28, %v561_v25  ;;  %v5219_v43 = vld [vmem:[%s4754_s4 + $0xb4] sm:$0xf] }
  0x58   : > { %v571_v50 = vrot.slane %v569_v11, 5  ;;  %v1291_v38 = vrot.slane %v4918_v31, 5  ;;  %v574_v20 = vshrl.u32 %v5182_v17, 16  ;;  %4244 = vmatpush3.bf16.msra.mxu0 %v4656_v60  ;;  %v577_v49 = vshll.u32 %v5182_v17, 16 }
  0x59   : > { %5934 = vst [vmem:[#allocation18_spill] sm:$0xff] %v5202_v3  ;;  %5935 = vst [vmem:[#allocation19_spill] sm:$0xff] %v5204_v63  ;;  %4029 = vmatprep.mubr.msk.bf16.mxu1 %vm702_vm2, %v5202_v3  ;;  %4213 = vmatprep.mubr.msk.bf16.mxu0 %vm702_vm2, %v5204_v63  ;;  %v557_v62 = vrot.slane %v556_v33, 4  ;;  %v567_v22 = vrot.slane %v566_v24, 4  ;;  %v583_v57 = vshll.u32 %v5200_v56, 16  ;;  %v1289_v31 = vsel %vm5000_vm6, %v3519_v47, %v1288_v2 }
  0x5a   : > { %v1290_v60 = vrot.slane %v1288_v2, 4  ;;  %v576_v28 = vrot.slane %v574_v20, 4  ;;  %v587_v26 = vshrl.u32 %v5200_v56, 16  ;;  %4277 = vmatprep.subr.bf16.mxu0 %v5191_v44  ;;  %v579_v33 = vrot.slane %v577_v49, 5  ;;  %v5230_v3 = vld [vmem:[%s4754_s4 + $0xb8] sm:$0xf] }
  0x5b   : > { %v562_v23 = vsel %vm4793_vm3, %v557_v62, %v561_v25  ;;  %v572_v11 = vsel %vm4793_vm3, %v567_v22, %v571_v50  ;;  %v585_v24 = vrot.slane %v583_v57, 5  ;;  %v593_v20 = vshll.u32 %v5207_v30, 16 }
  0x5c   : > { %v5232_v63 = vcombine.low %v562_v23, %v572_v11  ;;  %v1292_v47 = vsel %vm5000_vm6, %v1290_v60, %v1291_v38  ;;  %v589_v2 = vrot.slane %v587_v26, 4  ;;  %v580_v25 = vor.u32 %v579_v33, %v576_v28 }
  0x5d   : > { %v5240_v13 = vcombine.low %v1289_v31, %v1292_v47  ;;  %v3520_v62 = vrot.slane %v4928_v39, 9  ;;  %v1295_v50 = vrot.slane %v4937_v52, 5  ;;  %v595_v49 = vrot.slane %v593_v20, 5 }
  0x5e   : > { %5936 = vst [vmem:[#allocation20_spill] sm:$0xff] %v5232_v63  ;;  %4030 = vmatmul.mubr.msk.bf16.gmra.mrb[24].mxu1 %vm702_vm2, %v5232_v63  ;;  %v590_v22 = vor.u32 %v589_v2, %v585_v24  ;;  %v1298_v57 = vrot.slane %v4947_v61, 5  ;;  %v598_v38 = vshrl.u32 %v5219_v43, 16  ;;  %v581_v60 = vrot.slane %v580_v25, 4 }
  0x5f   : > { %5937 = vst [vmem:[#allocation21_spill] sm:$0xff] %v5240_v13  ;;  %4214 = vmatmul.mubr.msk.bf16.gmra.mrb[8].mxu0 %vm702_vm2, %v5240_v13  ;;  %v1296_v31 = vsel %vm5000_vm6, %v3520_v62, %v1295_v50  ;;  %v1297_v28 = vrot.slane %v1295_v50, 4  ;;  %v601_v26 = vshll.u32 %v5219_v43, 16  ;;  %v607_v33 = vshll.u32 %v5230_v3, 16 }
  0x60   : > { %v591_v23 = vrot.slane %v590_v22, 4  ;;  %v600_v11 = vrot.slane %v598_v38, 4  ;;  %v611_v47 = vshrl.u32 %v5230_v3, 16  ;;  %v586_v61 = vsel %vm4793_vm3, %v581_v60, %v585_v24 }
  0x61   : > { %v1299_v2 = vsel %vm5000_vm6, %v1297_v28, %v1298_v57  ;;  %v603_v20 = vrot.slane %v601_v26, 5  ;;  %v617_v25 = vshll.u32 %v5238_v40, 16  ;;  %v609_v22 = vrot.slane %v607_v33, 5 }
  0x62   : > { %v596_v62 = vsel %vm4793_vm3, %v591_v23, %v595_v49  ;;  %v5262_v50 = vcombine.low %v1296_v31, %v1299_v2  ;;  %v613_v38 = vrot.slane %v611_v47, 4  ;;  %v3521_v39 = vrot.slane %v4961_v19, 9 }
  0x63   : > { %v5264_v63 = vcombine.low %v586_v61, %v596_v62  ;;  %v604_v13 = vor.u32 %v603_v20, %v600_v11  ;;  %v619_v44 = vrot.slane %v617_v25, 5  ;;  %v1302_v57 = vrot.slane %v4966_v32, 5 }
  0x64   : > { %4217 = vmatprep.mubr.msk.bf16.mxu0 %vm702_vm2, %v5262_v50  ;;  %v614_v24 = vor.u32 %v613_v38, %v609_v22  ;;  %v1305_v60 = vrot.slane %v4980_v48, 5  ;;  %v3522_v49 = vrot.slane %v4994_v4, 9  ;;  %v3477_v28 = vcombine.low %v4760_v8, %v4763_v9 }
  0x65   : > { %4033 = vmatprep.mubr.msk.bf16.mxu1 %vm702_vm2, %v5264_v63  ;;  %v605_v31 = vrot.slane %v604_v13, 4  ;;  %v1309_v26 = vrot.slane %v5014_v27, 5  ;;  %v1312_v23 = vrot.slane %v5019_v34, 5  ;;  %v1303_v33 = vsel %vm5000_vm6, %v3521_v39, %v1302_v57 }
  0x66   : > { %v615_v11 = vrot.slane %v614_v24, 4  ;;  %v1304_v47 = vrot.slane %v1302_v57, 4  ;;  %v1316_v48 = vrot.slane %v5051_v35, 5  ;;  %v3523_v8 = vrot.slane %v5039_v5, 9 }
  0x67   : > { %v610_v61 = vsel %vm4793_vm3, %v605_v31, %v609_v22  ;;  %v1310_v13 = vsel %vm5000_vm6, %v3522_v49, %v1309_v26  ;;  %v1311_v2 = vrot.slane %v1309_v26, 4  ;;  %v1319_v39 = vrot.slane %v5054_v18, 5 }
  0x68   : > { %v620_v9 = vsel %vm4793_vm3, %v615_v11, %v619_v44  ;;  %v1306_v34 = vsel %vm5000_vm6, %v1304_v47, %v1305_v60  ;;  %v1318_v20 = vrot.slane %v1316_v48, 4  ;;  %v3524_v24 = vrot.slane %v5071_v1, 9 }
  0x69   : > { %v5291_v25 = vcombine.low %v610_v61, %v620_v9  ;;  %v5293_v62 = vcombine.low %v1303_v33, %v1306_v34  ;;  %v1313_v22 = vsel %vm5000_vm6, %v1311_v2, %v1312_v23  ;;  %v1323_v57 = vrot.slane %v5081_v12, 5  ;;  %v4655_v2 = vld [vmem:[%s5881_s1 + $0x48] sm:$0xff]  }
  0x6a   : > { %v5297_v38 = vcombine.low %v1310_v13, %v1313_v22  ;;  %v1326_v44 = vrot.slane %v5084_v7, 5  ;;  %v1317_v18 = vsel %vm5000_vm6, %v3523_v8, %v1316_v48  ;;  %v1320_v60 = vsel %vm5000_vm6, %v1318_v20, %v1319_v39 }
  0x6b   : > { %4034 = vmatmul.mubr.msk.bf16.gmra.mrb[28].mxu1 %vm702_vm2, %v5291_v25  ;;  %4218 = vmatmul.mubr.msk.bf16.gmra.mrb[12].mxu0 %vm702_vm2, %v5293_v62  ;;  %v1325_v49 = vrot.slane %v1323_v57, 4  ;;  %v1330_v31 = vrot.slane %v5119_v58, 5  ;;  %v1337_v26 = vrot.slane %v5151_v41, 5  ;;  %v1324_v23 = vsel %vm5000_vm6, %v3524_v24, %v1323_v57 }
  0x6c   : > { %4045 = vmatprep.mubr.msk.bf16.mxu1 %vm702_vm2, %v3477_v28  ;;  %4221 = vmatprep.mubr.msk.bf16.mxu0 %vm702_vm2, %v5297_v38  ;;  %v5319_v28 = vcombine.low %v1317_v18, %v1320_v60  ;;  %v3525_v11 = vrot.slane %v5111_v45, 9  ;;  %v1333_v47 = vrot.slane %v5128_v0, 5  ;;  %v5325_v48 = vcombine.low %v4806_v42, %v4813_v46 }
  0x6d   : > { %v1327_v7 = vsel %vm5000_vm6, %v1325_v49, %v1326_v44  ;;  %v1332_v33 = vrot.slane %v1330_v31, 4  ;;  %v3526_v61 = vrot.slane %v5141_v21, 9  ;;  %v1339_v8 = vrot.slane %v1337_v26, 4 }
  0x6e   : > { %v5328_v13 = vcombine.low %v1324_v23, %v1327_v7  ;;  %v1340_v9 = vrot.slane %v5169_v59, 5  ;;  %v1344_v34 = vrot.slane %v5200_v56, 5  ;;  %v1331_v42 = vsel %vm5000_vm6, %v3525_v11, %v1330_v31  ;;  %v5444_v31 = vld [vmem:[%s5881_s1 + $0x60] sm:$0xff]  }
  0x6f   : > { %v1334_v46 = vsel %vm5000_vm6, %v1332_v33, %v1333_v47  ;;  %v5348_v0 = vcombine.low %v4824_v53, %v4827_v54  ;;  %v1338_v59 = vsel %vm5000_vm6, %v3526_v61, %v1337_v26  ;;  %v5354_v20 = vcombine.low %v4961_v19, %v4966_v32  ;;  %v4661_v53 = vld [vmem:[%s5881_s1 + $0x50] sm:$0xff]  }
  0x70   : > { %v3527_v39 = vrot.slane %v5182_v17, 9  ;;  %v1351_v22 = vrot.slane %v5230_v3, 5  ;;  %v5367_v54 = vcombine.low %v4994_v4, %v5014_v27  ;;  %v5369_v19 = vcombine.low %v1331_v42, %v1334_v46 }
  0x71   : > { %v1346_v32 = vrot.slane %v1344_v34, 4  ;;  %v1347_v24 = vrot.slane %v5207_v30, 5  ;;  %v5374_v57 = vcombine.low %v5039_v5, %v5051_v35  ;;  %v5378_v44 = vcombine.low %v5071_v1, %v5081_v12  ;;  %v222_v30 = vld [vmem:[%s4754_s4 + $0xc8] sm:$0x1] }
  0x72   : > { %v5382_v18 = vcombine.low %v5111_v45, %v5119_v58  ;;  %v5386_v4 = vcombine.low %v5141_v21, %v5151_v41  ;;  %v5390_v27 = vcombine.low %v5182_v17, %v5200_v56  ;;  %v5394_v5 = vcombine.low %v4843_v10, %v4851_v16  ;;  %v5405_v21 = vld [vmem:[%s4754_s4 + $0xc4] sm:$0xf]  ;;  %v4667_v10 = vld [vmem:[%s5881_s1 + $0x58] sm:$0xff]  }
  0x73   : > { %4046 = vmatmul.mubr.msk.bf16.vlgmr.msra.gmra.mrb[0].mxu1 %vm702_vm2, %v4802_v37  ;;  %4222 = vmatmul.mubr.msk.bf16.gmra.mrb[16].mxu0 %vm702_vm2, %v5319_v28  ;;  %v5400_v1 = vcombine.low %v5219_v43, %v5230_v3  ;;  %v3528_v12 = vrot.slane %v5219_v43, 9  ;;  %v1353_v58 = vrot.slane %v1351_v22, 4  ;;  %v1354_v45 = vrot.slane %v5238_v40, 5  ;;  %v5428_v3 = vld [vmem:[%s4754_s4 + $0xc0] sm:$0xf] }
  0x74   : > { %4078 = vmatpush3.bf16.msra.mxu1 %v4942_v55  ;;  %4049 = vmatprep.mubr.msk.bf16.mxu1 %vm702_vm2, %v5325_v48  ;;  %v1341_v55 = vsel %vm5000_vm6, %v1339_v8, %v1340_v9  ;;  %v1345_v16 = vsel %vm5000_vm6, %v3527_v39, %v1344_v34  ;;  %v1348_v41 = vsel %vm5000_vm6, %v1346_v32, %v1347_v24  ;;  %v2171_v40 = vrot.slane %v5405_v21, 5 }
  0x75   : > { %4225 = vmatprep.mubr.msk.bf16.mxu0 %vm702_vm2, %v5328_v13  ;;  %4079 = vmatprep.subr.bf16.mxu1 %v4655_v2  ;;  %v5396_v35 = vcombine.low %v1338_v59, %v1341_v55  ;;  %v1352_v17 = vsel %vm5000_vm6, %v3528_v12, %v1351_v22  ;;  %v1355_v56 = vsel %vm5000_vm6, %v1353_v58, %v1354_v45  ;;  %v1913_v26 = vshrl.u32 %v5428_v3, 16  ;;  %v5938_v22 = vld [vmem:[#allocation4_spill] sm:$0xff]  ;;  %v5939_v45 = vld [vmem:[#allocation17_spill] sm:$0xff] }
  0x76   : > { %v5433_v43 = vcombine.low %v4866_v36, %v4881_v51  ;;  %v5435_v60 = vcombine.low %v1345_v16, %v1348_v41  ;;  %v5439_v49 = vcombine.low %v4898_v6, %v4906_v15  ;;  %v1916_v23 = vshll.u32 %v5428_v3, 16  ;;  %v4675_v16 = vld [vmem:[%s5881_s1 + $0xf8] sm:$0xff]   ;;  %v4684_v41 = vld [vmem:[%s4754_s4 + $0x4] sm:$0xf] }
  0x77   : > { %v1922_v7 = vshll.u32 %v5405_v21, 16  ;;  %v1926_v36 = vshrl.u32 %v5405_v21, 16  ;;  %v5450_v51 = vcombine.low %v1352_v17, %v1355_v56  ;;  %v3631_v11 = vrot.slane %v5428_v3, 9  ;;  %v4679_v17 = vld [vmem:[%s5881_s1 + $0x100] sm:$0xff]   ;;  %v4685_v56 = vld [vmem:[%s4754_s4 + $0x8] sm:$0x1] }
  0x78   : > { %4080 = vmatpush3.bf16.msra.mxu1 %v4655_v2  ;;  %v2173_v6 = vrot.slane %v2171_v40, 4  ;;  %v2174_v15 = vrot.slane %v222_v30, 5  ;;  %v1915_v33 = vrot.slane %v1913_v26, 4  ;;  %v1918_v47 = vrot.slane %v1916_v23, 5  ;;  %v4686_v26 = vld [vmem:[%s4754_s4] sm:$0xf] }
  0x79   : > { %4081 = vmatprep.subr.bf16.mxu1 %v4661_v53  ;;  %v1924_v61 = vrot.slane %v1922_v7, 5  ;;  %v1928_v2 = vrot.slane %v1926_v36, 4  ;;  %v1932_v34 = vshll.u32 %v222_v30, 16  ;;  %v2172_v42 = vsel %vm5000_vm6, %v3631_v11, %v2171_v40 }
  0x7a   : > { %v1919_v8 = vor.u32 %v1918_v47, %v1915_v33  ;;  %v2175_v46 = vsel %vm5000_vm6, %v2173_v6, %v2174_v15  ;;  %v1246_v40 = vrot.slane %v4684_v41, 5  ;;  %v1249_v30 = vrot.slane %v4685_v56, 5  ;;  %v4674_v15 = vld [vmem:[%s5881_s1 + $0x68] sm:$0xff]   ;;  %v5940_v33 = vld [vmem:[#allocation9_spill] sm:$0xff]  ;;  %v5952_v41 = vld [vmem:[#allocation10_spill] sm:$0xff] }
  0x7b   : > { %4050 = vmatmul.mubr.msk.bf16.gmra.mrb[4].mxu1 %vm702_vm2, %v5348_v0  ;;  %4226 = vmatmul.mubr.msk.bf16.gmra.mrb[20].mxu0 %vm702_vm2, %v5369_v19  ;;  %v1929_v9 = vor.u32 %v1928_v2, %v1924_v61  ;;  %v1934_v39 = vrot.slane %v1932_v34, 5  ;;  %v5470_v32 = vcombine.low %v2172_v42, %v2175_v46  ;;  %v3513_v23 = vrot.slane %v4686_v26, 9  ;;  %v5941_v47 = vld [vmem:[#allocation11_spill] sm:$0xff]  ;;  %v4680_v2 = vld [vmem:[%s5881_s1 + $0x78] sm:$0xff]   ;;  %v4687_v34 = vld [vmem:[%s5881_s1 + $0x80] sm:$0xff]  }
  0x7c   : > { %4053 = vmatprep.mubr.msk.bf16.mxu1 %vm702_vm2, %v5394_v5  ;;  %4229 = vmatprep.mubr.msk.bf16.mxu0 %vm702_vm2, %v5396_v35  ;;  %v1920_v59 = vrot.slane %v1919_v8, 4  ;;  %v1248_v7 = vrot.slane %v1246_v40, 4  ;;  %v5942_v8 = vld [vmem:[#allocation13_spill] sm:$0xff]  ;;  %v5944_v42 = vld [vmem:[#allocation19_spill] sm:$0xff]  ;;  %v5955_v56 = vld [vmem:[#allocation16_spill] sm:$0xff] }
  0x7d   : > { %4082 = vmatpush3.bf16.msra.mxu1 %v4661_v53  ;;  %v1930_v55 = vrot.slane %v1929_v9, 4  ;;  %v5468_v53 = vcombine.low %v5938_v22, %v4937_v52  ;;  %v4668_v52 = vld [vmem:[%s5881_s1 + $0xe8] sm:$0xff]   ;;  %v1247_v36 = vsel %vm5000_vm6, %v3513_v23, %v1246_v40  ;;  %v5565_v9 = vcombine.low %v5428_v3, %v5405_v21  ;;  %v5945_v46 = vld [vmem:[#allocation21_spill] sm:$0xff]  ;;  %v5582_v3 = vld [vmem:[%s4754_s4 + $0xd0] sm:$0xf] }
  0x7e   : > { %4083 = vmatprep.subr.bf16.mxu1 %v4667_v10  ;;  %v1925_v24 = vsel %vm4793_vm3, %v1920_v59, %v1924_v61  ;;  %v1250_v11 = vsel %vm5000_vm6, %v1248_v7, %v1249_v30  ;;  %v4678_v61 = vld [vmem:[%s5881_s1 + $0x70] sm:$0xff]   ;;  %v5579_v21 = vld [vmem:[%s4754_s4 + $0xcc] sm:$0xf]  ;;  %v2656_v23 = vshrl.u32 %v5582_v3, 16  ;;  %v5956_v7 = vld [vmem:[#allocation18_spill] sm:$0xff]  ;;  %v2901_v29 = vrot.slane %v5582_v3, 5 }
  0x7f   : > { %v1935_v12 = vsel %vm4793_vm3, %v1930_v55, %v1934_v39  ;;  %v3537_v6 = vcombine.low %v1247_v36, %v1250_v11  ;;  %v3669_v59 = vcombine.low %v5579_v21, %v5582_v3  ;;  %v5946_v55 = vld [vmem:[#allocation2_spill] sm:$0xff]  ;;  %v4681_v39 = vld [vmem:[%s5881_s1 + $0x108] sm:$0xff]   ;;  %v5953_v40 = vld [vmem:[#allocation12_spill] sm:$0xff]  ;;  %v2643_v30 = vshrl.u32 %v5579_v21, 16 }
  0x80   : > { %v5476_v58 = vcombine.low %v1925_v24, %v1935_v12  ;;  %v5947_v22 = vld [vmem:[#allocation3_spill] sm:$0xff]  ;;  %v5948_v24 = vld [vmem:[#allocation5_spill] sm:$0xff]  ;;  %v4682_v12 = vld [vmem:[%s5881_s1 + $0x110] sm:$0xff]   ;;  %v2646_v26 = vshll.u32 %v5579_v21, 16 }
  0x81   : > { %4084 = vmatpush3.bf16.msra.mxu1 %v4667_v10  ;;  %v4673_v10 = vld [vmem:[%s5881_s1 + $0xf0] sm:$0xff]   ;;  %v2645_v36 = vrot.slane %v2643_v30, 4 }
  0x82   : > { %4117 = vmatprep.subr.bf16.mxu1 %v5444_v31  ;;  %v2648_v11 = vrot.slane %v2646_v26, 5 }
  0x83   : > { %4054 = vmatmul.mubr.msk.bf16.gmra.mrb[8].mxu1 %vm702_vm2, %v5433_v43  ;;  %4230 = vmatmul.mubr.msk.bf16.gmra.mrb[24].mxu0 %vm702_vm2, %v5435_v60 }
  0x84   : > { %4057 = vmatprep.mubr.msk.bf16.mxu1 %vm702_vm2, %v5439_v49  ;;  %4233 = vmatprep.mubr.msk.bf16.mxu0 %vm702_vm2, %v5450_v51 }
  0x8b   : > { %4058 = vmatmul.mubr.msk.bf16.gmra.mrb[12].mxu1 %vm702_vm2, %v5468_v53  ;;  %4234 = vmatmul.mubr.msk.bf16.gmra.mrb[28].mxu0 %vm702_vm2, %v5470_v32 }
  0x8c   : > { %4061 = vmatprep.mubr.msk.bf16.mxu1 %vm702_vm2, %v5354_v20  ;;  %4245 = vmatprep.mubr.msk.bf16.mxu0 %vm702_vm2, %v5325_v48 }
  0x93   : > { %4062 = vmatmul.mubr.msk.bf16.gmra.mrb[16].mxu1 %vm702_vm2, %v5367_v54  ;;  %4246 = vmatmul.mubr.msk.bf16.vlgmr.msra.gmra.mrb[0].mxu0 %vm702_vm2, %v5348_v0 }
  0x94   : > { %4278 = vmatpush3.bf16.msra.mxu0 %v5939_v45  ;;  %4065 = vmatprep.mubr.msk.bf16.mxu1 %vm702_vm2, %v5374_v57  ;;  %v5949_v45 = vld [vmem:[#allocation6_spill] sm:$0xff] }
  0x95   : > { %4249 = vmatprep.mubr.msk.bf16.mxu0 %vm702_vm2, %v5394_v5  ;;  %4279 = vmatprep.subr.bf16.mxu0 %v4668_v52 }
  0x98   : > { %4280 = vmatpush3.bf16.msra.mxu0 %v4668_v52  ;;  %v4683_v52 = vld [vmem:[%s5881_s1 + $0x118] sm:$0xff]  }
  0x99   : > { %4281 = vmatprep.subr.bf16.mxu0 %v4673_v10 }
  0x9b   : > { %4066 = vmatmul.mubr.msk.bf16.gmra.mrb[20].mxu1 %vm702_vm2, %v5378_v44  ;;  %4250 = vmatmul.mubr.msk.bf16.gmra.mrb[4].mxu0 %vm702_vm2, %v5433_v43 }
  0x9c   : > { %4069 = vmatprep.mubr.msk.bf16.mxu1 %vm702_vm2, %v5382_v18  ;;  %4253 = vmatprep.mubr.msk.bf16.mxu0 %vm702_vm2, %v5439_v49 }
  0x9d   : > { %4282 = vmatpush3.bf16.msra.mxu0 %v4673_v10  ;;  %v5950_v10 = vld [vmem:[#allocation7_spill] sm:$0xff] }
  0x9e   : > { %4283 = vmatprep.subr.bf16.mxu0 %v4675_v16 }
  0xa1   : > { %4284 = vmatpush3.bf16.msra.mxu0 %v4675_v16  ;;  %v5951_v16 = vld [vmem:[#allocation8_spill] sm:$0xff] }
  0xa2   : > { %4317 = vmatprep.subr.bf16.mxu0 %v4679_v17 }
  0xa3   : > { %4070 = vmatmul.mubr.msk.bf16.gmra.mrb[24].mxu1 %vm702_vm2, %v5386_v4  ;;  %4254 = vmatmul.mubr.msk.bf16.gmra.mrb[8].mxu0 %vm702_vm2, %v5468_v53 }
  0xa4   : > { %4073 = vmatprep.mubr.msk.bf16.mxu1 %vm702_vm2, %v5390_v27  ;;  %4257 = vmatprep.mubr.msk.bf16.mxu0 %vm702_vm2, %v5354_v20 }
  0xab   : > { %4074 = vmatmul.mubr.msk.bf16.gmra.mrb[28].mxu1 %vm702_vm2, %v5400_v1  ;;  %4258 = vmatmul.mubr.msk.bf16.gmra.mrb[12].mxu0 %vm702_vm2, %v5367_v54 }
  0xac   : > { %4085 = vmatprep.mubr.msk.bf16.mxu1 %vm702_vm2, %v3537_v6  ;;  %4261 = vmatprep.mubr.msk.bf16.mxu0 %vm702_vm2, %v5374_v57 }
  0xb3   : > { %4086 = vmatmul.mubr.msk.bf16.vlgmr.msra.gmra.mrb[0].mxu1 %vm702_vm2, %v5940_v33  ;;  %4262 = vmatmul.mubr.msk.bf16.gmra.mrb[16].mxu0 %vm702_vm2, %v5378_v44  ;;  %v5650_v33 = vld [vmem:[%s4754_s4 + $0xd4] sm:$0x1] }
  0xb4   : > { %4118 = vmatpush3.bf16.msra.mxu1 %v5444_v31  ;;  %4089 = vmatprep.mubr.msk.bf16.mxu1 %vm702_vm2, %v5941_v47  ;;  %v5943_v31 = vld [vmem:[#allocation15_spill] sm:$0xff] }
  0xb5   : > { %4265 = vmatprep.mubr.msk.bf16.mxu0 %vm702_vm2, %v5382_v18  ;;  %4119 = vmatprep.subr.bf16.mxu1 %v4674_v15 }
  0xb8   : > { %4120 = vmatpush3.bf16.msra.mxu1 %v4674_v15  ;;  %v2658_v15 = vrot.slane %v2656_v23, 4 }
  0xb9   : > { %4121 = vmatprep.subr.bf16.mxu1 %v4678_v61 }
  0xbb   : > { %4090 = vmatmul.mubr.msk.bf16.gmra.mrb[4].mxu1 %vm702_vm2, %v5942_v8  ;;  %4266 = vmatmul.mubr.msk.bf16.gmra.mrb[20].mxu0 %vm702_vm2, %v5386_v4 }
  0xbc   : > { %4093 = vmatprep.mubr.msk.bf16.mxu1 %vm702_vm2, %v5943_v31  ;;  %4269 = vmatprep.mubr.msk.bf16.mxu0 %vm702_vm2, %v5390_v27 }
  0xbd   : > { %4122 = vmatpush3.bf16.msra.mxu1 %v4678_v61  ;;  %v5957_v61 = vld [vmem:[#allocation20_spill] sm:$0xff] }
  0xbe   : > { %4123 = vmatprep.subr.bf16.mxu1 %v4680_v2 }
  0xc1   : > { %4124 = vmatpush3.bf16.msra.mxu1 %v4680_v2  ;;  %v2649_v2 = vor.u32 %v2648_v11, %v2645_v36 }
  0xc2   : > { %4357 = vmatprep.subr.bf16.mxu1 %v4687_v34 }
  0xc3   : > { %4094 = vmatmul.mubr.msk.bf16.gmra.mrb[8].mxu1 %vm702_vm2, %v5944_v42  ;;  %4270 = vmatmul.mubr.msk.bf16.gmra.mrb[24].mxu0 %vm702_vm2, %v5400_v1 }
  0xc4   : > { %4097 = vmatprep.mubr.msk.bf16.mxu1 %vm702_vm2, %v5945_v46  ;;  %4273 = vmatprep.mubr.msk.bf16.mxu0 %vm702_vm2, %v5565_v9 }
  0xcb   : > { %4098 = vmatmul.mubr.msk.bf16.gmra.mrb[12].mxu1 %vm702_vm2, %v5262_v50  ;;  %4274 = vmatmul.mubr.msk.bf16.gmra.mrb[28].mxu0 %vm702_vm2, %v3669_v59  ;;  %v2662_v59 = vshll.u32 %v5650_v33, 16 }
  0xcc   : > { %4101 = vmatprep.mubr.msk.bf16.mxu1 %vm702_vm2, %v5293_v62  ;;  %4285 = vmatprep.mubr.msk.bf16.mxu0 %vm702_vm2, %v5946_v55  ;;  %v4690_v55 = vld [vmem:[%s5881_s1 + $0x98] sm:$0xff]  }
  0xd3   : > { %4102 = vmatmul.mubr.msk.bf16.gmra.mrb[16].mxu1 %vm702_vm2, %v5297_v38  ;;  %4286 = vmatmul.mubr.msk.bf16.vlgmr.msra.gmra.mrb[0].mxu0 %vm702_vm2, %v5947_v22  ;;  %v2664_v22 = vrot.slane %v2662_v59, 5 }
  0xd4   : > { %4318 = vmatpush3.bf16.msra.mxu0 %v4679_v17  ;;  %4105 = vmatprep.mubr.msk.bf16.mxu1 %vm702_vm2, %v5319_v28  ;;  %v5954_v17 = vld [vmem:[#allocation14_spill] sm:$0xff] }
  0xd5   : > { %4289 = vmatprep.mubr.msk.bf16.mxu0 %vm702_vm2, %v5948_v24  ;;  %4319 = vmatprep.subr.bf16.mxu0 %v4681_v39 }
  0xd8   : > { %4320 = vmatpush3.bf16.msra.mxu0 %v4681_v39 }
  0xd9   : > { %4321 = vmatprep.subr.bf16.mxu0 %v4682_v12 }
  0xdb   : > { %4106 = vmatmul.mubr.msk.bf16.gmra.mrb[20].mxu1 %vm702_vm2, %v5328_v13  ;;  %4290 = vmatmul.mubr.msk.bf16.gmra.mrb[4].mxu0 %vm702_vm2, %v5949_v45 }
  0xdc   : > { %4109 = vmatprep.mubr.msk.bf16.mxu1 %vm702_vm2, %v5369_v19  ;;  %4293 = vmatprep.mubr.msk.bf16.mxu0 %vm702_vm2, %v5950_v10 }
  0xdd   : > { %4322 = vmatpush3.bf16.msra.mxu0 %v4682_v12 }
  0xde   : > { %4323 = vmatprep.subr.bf16.mxu0 %v4683_v52 }
  0xe1   : > { %4324 = vmatpush3.bf16.msra.mxu0 %v4683_v52 }
  0xe3   : > { %4110 = vmatmul.mubr.msk.bf16.gmra.mrb[24].mxu1 %vm702_vm2, %v5396_v35  ;;  %4294 = vmatmul.mubr.msk.bf16.gmra.mrb[8].mxu0 %vm702_vm2, %v5951_v16 }
  0xe4   : > { %4113 = vmatprep.mubr.msk.bf16.mxu1 %vm702_vm2, %v5435_v60  ;;  %4297 = vmatprep.mubr.msk.bf16.mxu0 %vm702_vm2, %v5952_v41 }
  0xeb   : > { %4114 = vmatmul.mubr.msk.bf16.gmra.mrb[28].mxu1 %vm702_vm2, %v5450_v51  ;;  %4298 = vmatmul.mubr.msk.bf16.gmra.mrb[12].mxu0 %vm702_vm2, %v5953_v40 }
  0xec   : > { %4125 = vmatprep.mubr.msk.bf16.mxu1 %vm702_vm2, %v4802_v37  ;;  %4301 = vmatprep.mubr.msk.bf16.mxu0 %vm702_vm2, %v5954_v17  ;;  %v2652_v37 = vshll.u32 %v5582_v3, 16 }
  0xee   : > { %v2654_v6 = vrot.slane %v2652_v37, 5 }
  0xf3   : > { %4126 = vmatmul.mubr.msk.bf16.vlgmr.msra.gmra.mrb[0].mxu1 %vm702_vm2, %v5325_v48  ;;  %4302 = vmatmul.mubr.msk.bf16.gmra.mrb[16].mxu0 %vm702_vm2, %v5955_v56  ;;  %v4688_v48 = vld [vmem:[%s5881_s1 + $0x88] sm:$0xff]  }
  0xf4   : > { %4361 = vmatpush3.bf16.msra.mxu1 %v4687_v34  ;;  %4129 = vmatprep.mubr.msk.bf16.mxu1 %vm702_vm2, %v5348_v0  ;;  %v4689_v0 = vld [vmem:[%s5881_s1 + $0x90] sm:$0xff]   ;;  %v2659_v34 = vor.u32 %v2658_v15, %v2654_v6 }
  0xf5   : > { %4305 = vmatprep.mubr.msk.bf16.mxu0 %vm702_vm2, %v5956_v7  ;;  %4358 = vmatprep.subr.bf16.mxu1 %v4688_v48 }
  0xf6   : > { %v2660_v39 = vrot.slane %v2659_v34, 4 }
  0xf8   : > { %4362 = vmatpush3.bf16.msra.mxu1 %v4688_v48  ;;  %v2665_v24 = vsel %vm4793_vm3, %v2660_v39, %v2664_v22 }
  0xf9   : > { %4359 = vmatprep.subr.bf16.mxu1 %v4689_v0 }
  0xfb   : > { %4130 = vmatmul.mubr.msk.bf16.gmra.mrb[4].mxu1 %vm702_vm2, %v5394_v5  ;;  %4306 = vmatmul.mubr.msk.bf16.gmra.mrb[20].mxu0 %vm702_vm2, %v5957_v61  ;;  %v2650_v5 = vrot.slane %v2649_v2, 4 }
  0xfc   : > { %4133 = vmatprep.mubr.msk.bf16.mxu1 %vm702_vm2, %v5433_v43  ;;  %4309 = vmatprep.mubr.msk.bf16.mxu0 %vm702_vm2, %v5264_v63 }
  0xfd   : > { %4363 = vmatpush3.bf16.msra.mxu1 %v4689_v0  ;;  %v2655_v43 = vsel %vm4793_vm3, %v2650_v5, %v2654_v6 }
  0xfe   : > { %4360 = vmatprep.subr.bf16.mxu1 %v4690_v55  ;;  %v3698_v12 = vcombine.low %v2655_v43, %v2665_v24 }
 0x101   : > { %4364 = vmatpush3.bf16.msra.mxu1 %v4690_v55 }
 0x103   : > { %4134 = vmatmul.mubr.msk.bf16.gmra.mrb[8].mxu1 %vm702_vm2, %v5439_v49  ;;  %4310 = vmatmul.mubr.msk.bf16.gmra.mrb[24].mxu0 %vm702_vm2, %v5291_v25 }
 0x104   : > { %4137 = vmatprep.mubr.msk.bf16.mxu1 %vm702_vm2, %v5468_v53  ;;  %4313 = vmatprep.mubr.msk.bf16.mxu0 %vm702_vm2, %v5476_v58 }
 0x10b   : > { %4138 = vmatmul.mubr.msk.bf16.gmra.mrb[12].mxu1 %vm702_vm2, %v5354_v20  ;;  %4314 = vmatmul.mubr.msk.bf16.gmra.mrb[28].mxu0 %vm702_vm2, %v3698_v12 }
 0x10c   : > { %4141 = vmatprep.mubr.msk.bf16.mxu1 %vm702_vm2, %v5367_v54  ;;  %4325 = vmatprep.mubr.msk.bf16.mxu0 %vm702_vm2, %v5941_v47 }
 0x113   : > { %4142 = vmatmul.mubr.msk.bf16.gmra.mrb[16].mxu1 %vm702_vm2, %v5374_v57  ;;  %4326 = vmatmul.mubr.msk.bf16.vlgmr.msra.gmra.mrb[0].mxu0 %vm702_vm2, %v5942_v8 }
 0x114   : > { %4145 = vmatprep.mubr.msk.bf16.mxu1 %vm702_vm2, %v5378_v44  ;;  %4329 = vmatprep.mubr.msk.bf16.mxu0 %vm702_vm2, %v5943_v31 }
 0x11b   : > { %4146 = vmatmul.mubr.msk.bf16.gmra.mrb[20].mxu1 %vm702_vm2, %v5382_v18  ;;  %4330 = vmatmul.mubr.msk.bf16.gmra.mrb[4].mxu0 %vm702_vm2, %v5944_v42 }
 0x11c   : > { %4149 = vmatprep.mubr.msk.bf16.mxu1 %vm702_vm2, %v5386_v4  ;;  %4333 = vmatprep.mubr.msk.bf16.mxu0 %vm702_vm2, %v5945_v46 }
 0x123   : > { %4150 = vmatmul.mubr.msk.bf16.gmra.mrb[24].mxu1 %vm702_vm2, %v5390_v27  ;;  %4334 = vmatmul.mubr.msk.bf16.gmra.mrb[8].mxu0 %vm702_vm2, %v5262_v50  ;;  %v3719_v50 = vrot.slane %v5579_v21, 9 }
 0x124   : > { %4153 = vmatprep.mubr.msk.bf16.mxu1 %vm702_vm2, %v5400_v1  ;;  %4337 = vmatprep.mubr.msk.bf16.mxu0 %vm702_vm2, %v5293_v62  ;;  %v2903_v62 = vrot.slane %v2901_v29, 4 }
 0x12b   : > { %4154 = vmatmul.mubr.msk.bf16.gmra.mrb[28].mxu1 %vm702_vm2, %v5565_v9  ;;  %4338 = vmatmul.mubr.msk.bf16.gmra.mrb[12].mxu0 %vm702_vm2, %v5297_v38  ;;  %v2904_v38 = vrot.slane %v5650_v33, 5 }
 0x12c   : > { %4181 = vmatprep.mubr.msk.bf16.mxu1 %vm702_vm2, %v5953_v40  ;;  %4341 = vmatprep.mubr.msk.bf16.mxu0 %vm702_vm2, %v5319_v28  ;;  %v2902_v28 = vsel %vm5000_vm6, %v3719_v50, %v2901_v29 }
 0x133   : > { %4182 = vmatmul.mubr.msk.bf16.vlgmr.msra.gmra.mrb[16].mxu1 %vm702_vm2, %v5954_v17  ;;  %4342 = vmatmul.mubr.msk.bf16.gmra.mrb[16].mxu0 %vm702_vm2, %v5328_v13  ;;  %v2905_v13 = vsel %vm5000_vm6, %v2903_v62, %v2904_v38 }
 0x134   : > { %4185 = vmatprep.mubr.msk.bf16.mxu1 %vm702_vm2, %v5955_v56  ;;  %4345 = vmatprep.mubr.msk.bf16.mxu0 %vm702_vm2, %v5369_v19  ;;  %v3728_v20 = vcombine.low %v2902_v28, %v2905_v13 }
 0x13b   : > { %4186 = vmatmul.mubr.msk.bf16.gmra.mrb[20].mxu1 %vm702_vm2, %v5956_v7  ;;  %4346 = vmatmul.mubr.msk.bf16.gmra.mrb[20].mxu0 %vm702_vm2, %v5396_v35 }
 0x13c   : > { %4189 = vmatprep.mubr.msk.bf16.mxu1 %vm702_vm2, %v5957_v61  ;;  %4349 = vmatprep.mubr.msk.bf16.mxu0 %vm702_vm2, %v5435_v60 }
 0x143   : > { %4190 = vmatmul.mubr.msk.bf16.gmra.mrb[24].mxu1 %vm702_vm2, %v5264_v63  ;;  %4350 = vmatmul.mubr.msk.bf16.gmra.mrb[24].mxu0 %vm702_vm2, %v5450_v51 }
 0x144   : > { %4193 = vmatprep.mubr.msk.bf16.mxu1 %vm702_vm2, %v5291_v25  ;;  %4353 = vmatprep.mubr.msk.bf16.mxu0 %vm702_vm2, %v5470_v32 }
 0x14b   : > { %4194 = vmatmul.mubr.msk.bf16.gmra.mrb[28].mxu1 %vm702_vm2, %v5476_v58  ;;  %4354 = vmatmul.mubr.msk.bf16.gmra.mrb[28].mxu0 %vm702_vm2, %v3728_v20  ;;  %v5767_v58 = vld [vmem:[%s5882_s2] ss:$0 sm:$0xff] }
 0x1c6   : > { %v4127_v63 = vpop.f32.mrb[0].mxu1 }
 0x1c7   : > { %v1753_v54 = vpop.f32.mrb[1].mxu1 }
 0x1c8   : > { %v4128_v19 = vpop.f32.mrb[2].mxu1 }
 0x1c9   : > { %v1756_v57 = vpop.f32.mrb[3].mxu1 }
 0x1ce   : > { %v4131_v25 = vpop.f32.mrb[4].mxu1 }
 0x1cf   : > { %v1769_v44 = vpop.f32.mrb[5].mxu1 }
 0x1d0   : > { %v4132_v18 = vpop.f32.mrb[6].mxu1 }
 0x1d1   : > { %v1772_v4 = vpop.f32.mrb[7].mxu1 }
 0x1d6   : > { %v4135_v27 = vpop.f32.mrb[8].mxu1 }
 0x1d7   : > { %v1785_v35 = vpop.f32.mrb[9].mxu1 }
 0x1d8   : > { %v5752_v1 = vpop.f32.mrb[10].mxu1 }
 0x1d9   : > { %v5754_v14 = vpop.f32.mrb[11].mxu1 }
 0x1de   : > { %v5756_v60 = vpop.f32.mrb[12].mxu1 }
 0x1df   : > { %v5758_v49 = vpop.f32.mrb[13].mxu1 }
 0x1e0   : > { %v5760_v51 = vpop.f32.mrb[14].mxu1 }
 0x1e1   : > { %v5762_v53 = vpop.f32.mrb[15].mxu1 }
 0x1e6   : > { %v4327_v32 = vpop.f32.mrb[0].mxu0 }
 0x1e7   : > { %v4365_v47 = vadd.f32 %v4327_v32, %v4127_v63  ;;  %v2979_v8 = vpop.f32.mrb[1].mxu0 }
 0x1e8   : > { %v4366_v31 = vadd.f32 %v2979_v8, %v1753_v54  ;;  %v4328_v9 = vpop.f32.mrb[2].mxu0 }
 0x1e9   : > { %v3147_v42 = vadd.f32 %v4365_v47, %v5767_v58  ;;  %v4367_v46 = vadd.f32 %v4328_v9, %v4128_v19  ;;  %v2982_v21 = vpop.f32.mrb[3].mxu0 }
 0x1ea   : > { %v3145_v3 = vadd.f32 %v4366_v31, %v5767_v58  ;;  %v4368_v52 = vadd.f32 %v2982_v21, %v1756_v57 }
 0x1eb   : > { %v3179_v45 = vmax.f32 %v3147_v42, 0.0  ;;  %v3148_v10 = vadd.f32 %v4367_v46, %v5767_v58 }
 0x1ec   : > { %v3177_v16 = vmax.f32 %v3145_v3, 0.0  ;;  %v3146_v41 = vadd.f32 %v4368_v52, %v5767_v58 }
 0x1ed   : > { %v3787_v40 = vpack.c.bf16 %v3179_v45, %v3179_v45  ;;  %v3180_v17 = vmax.f32 %v3148_v10, 0.0 }
 0x1ee   : > { %v3785_v56 = vpack.c.bf16 %v3177_v16, %v3177_v16  ;;  %v3178_v30 = vmax.f32 %v3146_v41, 0.0  ;;  %v4331_v26 = vpop.f32.mrb[4].mxu0 }
 0x1ef   : > { %3340 = vst.msk [vmem:[%s5776_s29 + $0x8] sm:$0xf] %vm3337_vm7, %v3787_v40  ;;  %v3788_v23 = vpack.c.bf16 %v3180_v17, %v3180_v17  ;;  %v4369_v37 = vadd.f32 %v4331_v26, %v4131_v25  ;;  %v2995_v7 = vpop.f32.mrb[5].mxu0 }
 0x1f0   : > { %3338 = vst.msk [vmem:[%s5776_s29] sm:$0xf] %vm3337_vm7, %v3785_v56  ;;  %v3786_v48 = vpack.c.bf16 %v3178_v30, %v3178_v30  ;;  %v4370_v36 = vadd.f32 %v2995_v7, %v1769_v44  ;;  %v4332_v11 = vpop.f32.mrb[6].mxu0 }
 0x1f1   : > { %3341 = vst.msk [vmem:[%s5776_s29 + $0xc] sm:$0xf] %vm3337_vm7, %v3788_v23  ;;  %v3151_v6 = vadd.f32 %v4369_v37, %v5767_v58  ;;  %v4371_v15 = vadd.f32 %v4332_v11, %v4132_v18  ;;  %v2998_v33 = vpop.f32.mrb[7].mxu0 }
 0x1f2   : > { %3339 = vst.msk [vmem:[%s5776_s29 + $0x4] sm:$0xf] %vm3337_vm7, %v3786_v48  ;;  %v3149_v0 = vadd.f32 %v4370_v36, %v5767_v58  ;;  %v4372_v61 = vadd.f32 %v2998_v33, %v1772_v4 }
 0x1f3   : > { %v3183_v2 = vmax.f32 %v3151_v6, 0.0  ;;  %v3152_v34 = vadd.f32 %v4371_v15, %v5767_v58 }
 0x1f4   : > { %v3181_v59 = vmax.f32 %v3149_v0, 0.0  ;;  %v3150_v55 = vadd.f32 %v4372_v61, %v5767_v58 }
 0x1f5   : > { %v3791_v5 = vpack.c.bf16 %v3183_v2, %v3183_v2  ;;  %v3184_v39 = vmax.f32 %v3152_v34, 0.0 }
 0x1f6   : > { %v3789_v22 = vpack.c.bf16 %v3181_v59, %v3181_v59  ;;  %v3182_v43 = vmax.f32 %v3150_v55, 0.0  ;;  %v4335_v24 = vpop.f32.mrb[8].mxu0 }
 0x1f7   : > { %3344 = vst.msk [vmem:[%s5776_s29 + $0x18] sm:$0xf] %vm3337_vm7, %v3791_v5  ;;  %v3792_v12 = vpack.c.bf16 %v3184_v39, %v3184_v39  ;;  %v4373_v29 = vadd.f32 %v4335_v24, %v4135_v27  ;;  %v3011_v50 = vpop.f32.mrb[9].mxu0 }
 0x1f8   : > { %3342 = vst.msk [vmem:[%s5776_s29 + $0x10] sm:$0xf] %vm3337_vm7, %v3789_v22  ;;  %v3790_v62 = vpack.c.bf16 %v3182_v43, %v3182_v43  ;;  %v4374_v38 = vadd.f32 %v3011_v50, %v1785_v35  ;;  %v4336_v28 = vpop.f32.mrb[10].mxu0 }
 0x1f9   : > { %3345 = vst.msk [vmem:[%s5776_s29 + $0x1c] sm:$0xf] %vm3337_vm7, %v3792_v12  ;;  %v3155_v13 = vadd.f32 %v4373_v29, %v5767_v58  ;;  %v4375_v20 = vadd.f32 %v4336_v28, %v5752_v1  ;;  %v3014_v63 = vpop.f32.mrb[11].mxu0 }
 0x1fa   : > { %3343 = vst.msk [vmem:[%s5776_s29 + $0x14] sm:$0xf] %vm3337_vm7, %v3790_v62  ;;  %v3153_v54 = vadd.f32 %v4374_v38, %v5767_v58  ;;  %v4376_v19 = vadd.f32 %v3014_v63, %v5754_v14 }
 0x1fb   : > { %v3187_v57 = vmax.f32 %v3155_v13, 0.0  ;;  %v3156_v25 = vadd.f32 %v4375_v20, %v5767_v58 }
 0x1fc   : > { %v3185_v44 = vmax.f32 %v3153_v54, 0.0  ;;  %v3154_v18 = vadd.f32 %v4376_v19, %v5767_v58 }
 0x1fd   : > { %v3795_v4 = vpack.c.bf16 %v3187_v57, %v3187_v57  ;;  %v3188_v27 = vmax.f32 %v3156_v25, 0.0 }
 0x1fe   : > { %v3793_v35 = vpack.c.bf16 %v3185_v44, %v3185_v44  ;;  %v3186_v1 = vmax.f32 %v3154_v18, 0.0  ;;  %v4339_v32 = vpop.f32.mrb[12].mxu0 }
 0x1ff   : > { %3348 = vst.msk [vmem:[%s5776_s29 + $0x28] sm:$0xf] %vm3337_vm7, %v3795_v4  ;;  %v3796_v47 = vpack.c.bf16 %v3188_v27, %v3188_v27  ;;  %v4377_v8 = vadd.f32 %v4339_v32, %v5756_v60  ;;  %v3027_v31 = vpop.f32.mrb[13].mxu0 }
 0x200   : > { %3346 = vst.msk [vmem:[%s5776_s29 + $0x20] sm:$0xf] %vm3337_vm7, %v3793_v35  ;;  %v3794_v14 = vpack.c.bf16 %v3186_v1, %v3186_v1  ;;  %v4378_v9 = vadd.f32 %v3027_v31, %v5758_v49  ;;  %v4340_v42 = vpop.f32.mrb[14].mxu0 }
 0x201   : > { %3349 = vst.msk [vmem:[%s5776_s29 + $0x2c] sm:$0xf] %vm3337_vm7, %v3796_v47  ;;  %v3159_v46 = vadd.f32 %v4377_v8, %v5767_v58  ;;  %v4379_v21 = vadd.f32 %v4340_v42, %v5760_v51  ;;  %v3030_v3 = vpop.f32.mrb[15].mxu0 }
 0x202   : > { %3347 = vst.msk [vmem:[%s5776_s29 + $0x24] sm:$0xf] %vm3337_vm7, %v3794_v14  ;;  %v3157_v52 = vadd.f32 %v4378_v9, %v5767_v58  ;;  %v4380_v60 = vadd.f32 %v3030_v3, %v5762_v53 }
 0x203   : > { %v3191_v45 = vmax.f32 %v3159_v46, 0.0  ;;  %v3160_v10 = vadd.f32 %v4379_v21, %v5767_v58 }
 0x204   : > { %v3189_v49 = vmax.f32 %v3157_v52, 0.0  ;;  %v3158_v16 = vadd.f32 %v4380_v60, %v5767_v58 }
 0x205   : > { %v3799_v41 = vpack.c.bf16 %v3191_v45, %v3191_v45  ;;  %v3192_v40 = vmax.f32 %v3160_v10, 0.0 }
 0x206   : > { %v3797_v17 = vpack.c.bf16 %v3189_v49, %v3189_v49  ;;  %v3190_v56 = vmax.f32 %v3158_v16, 0.0  ;;  %v4183_v51 = vpop.f32.mrb[16].mxu1  ;;  %v4343_v30 = vpop.f32.mrb[16].mxu0 }
 0x207   : > { %3352 = vst.msk [vmem:[%s5776_s29 + $0x38] sm:$0xf] %vm3337_vm7, %v3799_v41  ;;  %v3800_v26 = vpack.c.bf16 %v3192_v40, %v3192_v40  ;;  %v4381_v23 = vadd.f32 %v4343_v30, %v4183_v51  ;;  %v2073_v53 = vpop.f32.mrb[17].mxu1  ;;  %v3043_v37 = vpop.f32.mrb[17].mxu0 }
 0x208   : > { %3350 = vst.msk [vmem:[%s5776_s29 + $0x30] sm:$0xf] %vm3337_vm7, %v3797_v17  ;;  %v3798_v7 = vpack.c.bf16 %v3190_v56, %v3190_v56  ;;  %v4382_v48 = vadd.f32 %v3043_v37, %v2073_v53  ;;  %v4184_v36 = vpop.f32.mrb[18].mxu1  ;;  %v4344_v11 = vpop.f32.mrb[18].mxu0 }
 0x209   : > { %3353 = vst.msk [vmem:[%s5776_s29 + $0x3c] sm:$0xf] %vm3337_vm7, %v3800_v26  ;;  %v3163_v6 = vadd.f32 %v4381_v23, %v5767_v58  ;;  %v4383_v15 = vadd.f32 %v4344_v11, %v4184_v36  ;;  %v2076_v33 = vpop.f32.mrb[19].mxu1  ;;  %v3046_v0 = vpop.f32.mrb[19].mxu0 }
 0x20a   : > { %3351 = vst.msk [vmem:[%s5776_s29 + $0x34] sm:$0xf] %vm3337_vm7, %v3798_v7  ;;  %v3161_v61 = vadd.f32 %v4382_v48, %v5767_v58  ;;  %v4384_v2 = vadd.f32 %v3046_v0, %v2076_v33 }
 0x20b   : > { %v3195_v34 = vmax.f32 %v3163_v6, 0.0  ;;  %v3164_v59 = vadd.f32 %v4383_v15, %v5767_v58 }
 0x20c   : > { %v3193_v55 = vmax.f32 %v3161_v61, 0.0  ;;  %v3162_v5 = vadd.f32 %v4384_v2, %v5767_v58 }
 0x20d   : > { %v3803_v39 = vpack.c.bf16 %v3195_v34, %v3195_v34  ;;  %v3196_v22 = vmax.f32 %v3164_v59, 0.0 }
 0x20e   : > { %v3801_v43 = vpack.c.bf16 %v3193_v55, %v3193_v55  ;;  %v3194_v24 = vmax.f32 %v3162_v5, 0.0  ;;  %v4187_v12 = vpop.f32.mrb[20].mxu1  ;;  %v4347_v29 = vpop.f32.mrb[20].mxu0 }
 0x20f   : > { %3356 = vst.msk [vmem:[%s5776_s29 + $0x48] sm:$0xf] %vm3337_vm7, %v3803_v39  ;;  %v3804_v50 = vpack.c.bf16 %v3196_v22, %v3196_v22  ;;  %v4385_v62 = vadd.f32 %v4347_v29, %v4187_v12  ;;  %v2089_v38 = vpop.f32.mrb[21].mxu1  ;;  %v3059_v28 = vpop.f32.mrb[21].mxu0 }
 0x210   : > { %3354 = vst.msk [vmem:[%s5776_s29 + $0x40] sm:$0xf] %vm3337_vm7, %v3801_v43  ;;  %v3802_v13 = vpack.c.bf16 %v3194_v24, %v3194_v24  ;;  %v4386_v20 = vadd.f32 %v3059_v28, %v2089_v38  ;;  %v4188_v63 = vpop.f32.mrb[22].mxu1  ;;  %v4348_v54 = vpop.f32.mrb[22].mxu0 }
 0x211   : > { %3357 = vst.msk [vmem:[%s5776_s29 + $0x4c] sm:$0xf] %vm3337_vm7, %v3804_v50  ;;  %v3167_v19 = vadd.f32 %v4385_v62, %v5767_v58  ;;  %v4387_v57 = vadd.f32 %v4348_v54, %v4188_v63  ;;  %v2092_v25 = vpop.f32.mrb[23].mxu1  ;;  %v3062_v44 = vpop.f32.mrb[23].mxu0 }
 0x212   : > { %3355 = vst.msk [vmem:[%s5776_s29 + $0x44] sm:$0xf] %vm3337_vm7, %v3802_v13  ;;  %v3165_v18 = vadd.f32 %v4386_v20, %v5767_v58  ;;  %v4388_v4 = vadd.f32 %v3062_v44, %v2092_v25 }
 0x213   : > { %v3199_v27 = vmax.f32 %v3167_v19, 0.0  ;;  %v3168_v35 = vadd.f32 %v4387_v57, %v5767_v58 }
 0x214   : > { %v3197_v1 = vmax.f32 %v3165_v18, 0.0  ;;  %v3166_v32 = vadd.f32 %v4388_v4, %v5767_v58 }
 0x215   : > { %v3807_v47 = vpack.c.bf16 %v3199_v27, %v3199_v27  ;;  %v3200_v8 = vmax.f32 %v3168_v35, 0.0 }
 0x216   : > { %v3805_v31 = vpack.c.bf16 %v3197_v1, %v3197_v1  ;;  %v3198_v14 = vmax.f32 %v3166_v32, 0.0  ;;  %v4191_v9 = vpop.f32.mrb[24].mxu1  ;;  %v4351_v42 = vpop.f32.mrb[24].mxu0 }
 0x217   : > { %3360 = vst.msk [vmem:[%s5776_s29 + $0x58] sm:$0xf] %vm3337_vm7, %v3807_v47  ;;  %v3808_v46 = vpack.c.bf16 %v3200_v8, %v3200_v8  ;;  %v4389_v21 = vadd.f32 %v4351_v42, %v4191_v9  ;;  %v2105_v3 = vpop.f32.mrb[25].mxu1  ;;  %v3075_v52 = vpop.f32.mrb[25].mxu0 }
 0x218   : > { %3358 = vst.msk [vmem:[%s5776_s29 + $0x50] sm:$0xf] %vm3337_vm7, %v3805_v31  ;;  %v3806_v60 = vpack.c.bf16 %v3198_v14, %v3198_v14  ;;  %v4390_v45 = vadd.f32 %v3075_v52, %v2105_v3  ;;  %v4192_v10 = vpop.f32.mrb[26].mxu1  ;;  %v4352_v49 = vpop.f32.mrb[26].mxu0 }
 0x219   : > { %3361 = vst.msk [vmem:[%s5776_s29 + $0x5c] sm:$0xf] %vm3337_vm7, %v3808_v46  ;;  %v3171_v16 = vadd.f32 %v4389_v21, %v5767_v58  ;;  %v4391_v41 = vadd.f32 %v4352_v49, %v4192_v10  ;;  %v2108_v40 = vpop.f32.mrb[27].mxu1  ;;  %v3078_v17 = vpop.f32.mrb[27].mxu0 }
 0x21a   : > { %3359 = vst.msk [vmem:[%s5776_s29 + $0x54] sm:$0xf] %vm3337_vm7, %v3806_v60  ;;  %v3169_v56 = vadd.f32 %v4390_v45, %v5767_v58  ;;  %v4392_v51 = vadd.f32 %v3078_v17, %v2108_v40 }
 0x21b   : > { %v3203_v30 = vmax.f32 %v3171_v16, 0.0  ;;  %v3172_v26 = vadd.f32 %v4391_v41, %v5767_v58 }
 0x21c   : > { %v3201_v23 = vmax.f32 %v3169_v56, 0.0  ;;  %v3170_v53 = vadd.f32 %v4392_v51, %v5767_v58 }
 0x21d   : > { %v3811_v37 = vpack.c.bf16 %v3203_v30, %v3203_v30  ;;  %v3204_v7 = vmax.f32 %v3172_v26, 0.0 }
 0x21e   : > { %v3809_v48 = vpack.c.bf16 %v3201_v23, %v3201_v23  ;;  %v3202_v36 = vmax.f32 %v3170_v53, 0.0  ;;  %v4195_v11 = vpop.f32.mrb[28].mxu1  ;;  %v4355_v6 = vpop.f32.mrb[28].mxu0 }
 0x21f   : > { %3364 = vst.msk [vmem:[%s5776_s29 + $0x68] sm:$0xf] %vm3337_vm7, %v3811_v37  ;;  %v3812_v15 = vpack.c.bf16 %v3204_v7, %v3204_v7  ;;  %v4393_v33 = vadd.f32 %v4355_v6, %v4195_v11  ;;  %v2121_v0 = vpop.f32.mrb[29].mxu1  ;;  %v3091_v61 = vpop.f32.mrb[29].mxu0 }
 0x220   : > { %3362 = vst.msk [vmem:[%s5776_s29 + $0x60] sm:$0xf] %vm3337_vm7, %v3809_v48  ;;  %v3810_v2 = vpack.c.bf16 %v3202_v36, %v3202_v36  ;;  %v4394_v34 = vadd.f32 %v3091_v61, %v2121_v0  ;;  %v4196_v59 = vpop.f32.mrb[30].mxu1  ;;  %v4356_v55 = vpop.f32.mrb[30].mxu0 }
 0x221   : > { %3365 = vst.msk [vmem:[%s5776_s29 + $0x6c] sm:$0xf] %vm3337_vm7, %v3812_v15  ;;  %v3175_v5 = vadd.f32 %v4393_v33, %v5767_v58  ;;  %v4395_v39 = vadd.f32 %v4356_v55, %v4196_v59  ;;  %v2124_v22 = vpop.f32.mrb[31].mxu1  ;;  %v3094_v43 = vpop.f32.mrb[31].mxu0 }
 0x222   : > { %3363 = vst.msk [vmem:[%s5776_s29 + $0x64] sm:$0xf] %vm3337_vm7, %v3810_v2  ;;  %v3173_v24 = vadd.f32 %v4394_v34, %v5767_v58  ;;  %v4396_v12 = vadd.f32 %v3094_v43, %v2124_v22 }
 0x223   : > { %v3207_v29 = vmax.f32 %v3175_v5, 0.0  ;;  %v3176_v50 = vadd.f32 %v4395_v39, %v5767_v58 }
 0x224   : > { %v3205_v62 = vmax.f32 %v3173_v24, 0.0  ;;  %v3174_v38 = vadd.f32 %v4396_v12, %v5767_v58 }
 0x225   : > { %v3815_v28 = vpack.c.bf16 %v3207_v29, %v3207_v29  ;;  %v3208_v13 = vmax.f32 %v3176_v50, 0.0 }
 0x226   : > { %v3813_v20 = vpack.c.bf16 %v3205_v62, %v3205_v62  ;;  %v3206_v63 = vmax.f32 %v3174_v38, 0.0 }
 0x227   : > { %3368 = vst.msk [vmem:[%s5776_s29 + $0x78] sm:$0xf] %vm3337_vm7, %v3815_v28  ;;  %v3816_v54 = vpack.c.bf16 %v3208_v13, %v3208_v13 }
 0x228   : > { %3366 = vst.msk [vmem:[%s5776_s29 + $0x70] sm:$0xf] %vm3337_vm7, %v3813_v20  ;;  %v3814_v19 = vpack.c.bf16 %v3206_v63, %v3206_v63 }
 0x229   : > { %3369 = vst.msk [vmem:[%s5776_s29 + $0x7c] sm:$0xf] %vm3337_vm7, %v3816_v54 }
 0x22a   : > { %3367 = vst.msk [vmem:[%s5776_s29 + $0x74] sm:$0xf] %vm3337_vm7, %v3814_v19 }
 0x22b PF: > { %s13_s12 = sadd.s32 1, %s4697_s12  }
 0x22c   : > { %p10_p4 = scmp.ge.s32.totalorder %s13_s12, 4  }
 0x22e   :  { %12 = sbr.rel (!%p10_p4) target bundleno = 1 (0x1), region = 70 }

</bundles_post_ra>
